<compile_context>
chip_gen: v5e
topology: v5e:2x2
jax: 0.10.0
libtpu: 0.0.40
codegen_flags: <defaults>
</compile_context>

<pallas_src>
import functools

import jax
import jax.numpy as jnp
from jax import lax
from jax.experimental import pallas as pl
from jax.experimental.pallas import tpu as pltpu


def _bottleneck_kernel(x_ref, w1_ref, b1_ref, w2_ref, b2_ref, w3_ref, b3_ref,
                       o_ref, pad_ref, acc_ref, *, dilation):
    d = dilation
    _, H, W, Cin = x_ref.shape
    Cmid = w1_ref.shape[1]
    HW = H * W
    Hp = H + 2 * d

    # Zero only the H-halo rows of the scratch (interior is overwritten below).
    zrow = jnp.zeros((d, W, Cmid), jnp.float32)
    pad_ref[0:d] = zrow
    pad_ref[d + H:d + H + d] = zrow

    x = x_ref[0]                                        # (H, W, Cin) f32
    x_bf = x.reshape(HW, Cin).astype(jnp.bfloat16)

    # ---- conv1: 1x1 conv (channel matmul, bf16 MXU) + folded BN + ReLU.
    t1 = jnp.dot(x_bf, w1_ref[...], preferred_element_type=jnp.float32)
    t1 = jnp.maximum(t1 + b1_ref[...], 0.0)             # (HW, Cmid) f32
    pad_ref[d:d + H] = t1.reshape(H, W, Cmid)           # aligned full-plane store

    # ---- conv2: 3x3 dilated conv as 9 shifted matmuls.
    # H shifts: leading-dim slices of the H-padded scratch (always aligned).
    # W shifts: pltpu.roll along W (XLU slot, idle next to the MXU) + a column
    # mask that reproduces the zero padding along W.
    acc_ref[...] = jnp.broadcast_to(b2_ref[...], (HW, Cmid))   # bias-initialized
    col = lax.broadcasted_iota(jnp.int32, (Hp, W, Cmid), 1)    # hoisted once
    for tx in range(3):
        dx = (tx - 1) * d
        padded = pad_ref[...]                            # (Hp, W, Cmid) f32
        if dx == 0:
            shifted = padded
        elif dx > 0:
            shifted = pltpu.roll(padded, shift=W - dx, axis=1)
            shifted = jnp.where(col < W - dx, shifted, 0.0)
        else:
            shifted = pltpu.roll(padded, shift=-dx, axis=1)
            shifted = jnp.where(col >= -dx, shifted, 0.0)
        shifted = shifted.astype(jnp.bfloat16)
        for ty in range(3):
            lhs = shifted[ty * d:ty * d + H].reshape(HW, Cmid)
            acc_ref[...] += jnp.dot(lhs, w2_ref[ty * 3 + tx],
                                    preferred_element_type=jnp.float32)
    t2 = jnp.maximum(acc_ref[...], 0.0)                  # (HW, Cmid) f32

    # ---- conv3: 1x1 conv back to Cin + folded BN + ReLU, then residual add.
    t3 = jnp.dot(t2.astype(jnp.bfloat16), w3_ref[...],
                 preferred_element_type=jnp.float32)
    t3 = jnp.maximum(t3 + b3_ref[...], 0.0)              # (HW, Cin) f32
    o_ref[0] = (t3.reshape(H, W, Cin) + x).astype(o_ref.dtype)


def bottleneck_pallas(x_nhwc, w1, b1, w2, b2, w3, b3, *, dilation):
    """x_nhwc: (N, H, W, Cin) f32; w1: (Cin, Cmid); w2: (9, Cmid, Cmid);
    w3: (Cmid, Cin); biases are (1, C) row vectors (BN already folded)."""
    N, H, W, Cin = x_nhwc.shape
    Cmid = w1.shape[1]
    d = dilation
    assert 0 < d < min(H, W)

    # bf16 weights for native MXU throughput (accumulation stays f32).
    w1_bf = w1.astype(jnp.bfloat16)
    w2_bf = w2.astype(jnp.bfloat16)
    w3_bf = w3.astype(jnp.bfloat16)

    kernel = functools.partial(_bottleneck_kernel, dilation=d)

    # Scoped-VMEM budget: double-buffered input/output blocks + bf16 weights +
    # the two scratch buffers, with 2x headroom.
    est_bytes = (
        4 * H * W * Cin * 4                                      # x + out blocks
        + 4 * (Cin * Cmid + 9 * Cmid * Cmid + Cmid * Cin)        # bf16 weights
        + 4 * (Cmid + Cin) * 4                                   # biases
        + (H + 2 * d) * W * Cmid * 4                             # pad scratch
        + H * W * Cmid * 4                                       # acc scratch
    )
    vmem_limit = int(min(48 * 1024 * 1024, max(16 * 1024 * 1024, 2 * est_bytes)))

    grid_spec = pltpu.PrefetchScalarGridSpec(
        num_scalar_prefetch=0,
        grid=(N,),
        in_specs=[
            pl.BlockSpec((1, H, W, Cin), lambda n: (n, 0, 0, 0)),
            pl.BlockSpec((Cin, Cmid), lambda n: (0, 0)),
            pl.BlockSpec((1, Cmid), lambda n: (0, 0)),
            pl.BlockSpec((9, Cmid, Cmid), lambda n: (0, 0, 0)),
            pl.BlockSpec((1, Cmid), lambda n: (0, 0)),
            pl.BlockSpec((Cmid, Cin), lambda n: (0, 0)),
            pl.BlockSpec((1, Cin), lambda n: (0, 0)),
        ],
        out_specs=pl.BlockSpec((1, H, W, Cin), lambda n: (n, 0, 0, 0)),
        scratch_shapes=[
            pltpu.VMEM((H + 2 * d, W, Cmid), jnp.float32),   # H-padded t1
            pltpu.VMEM((H * W, Cmid), jnp.float32),          # conv2 accumulator
        ],
    )

    return pl.pallas_call(
        kernel,
        out_shape=jax.ShapeDtypeStruct((N, H, W, Cin), jnp.float32),
        grid_spec=grid_spec,
        compiler_params=pltpu.CompilerParams(
            dimension_semantics=("parallel",),
            vmem_limit_bytes=vmem_limit),
    )(x_nhwc, w1_bf, b1, w2_bf, b2, w3_bf, b3)


# ----------------------------- parameter setup -----------------------------

def _fold_bn(w, b, gamma, beta, mean, var, eps=1e-5):
    """Fold eval-mode BatchNorm into the preceding conv. w's last axis = Cout."""
    s = gamma / jnp.sqrt(var + eps)
    return w * s, (b - mean) * s + beta


def make_params(key, in_channels, mid_channels):
    ks = jax.random.split(key, 12)
    f32 = jnp.float32

    def bn_params(k, c):
        k1, k2, k3, k4 = jax.random.split(k, 4)
        gamma = 0.5 + jax.random.uniform(k1, (c,), f32)
        beta = 0.1 * jax.random.normal(k2, (c,), f32)
        mean = 0.1 * jax.random.normal(k3, (c,), f32)
        var = 0.5 + jax.random.uniform(k4, (c,), f32)
        return gamma, beta, mean, var

    # conv1: 1x1, in -> mid   (stored as (Cin, Cmid), i.e. channel matmul)
    w1 = 0.1 * jax.random.normal(ks[0], (in_channels, mid_channels), f32)
    b1 = 0.05 * jax.random.normal(ks[1], (mid_channels,), f32)
    w1, b1 = _fold_bn(w1, b1, *bn_params(ks[2], mid_channels))

    # conv2: 3x3 dilated, mid -> mid   (stored HWIO (3,3,Cmid,Cmid))
    w2 = 0.1 * jax.random.normal(ks[3], (3, 3, mid_channels, mid_channels), f32)
    b2 = 0.05 * jax.random.normal(ks[4], (mid_channels,), f32)
    w2, b2 = _fold_bn(w2, b2, *bn_params(ks[5], mid_channels))

    # conv3: 1x1, mid -> in
    w3 = 0.1 * jax.random.normal(ks[6], (mid_channels, in_channels), f32)
    b3 = 0.05 * jax.random.normal(ks[7], (in_channels,), f32)
    w3, b3 = _fold_bn(w3, b3, *bn_params(ks[8], in_channels))

    return (w1, b1.reshape(1, -1),
            w2.reshape(9, mid_channels, mid_channels), b2.reshape(1, -1),
            w3, b3.reshape(1, -1))


# --------------------------- pure-JAX reference -----------------------------

def bottleneck_ref(x_nhwc, w1, b1, w2, b2, w3, b3, *, dilation):
    """Reference with the kernel's numerics: matmul/conv operands rounded to
    bf16, accumulation / bias / ReLU / residual in f32."""
    d = dilation
    Cmid = w1.shape[1]
    r = lambda a: a.astype(jnp.bfloat16).astype(jnp.float32)
    t1 = jnp.maximum(jnp.einsum('nhwc,cd->nhwd', r(x_nhwc), r(w1)) + b1[0], 0.0)
    w2_hwio = r(w2).reshape(3, 3, Cmid, Cmid)
    t2 = lax.conv_general_dilated(
        r(t1), w2_hwio, window_strides=(1, 1), padding=[(d, d), (d, d)],
        rhs_dilation=(d, d), dimension_numbers=('NHWC', 'HWIO', 'NHWC'))
    t2 = jnp.maximum(t2 + b2[0], 0.0)
    t3 = jnp.maximum(jnp.einsum('nhwd,dc->nhwc', r(t2), r(w3)) + b3[0], 0.0)
    return t3 + x_nhwc


# --------------------------------- driver -----------------------------------

if __name__ == "__main__":
    # Small but lane-dense shapes (channels are multiples of 128 so MXU tiles
    # and output stores are unmasked); YOLOF production uses Cin=512, Cmid=128.
    N, Cin, Cmid, H, W = 2, 128, 128, 16, 16
    dilation = 2

    key = jax.random.PRNGKey(0)
    kx, kp = jax.random.split(key)

    # PyTorch-style NCHW input -> NHWC for the kernel.
    x_nchw = jax.random.normal(kx, (N, Cin, H, W), jnp.float32)
    x_nhwc = jnp.transpose(x_nchw, (0, 2, 3, 1))

    w1, b1, w2, b2, w3, b3 = make_params(kp, Cin, Cmid)

    out = bottleneck_pallas(x_nhwc, w1, b1, w2, b2, w3, b3, dilation=dilation)
    out = jax.block_until_ready(out)

    ref = bottleneck_ref(x_nhwc, w1, b1, w2, b2, w3, b3, dilation=dilation)
    assert out.shape == (N, H, W, Cin)
    max_err = float(jnp.max(jnp.abs(out - ref)))
    assert jnp.allclose(out, ref, atol=1e-2, rtol=1e-2), max_err

    print("KERNEL_OK")
</pallas_src>

<mosaic_0001>
module attributes {stable_mosaic.version = 11 : i64} {
  func.func @_bottleneck_kernel(%arg0: i32, %arg1: memref<1x16x16x128xf32, #tpu.memory_space<vmem>>, %arg2: memref<128x128xbf16, #tpu.memory_space<vmem>>, %arg3: memref<1x128xf32, #tpu.memory_space<vmem>>, %arg4: memref<9x128x128xbf16, #tpu.memory_space<vmem>>, %arg5: memref<1x128xf32, #tpu.memory_space<vmem>>, %arg6: memref<128x128xbf16, #tpu.memory_space<vmem>>, %arg7: memref<1x128xf32, #tpu.memory_space<vmem>>, %arg8: memref<1x16x16x128xf32, #tpu.memory_space<vmem>>, %arg9: memref<20x16x128xf32, #tpu.memory_space<vmem>>, %arg10: memref<256x128xf32, #tpu.memory_space<vmem>>) attributes {dimension_semantics = [#tpu.dimension_semantics<parallel>], iteration_bounds = array<i64: 2>, scalar_prefetch = 0 : i64, scratch_operands = 2 : i64, tpu.core_type = #tpu.core_type<tc>, window_params = [{transform_indices = @transform_0, window_bounds = array<i64: 1, 16, 16, 128>}, {pipeline_mode = #tpu.pipeline_mode<synchronous>, transform_indices = @transform_1, window_bounds = array<i64: 128, 128>}, {pipeline_mode = #tpu.pipeline_mode<synchronous>, transform_indices = @transform_2, window_bounds = array<i64: 1, 128>}, {pipeline_mode = #tpu.pipeline_mode<synchronous>, transform_indices = @transform_3, window_bounds = array<i64: 9, 128, 128>}, {pipeline_mode = #tpu.pipeline_mode<synchronous>, transform_indices = @transform_4, window_bounds = array<i64: 1, 128>}, {pipeline_mode = #tpu.pipeline_mode<synchronous>, transform_indices = @transform_5, window_bounds = array<i64: 128, 128>}, {pipeline_mode = #tpu.pipeline_mode<synchronous>, transform_indices = @transform_6, window_bounds = array<i64: 1, 128>}, {transform_indices = @transform_7, window_bounds = array<i64: 1, 16, 16, 128>}]} {
    %cst = arith.constant 0.000000e+00 : f32
    %0 = vector.broadcast %cst : f32 to vector<2x16x128xf32>
    %c0 = arith.constant 0 : index
    %c0_0 = arith.constant 0 : index
    %c0_1 = arith.constant 0 : index
    %1 = vector.load %arg9[%c0, %c0_0, %c0_1] : memref<20x16x128xf32, #tpu.memory_space<vmem>>, vector<2x16x128xf32>
    tpu.vector_store %arg9[%c0, %c0_0, %c0_1], %0 {strides = array<i32>} : memref<20x16x128xf32, #tpu.memory_space<vmem>>, vector<2x16x128xf32>,
    %c18 = arith.constant 18 : index
    %c0_2 = arith.constant 0 : index
    %c0_3 = arith.constant 0 : index
    %2 = vector.load %arg9[%c18, %c0_2, %c0_3] : memref<20x16x128xf32, #tpu.memory_space<vmem>>, vector<2x16x128xf32>
    tpu.vector_store %arg9[%c18, %c0_2, %c0_3], %0 {strides = array<i32>} : memref<20x16x128xf32, #tpu.memory_space<vmem>>, vector<2x16x128xf32>,
    %c0_4 = arith.constant 0 : index
    %c0_5 = arith.constant 0 : index
    %c0_6 = arith.constant 0 : index
    %c0_7 = arith.constant 0 : index
    %3 = vector.load %arg1[%c0_4, %c0_5, %c0_6, %c0_7] : memref<1x16x16x128xf32, #tpu.memory_space<vmem>>, vector<1x16x16x128xf32>
    %4 = vector.shape_cast %3 : vector<1x16x16x128xf32> to vector<16x16x128xf32>
    %5 = vector.shape_cast %4 : vector<16x16x128xf32> to vector<256x128xf32>
    %6 = arith.truncf %5 : vector<256x128xf32> to vector<256x128xbf16>
    %c0_8 = arith.constant 0 : index
    %c0_9 = arith.constant 0 : index
    %7 = vector.load %arg2[%c0_8, %c0_9] : memref<128x128xbf16, #tpu.memory_space<vmem>>, vector<128x128xbf16>
    %cst_10 = arith.constant dense<0.000000e+00> : vector<256x128xf32>
    %8 = tpu.matmul %6, %7, %cst_10 {dimension_numbers = #tpu.dot_dimension_numbers<[1], [0], [0], [1], [0, 0, 1, 1], [], []>} : vector<256x128xbf16>, vector<128x128xbf16>, vector<256x128xf32> -> vector<256x128xf32>
    %c0_11 = arith.constant 0 : index
    %c0_12 = arith.constant 0 : index
    %9 = vector.load %arg3[%c0_11, %c0_12] : memref<1x128xf32, #tpu.memory_space<vmem>>, vector<1x128xf32>
    %10 = vector.broadcast %9 : vector<1x128xf32> to vector<256x128xf32>
    %11 = arith.addf %8, %10 : vector<256x128xf32>
    %cst_13 = arith.constant 0.000000e+00 : f32
    %12 = vector.broadcast %cst_13 : f32 to vector<256x128xf32>
    %13 = arith.maximumf %11, %12 : vector<256x128xf32>
    %14 = vector.shape_cast %13 : vector<256x128xf32> to vector<16x16x128xf32>
    %c2 = arith.constant 2 : index
    %c0_14 = arith.constant 0 : index
    %c0_15 = arith.constant 0 : index
    %15 = vector.load %arg9[%c2, %c0_14, %c0_15] : memref<20x16x128xf32, #tpu.memory_space<vmem>>, vector<16x16x128xf32>
    tpu.vector_store %arg9[%c2, %c0_14, %c0_15], %14 {strides = array<i32>} : memref<20x16x128xf32, #tpu.memory_space<vmem>>, vector<16x16x128xf32>,
    %c0_16 = arith.constant 0 : index
    %c0_17 = arith.constant 0 : index
    %16 = vector.load %arg5[%c0_16, %c0_17] : memref<1x128xf32, #tpu.memory_space<vmem>>, vector<1x128xf32>
    %17 = vector.shape_cast %16 : vector<1x128xf32> to vector<1x128xf32>
    %18 = vector.broadcast %17 : vector<1x128xf32> to vector<256x128xf32>
    %c0_18 = arith.constant 0 : index
    %c0_19 = arith.constant 0 : index
    %19 = vector.load %arg10[%c0_18, %c0_19] : memref<256x128xf32, #tpu.memory_space<vmem>>, vector<256x128xf32>
    tpu.vector_store %arg10[%c0_18, %c0_19], %18 {strides = array<i32>} : memref<256x128xf32, #tpu.memory_space<vmem>>, vector<256x128xf32>,
    %20 = tpu.iota {dimensions = array<i32: 1>} : vector<20x16x128xi32>
    %c0_20 = arith.constant 0 : index
    %c0_21 = arith.constant 0 : index
    %c0_22 = arith.constant 0 : index
    %21 = vector.load %arg9[%c0_20, %c0_21, %c0_22] : memref<20x16x128xf32, #tpu.memory_space<vmem>>, vector<20x16x128xf32>
    %c2_i32 = arith.constant 2 : i32
    %22 = tpu.dynamic_rotate %21 by %c2_i32 dim 1 : vector<20x16x128xf32>, i32 -> vector<20x16x128xf32>
    %c2_i32_23 = arith.constant 2 : i32
    %23 = vector.broadcast %c2_i32_23 : i32 to vector<20x16x128xi32>
    %24 = arith.cmpi sge, %20, %23 : vector<20x16x128xi32>
    %cst_24 = arith.constant 0.000000e+00 : f32
    %25 = vector.broadcast %cst_24 : f32 to vector<20x16x128xf32>
    %26 = arith.select %24, %22, %25 : vector<20x16x128xi1>, vector<20x16x128xf32>
    %27 = arith.truncf %26 : vector<20x16x128xf32> to vector<20x16x128xbf16>
    %28 = vector.extract_strided_slice %27 {offsets = [0, 0, 0], sizes = [16, 16, 128], strides = [1, 1, 1]} : vector<20x16x128xbf16> to vector<16x16x128xbf16>
    %29 = vector.shape_cast %28 : vector<16x16x128xbf16> to vector<256x128xbf16>
    %c0_25 = arith.constant 0 : index
    %c0_26 = arith.constant 0 : index
    %30 = vector.load %arg10[%c0_25, %c0_26] : memref<256x128xf32, #tpu.memory_space<vmem>>, vector<256x128xf32>
    %c0_27 = arith.constant 0 : index
    %c0_28 = arith.constant 0 : index
    %c0_29 = arith.constant 0 : index
    %31 = vector.load %arg4[%c0_27, %c0_28, %c0_29] : memref<9x128x128xbf16, #tpu.memory_space<vmem>>, vector<1x128x128xbf16>
    %32 = vector.shape_cast %31 : vector<1x128x128xbf16> to vector<128x128xbf16>
    %cst_30 = arith.constant dense<0.000000e+00> : vector<256x128xf32>
    %33 = tpu.matmul %29, %32, %cst_30 {dimension_numbers = #tpu.dot_dimension_numbers<[1], [0], [0], [1], [0, 0, 1, 1], [], []>} : vector<256x128xbf16>, vector<128x128xbf16>, vector<256x128xf32> -> vector<256x128xf32>
    %34 = arith.addf %30, %33 : vector<256x128xf32>
    %c0_31 = arith.constant 0 : index
    %c0_32 = arith.constant 0 : index
    %35 = vector.load %arg10[%c0_31, %c0_32] : memref<256x128xf32, #tpu.memory_space<vmem>>, vector<256x128xf32>
    tpu.vector_store %arg10[%c0_31, %c0_32], %34 {strides = array<i32>} : memref<256x128xf32, #tpu.memory_space<vmem>>, vector<256x128xf32>,
    %36 = vector.extract_strided_slice %27 {offsets = [2, 0, 0], sizes = [16, 16, 128], strides = [1, 1, 1]} : vector<20x16x128xbf16> to vector<16x16x128xbf16>
    %37 = vector.shape_cast %36 : vector<16x16x128xbf16> to vector<256x128xbf16>
    %c0_33 = arith.constant 0 : index
    %c0_34 = arith.constant 0 : index
    %38 = vector.load %arg10[%c0_33, %c0_34] : memref<256x128xf32, #tpu.memory_space<vmem>>, vector<256x128xf32>
    %c3 = arith.constant 3 : index
    %c0_35 = arith.constant 0 : index
    %c0_36 = arith.constant 0 : index
    %39 = vector.load %arg4[%c3, %c0_35, %c0_36] : memref<9x128x128xbf16, #tpu.memory_space<vmem>>, vector<1x128x128xbf16>
    %40 = vector.shape_cast %39 : vector<1x128x128xbf16> to vector<128x128xbf16>
    %cst_37 = arith.constant dense<0.000000e+00> : vector<256x128xf32>
    %41 = tpu.matmul %37, %40, %cst_37 {dimension_numbers = #tpu.dot_dimension_numbers<[1], [0], [0], [1], [0, 0, 1, 1], [], []>} : vector<256x128xbf16>, vector<128x128xbf16>, vector<256x128xf32> -> vector<256x128xf32>
    %42 = arith.addf %38, %41 : vector<256x128xf32>
    %c0_38 = arith.constant 0 : index
    %c0_39 = arith.constant 0 : index
    %43 = vector.load %arg10[%c0_38, %c0_39] : memref<256x128xf32, #tpu.memory_space<vmem>>, vector<256x128xf32>
    tpu.vector_store %arg10[%c0_38, %c0_39], %42 {strides = array<i32>} : memref<256x128xf32, #tpu.memory_space<vmem>>, vector<256x128xf32>,
    %44 = vector.extract_strided_slice %27 {offsets = [4, 0, 0], sizes = [16, 16, 128], strides = [1, 1, 1]} : vector<20x16x128xbf16> to vector<16x16x128xbf16>
    %45 = vector.shape_cast %44 : vector<16x16x128xbf16> to vector<256x128xbf16>
    %c0_40 = arith.constant 0 : index
    %c0_41 = arith.constant 0 : index
    %46 = vector.load %arg10[%c0_40, %c0_41] : memref<256x128xf32, #tpu.memory_space<vmem>>, vector<256x128xf32>
    %c6 = arith.constant 6 : index
    %c0_42 = arith.constant 0 : index
    %c0_43 = arith.constant 0 : index
    %47 = vector.load %arg4[%c6, %c0_42, %c0_43] : memref<9x128x128xbf16, #tpu.memory_space<vmem>>, vector<1x128x128xbf16>
    %48 = vector.shape_cast %47 : vector<1x128x128xbf16> to vector<128x128xbf16>
    %cst_44 = arith.constant dense<0.000000e+00> : vector<256x128xf32>
    %49 = tpu.matmul %45, %48, %cst_44 {dimension_numbers = #tpu.dot_dimension_numbers<[1], [0], [0], [1], [0, 0, 1, 1], [], []>} : vector<256x128xbf16>, vector<128x128xbf16>, vector<256x128xf32> -> vector<256x128xf32>
    %50 = arith.addf %46, %49 : vector<256x128xf32>
    %c0_45 = arith.constant 0 : index
    %c0_46 = arith.constant 0 : index
    %51 = vector.load %arg10[%c0_45, %c0_46] : memref<256x128xf32, #tpu.memory_space<vmem>>, vector<256x128xf32>
    tpu.vector_store %arg10[%c0_45, %c0_46], %50 {strides = array<i32>} : memref<256x128xf32, #tpu.memory_space<vmem>>, vector<256x128xf32>,
    %c0_47 = arith.constant 0 : index
    %c0_48 = arith.constant 0 : index
    %c0_49 = arith.constant 0 : index
    %52 = vector.load %arg9[%c0_47, %c0_48, %c0_49] : memref<20x16x128xf32, #tpu.memory_space<vmem>>, vector<20x16x128xf32>
    %53 = arith.truncf %52 : vector<20x16x128xf32> to vector<20x16x128xbf16>
    %54 = vector.extract_strided_slice %53 {offsets = [0, 0, 0], sizes = [16, 16, 128], strides = [1, 1, 1]} : vector<20x16x128xbf16> to vector<16x16x128xbf16>
    %55 = vector.shape_cast %54 : vector<16x16x128xbf16> to vector<256x128xbf16>
    %c0_50 = arith.constant 0 : index
    %c0_51 = arith.constant 0 : index
    %56 = vector.load %arg10[%c0_50, %c0_51] : memref<256x128xf32, #tpu.memory_space<vmem>>, vector<256x128xf32>
    %c1 = arith.constant 1 : index
    %c0_52 = arith.constant 0 : index
    %c0_53 = arith.constant 0 : index
    %57 = vector.load %arg4[%c1, %c0_52, %c0_53] : memref<9x128x128xbf16, #tpu.memory_space<vmem>>, vector<1x128x128xbf16>
    %58 = vector.shape_cast %57 : vector<1x128x128xbf16> to vector<128x128xbf16>
    %cst_54 = arith.constant dense<0.000000e+00> : vector<256x128xf32>
    %59 = tpu.matmul %55, %58, %cst_54 {dimension_numbers = #tpu.dot_dimension_numbers<[1], [0], [0], [1], [0, 0, 1, 1], [], []>} : vector<256x128xbf16>, vector<128x128xbf16>, vector<256x128xf32> -> vector<256x128xf32>
    %60 = arith.addf %56, %59 : vector<256x128xf32>
    %c0_55 = arith.constant 0 : index
    %c0_56 = arith.constant 0 : index
    %61 = vector.load %arg10[%c0_55, %c0_56] : memref<256x128xf32, #tpu.memory_space<vmem>>, vector<256x128xf32>
    tpu.vector_store %arg10[%c0_55, %c0_56], %60 {strides = array<i32>} : memref<256x128xf32, #tpu.memory_space<vmem>>, vector<256x128xf32>,
    %62 = vector.extract_strided_slice %53 {offsets = [2, 0, 0], sizes = [16, 16, 128], strides = [1, 1, 1]} : vector<20x16x128xbf16> to vector<16x16x128xbf16>
    %63 = vector.shape_cast %62 : vector<16x16x128xbf16> to vector<256x128xbf16>
    %c0_57 = arith.constant 0 : index
    %c0_58 = arith.constant 0 : index
    %64 = vector.load %arg10[%c0_57, %c0_58] : memref<256x128xf32, #tpu.memory_space<vmem>>, vector<256x128xf32>
    %c4 = arith.constant 4 : index
    %c0_59 = arith.constant 0 : index
    %c0_60 = arith.constant 0 : index
    %65 = vector.load %arg4[%c4, %c0_59, %c0_60] : memref<9x128x128xbf16, #tpu.memory_space<vmem>>, vector<1x128x128xbf16>
    %66 = vector.shape_cast %65 : vector<1x128x128xbf16> to vector<128x128xbf16>
    %cst_61 = arith.constant dense<0.000000e+00> : vector<256x128xf32>
    %67 = tpu.matmul %63, %66, %cst_61 {dimension_numbers = #tpu.dot_dimension_numbers<[1], [0], [0], [1], [0, 0, 1, 1], [], []>} : vector<256x128xbf16>, vector<128x128xbf16>, vector<256x128xf32> -> vector<256x128xf32>
    %68 = arith.addf %64, %67 : vector<256x128xf32>
    %c0_62 = arith.constant 0 : index
    %c0_63 = arith.constant 0 : index
    %69 = vector.load %arg10[%c0_62, %c0_63] : memref<256x128xf32, #tpu.memory_space<vmem>>, vector<256x128xf32>
    tpu.vector_store %arg10[%c0_62, %c0_63], %68 {strides = array<i32>} : memref<256x128xf32, #tpu.memory_space<vmem>>, vector<256x128xf32>,
    %70 = vector.extract_strided_slice %53 {offsets = [4, 0, 0], sizes = [16, 16, 128], strides = [1, 1, 1]} : vector<20x16x128xbf16> to vector<16x16x128xbf16>
    %71 = vector.shape_cast %70 : vector<16x16x128xbf16> to vector<256x128xbf16>
    %c0_64 = arith.constant 0 : index
    %c0_65 = arith.constant 0 : index
    %72 = vector.load %arg10[%c0_64, %c0_65] : memref<256x128xf32, #tpu.memory_space<vmem>>, vector<256x128xf32>
    %c7 = arith.constant 7 : index
    %c0_66 = arith.constant 0 : index
    %c0_67 = arith.constant 0 : index
    %73 = vector.load %arg4[%c7, %c0_66, %c0_67] : memref<9x128x128xbf16, #tpu.memory_space<vmem>>, vector<1x128x128xbf16>
    %74 = vector.shape_cast %73 : vector<1x128x128xbf16> to vector<128x128xbf16>
    %cst_68 = arith.constant dense<0.000000e+00> : vector<256x128xf32>
    %75 = tpu.matmul %71, %74, %cst_68 {dimension_numbers = #tpu.dot_dimension_numbers<[1], [0], [0], [1], [0, 0, 1, 1], [], []>} : vector<256x128xbf16>, vector<128x128xbf16>, vector<256x128xf32> -> vector<256x128xf32>
    %76 = arith.addf %72, %75 : vector<256x128xf32>
    %c0_69 = arith.constant 0 : index
    %c0_70 = arith.constant 0 : index
    %77 = vector.load %arg10[%c0_69, %c0_70] : memref<256x128xf32, #tpu.memory_space<vmem>>, vector<256x128xf32>
    tpu.vector_store %arg10[%c0_69, %c0_70], %76 {strides = array<i32>} : memref<256x128xf32, #tpu.memory_space<vmem>>, vector<256x128xf32>,
    %c0_71 = arith.constant 0 : index
    %c0_72 = arith.constant 0 : index
    %c0_73 = arith.constant 0 : index
    %78 = vector.load %arg9[%c0_71, %c0_72, %c0_73] : memref<20x16x128xf32, #tpu.memory_space<vmem>>, vector<20x16x128xf32>
    %c14_i32 = arith.constant 14 : i32
    %79 = tpu.dynamic_rotate %78 by %c14_i32 dim 1 : vector<20x16x128xf32>, i32 -> vector<20x16x128xf32>
    %c14_i32_74 = arith.constant 14 : i32
    %80 = vector.broadcast %c14_i32_74 : i32 to vector<20x16x128xi32>
    %81 = arith.cmpi slt, %20, %80 : vector<20x16x128xi32>
    %cst_75 = arith.constant 0.000000e+00 : f32
    %82 = vector.broadcast %cst_75 : f32 to vector<20x16x128xf32>
    %83 = arith.select %81, %79, %82 : vector<20x16x128xi1>, vector<20x16x128xf32>
    %84 = arith.truncf %83 : vector<20x16x128xf32> to vector<20x16x128xbf16>
    %85 = vector.extract_strided_slice %84 {offsets = [0, 0, 0], sizes = [16, 16, 128], strides = [1, 1, 1]} : vector<20x16x128xbf16> to vector<16x16x128xbf16>
    %86 = vector.shape_cast %85 : vector<16x16x128xbf16> to vector<256x128xbf16>
    %c0_76 = arith.constant 0 : index
    %c0_77 = arith.constant 0 : index
    %87 = vector.load %arg10[%c0_76, %c0_77] : memref<256x128xf32, #tpu.memory_space<vmem>>, vector<256x128xf32>
    %c2_78 = arith.constant 2 : index
    %c0_79 = arith.constant 0 : index
    %c0_80 = arith.constant 0 : index
    %88 = vector.load %arg4[%c2_78, %c0_79, %c0_80] : memref<9x128x128xbf16, #tpu.memory_space<vmem>>, vector<1x128x128xbf16>
    %89 = vector.shape_cast %88 : vector<1x128x128xbf16> to vector<128x128xbf16>
    %cst_81 = arith.constant dense<0.000000e+00> : vector<256x128xf32>
    %90 = tpu.matmul %86, %89, %cst_81 {dimension_numbers = #tpu.dot_dimension_numbers<[1], [0], [0], [1], [0, 0, 1, 1], [], []>} : vector<256x128xbf16>, vector<128x128xbf16>, vector<256x128xf32> -> vector<256x128xf32>
    %91 = arith.addf %87, %90 : vector<256x128xf32>
    %c0_82 = arith.constant 0 : index
    %c0_83 = arith.constant 0 : index
    %92 = vector.load %arg10[%c0_82, %c0_83] : memref<256x128xf32, #tpu.memory_space<vmem>>, vector<256x128xf32>
    tpu.vector_store %arg10[%c0_82, %c0_83], %91 {strides = array<i32>} : memref<256x128xf32, #tpu.memory_space<vmem>>, vector<256x128xf32>,
    %93 = vector.extract_strided_slice %84 {offsets = [2, 0, 0], sizes = [16, 16, 128], strides = [1, 1, 1]} : vector<20x16x128xbf16> to vector<16x16x128xbf16>
    %94 = vector.shape_cast %93 : vector<16x16x128xbf16> to vector<256x128xbf16>
    %c0_84 = arith.constant 0 : index
    %c0_85 = arith.constant 0 : index
    %95 = vector.load %arg10[%c0_84, %c0_85] : memref<256x128xf32, #tpu.memory_space<vmem>>, vector<256x128xf32>
    %c5 = arith.constant 5 : index
    %c0_86 = arith.constant 0 : index
    %c0_87 = arith.constant 0 : index
    %96 = vector.load %arg4[%c5, %c0_86, %c0_87] : memref<9x128x128xbf16, #tpu.memory_space<vmem>>, vector<1x128x128xbf16>
    %97 = vector.shape_cast %96 : vector<1x128x128xbf16> to vector<128x128xbf16>
    %cst_88 = arith.constant dense<0.000000e+00> : vector<256x128xf32>
    %98 = tpu.matmul %94, %97, %cst_88 {dimension_numbers = #tpu.dot_dimension_numbers<[1], [0], [0], [1], [0, 0, 1, 1], [], []>} : vector<256x128xbf16>, vector<128x128xbf16>, vector<256x128xf32> -> vector<256x128xf32>
    %99 = arith.addf %95, %98 : vector<256x128xf32>
    %c0_89 = arith.constant 0 : index
    %c0_90 = arith.constant 0 : index
    %100 = vector.load %arg10[%c0_89, %c0_90] : memref<256x128xf32, #tpu.memory_space<vmem>>, vector<256x128xf32>
    tpu.vector_store %arg10[%c0_89, %c0_90], %99 {strides = array<i32>} : memref<256x128xf32, #tpu.memory_space<vmem>>, vector<256x128xf32>,
    %101 = vector.extract_strided_slice %84 {offsets = [4, 0, 0], sizes = [16, 16, 128], strides = [1, 1, 1]} : vector<20x16x128xbf16> to vector<16x16x128xbf16>
    %102 = vector.shape_cast %101 : vector<16x16x128xbf16> to vector<256x128xbf16>
    %c0_91 = arith.constant 0 : index
    %c0_92 = arith.constant 0 : index
    %103 = vector.load %arg10[%c0_91, %c0_92] : memref<256x128xf32, #tpu.memory_space<vmem>>, vector<256x128xf32>
    %c8 = arith.constant 8 : index
    %c0_93 = arith.constant 0 : index
    %c0_94 = arith.constant 0 : index
    %104 = vector.load %arg4[%c8, %c0_93, %c0_94] : memref<9x128x128xbf16, #tpu.memory_space<vmem>>, vector<1x128x128xbf16>
    %105 = vector.shape_cast %104 : vector<1x128x128xbf16> to vector<128x128xbf16>
    %cst_95 = arith.constant dense<0.000000e+00> : vector<256x128xf32>
    %106 = tpu.matmul %102, %105, %cst_95 {dimension_numbers = #tpu.dot_dimension_numbers<[1], [0], [0], [1], [0, 0, 1, 1], [], []>} : vector<256x128xbf16>, vector<128x128xbf16>, vector<256x128xf32> -> vector<256x128xf32>
    %107 = arith.addf %103, %106 : vector<256x128xf32>
    %c0_96 = arith.constant 0 : index
    %c0_97 = arith.constant 0 : index
    %108 = vector.load %arg10[%c0_96, %c0_97] : memref<256x128xf32, #tpu.memory_space<vmem>>, vector<256x128xf32>
    tpu.vector_store %arg10[%c0_96, %c0_97], %107 {strides = array<i32>} : memref<256x128xf32, #tpu.memory_space<vmem>>, vector<256x128xf32>,
    %c0_98 = arith.constant 0 : index
    %c0_99 = arith.constant 0 : index
    %109 = vector.load %arg10[%c0_98, %c0_99] : memref<256x128xf32, #tpu.memory_space<vmem>>, vector<256x128xf32>
    %cst_100 = arith.constant 0.000000e+00 : f32
    %110 = vector.broadcast %cst_100 : f32 to vector<256x128xf32>
    %111 = arith.maximumf %109, %110 : vector<256x128xf32>
    %112 = arith.truncf %111 : vector<256x128xf32> to vector<256x128xbf16>
    %c0_101 = arith.constant 0 : index
    %c0_102 = arith.constant 0 : index
    %113 = vector.load %arg6[%c0_101, %c0_102] : memref<128x128xbf16, #tpu.memory_space<vmem>>, vector<128x128xbf16>
    %cst_103 = arith.constant dense<0.000000e+00> : vector<256x128xf32>
    %114 = tpu.matmul %112, %113, %cst_103 {dimension_numbers = #tpu.dot_dimension_numbers<[1], [0], [0], [1], [0, 0, 1, 1], [], []>} : vector<256x128xbf16>, vector<128x128xbf16>, vector<256x128xf32> -> vector<256x128xf32>
    %c0_104 = arith.constant 0 : index
    %c0_105 = arith.constant 0 : index
    %115 = vector.load %arg7[%c0_104, %c0_105] : memref<1x128xf32, #tpu.memory_space<vmem>>, vector<1x128xf32>
    %116 = vector.broadcast %115 : vector<1x128xf32> to vector<256x128xf32>
    %117 = arith.addf %114, %116 : vector<256x128xf32>
    %cst_106 = arith.constant 0.000000e+00 : f32
    %118 = vector.broadcast %cst_106 : f32 to vector<256x128xf32>
    %119 = arith.maximumf %117, %118 : vector<256x128xf32>
    %120 = vector.shape_cast %119 : vector<256x128xf32> to vector<16x16x128xf32>
    %121 = arith.addf %120, %4 : vector<16x16x128xf32>
    %c0_107 = arith.constant 0 : index
    %c0_108 = arith.constant 0 : index
    %c0_109 = arith.constant 0 : index
    %c0_110 = arith.constant 0 : index
    %122 = vector.load %arg8[%c0_107, %c0_108, %c0_109, %c0_110] : memref<1x16x16x128xf32, #tpu.memory_space<vmem>>, vector<1x16x16x128xf32>
    %123 = vector.shape_cast %122 : vector<1x16x16x128xf32> to vector<16x16x128xf32>
    %124 = vector.shape_cast %121 : vector<16x16x128xf32> to vector<1x16x16x128xf32>
    tpu.vector_store %arg8[%c0_107, %c0_108, %c0_109, %c0_110], %124 {strides = array<i32>} : memref<1x16x16x128xf32, #tpu.memory_space<vmem>>, vector<1x16x16x128xf32>,
    return
  }
  func.func @transform_0(%arg0: i32) -> (i32, i32, i32, i32) {
    %c0_i32 = arith.constant 0 : i32
    %c0_i32_0 = arith.constant 0 : i32
    %c0_i32_1 = arith.constant 0 : i32
    %c0_i32_2 = arith.constant 0 : i32
    return %arg0, %c0_i32, %c0_i32_0, %c0_i32_1 : i32, i32, i32, i32
  }
  func.func @transform_1(%arg0: i32) -> (i32, i32) {
    %c0_i32 = arith.constant 0 : i32
    %c0_i32_0 = arith.constant 0 : i32
    %c0_i32_1 = arith.constant 0 : i32
    return %c0_i32, %c0_i32_0 : i32, i32
  }
  func.func @transform_2(%arg0: i32) -> (i32, i32) {
    %c0_i32 = arith.constant 0 : i32
    %c0_i32_0 = arith.constant 0 : i32
    %c0_i32_1 = arith.constant 0 : i32
    return %c0_i32, %c0_i32_0 : i32, i32
  }
  func.func @transform_3(%arg0: i32) -> (i32, i32, i32) {
    %c0_i32 = arith.constant 0 : i32
    %c0_i32_0 = arith.constant 0 : i32
    %c0_i32_1 = arith.constant 0 : i32
    %c0_i32_2 = arith.constant 0 : i32
    return %c0_i32, %c0_i32_0, %c0_i32_1 : i32, i32, i32
  }
  func.func @transform_4(%arg0: i32) -> (i32, i32) {
    %c0_i32 = arith.constant 0 : i32
    %c0_i32_0 = arith.constant 0 : i32
    %c0_i32_1 = arith.constant 0 : i32
    return %c0_i32, %c0_i32_0 : i32, i32
  }
  func.func @transform_5(%arg0: i32) -> (i32, i32) {
    %c0_i32 = arith.constant 0 : i32
    %c0_i32_0 = arith.constant 0 : i32
    %c0_i32_1 = arith.constant 0 : i32
    return %c0_i32, %c0_i32_0 : i32, i32
  }
  func.func @transform_6(%arg0: i32) -> (i32, i32) {
    %c0_i32 = arith.constant 0 : i32
    %c0_i32_0 = arith.constant 0 : i32
    %c0_i32_1 = arith.constant 0 : i32
    return %c0_i32, %c0_i32_0 : i32, i32
  }
  func.func @transform_7(%arg0: i32) -> (i32, i32, i32, i32) {
    %c0_i32 = arith.constant 0 : i32
    %c0_i32_0 = arith.constant 0 : i32
    %c0_i32_1 = arith.constant 0 : i32
    %c0_i32_2 = arith.constant 0 : i32
    return %arg0, %c0_i32, %c0_i32_0, %c0_i32_1 : i32, i32, i32, i32
  }
}

</mosaic_0001>

<bundles_post_ra>
// kernel: tpu_custom_call.1
= control target key start
LH: loop header
LB: loop body
LE: loop exit
PB: predicated region body
PF: predicated region fallthrough
CT: control target
= control target key end

     0   :  { %s6579_s0 = inlined_call_operand.hbm [shape: f32[2,16,16,128], index: 0, kind: input, shape index: {}]   ;;  %s6580_s1 = inlined_call_operand.hbm [shape: bf16[128,128], index: 1, kind: input, shape index: {}]   ;;  %s6581_s2 = inlined_call_operand.vmem [shape: f32[1,128], index: 2, kind: input, shape index: {}]   ;;  %s6582_s3 = inlined_call_operand.hbm [shape: bf16[9,128,128], index: 3, kind: input, shape index: {}]   ;;  %s6583_s4 = inlined_call_operand.vmem [shape: f32[1,128], index: 4, kind: input, shape index: {}]   ;;  %s6584_s5 = inlined_call_operand.hbm [shape: bf16[128,128], index: 5, kind: input, shape index: {}]   ;;  %s6585_s6 = inlined_call_operand.vmem [shape: f32[1,128], index: 6, kind: input, shape index: {}]   ;;  %s6586_s7 = inlined_call_operand.hbm [shape: f32[2,16,16,128], index: 7, kind: output, shape index: {}]  }
   0x1   :  { %6601 = sst [smem:[#allocation112_spill]] %s6580_s1 }
   0x2   :  { %12 = vsyncpa [#allocation5], 0 }
   0x3   :  { %14 = vsyncpa [#allocation5 + $0x1], 0 }
   0x4   :  { %15 = vsyncpa [#allocation8], 0 }
   0x5   :  { %16 = vsyncpa [#allocation11], 0 }
   0x6   :  { %17 = vsyncpa [#allocation6], 0 }
   0x7   :  { %19 = vsyncpa [#allocation6 + $0x1], 0  ;;  %s5068_s24 = smov 0   ;;  %s5070_s25 = smov 0  }
   0x8   :  { %s5072_s26 = smov 0   ;;  %s5074_s27 = smov 0  }
   0x9 LB: > { %s5089_s28 = sadd.s32 4294967295, %s5015_s27   ;;  %s4213_s29 = sadd.s32 4294967294, %s5015_s27   ;;  %s5015_s27 = sphi %s5074_s27, %s6843_s27   ;;  %s5011_s26 = sphi %s5072_s26, %s6842_s26   ;;  %s5007_s25 = sphi %s5070_s25, %s6841_s25   ;;  %s5003_s24 = sphi %s5068_s24, %s6840_s24  }
   0xa   : > { %p45_p0 = scmp.ne.s32.totalorder %s5007_s25, %s5003_s24  ;;  %p46_p1 = scmp.eq.s32.totalorder %s5089_s28, 0 }
   0xb   : > { %p195_p2 = scmp.eq.s32.totalorder %s5089_s28, 1  ;;  %p201_p3 = scmp.eq.s32.totalorder %s4213_s29, 1 }
   0xc   : > { %p5098_p4 = por %p46_p1, %p45_p0  ;;  %p4214_p5 = scmp.ge.s32.totalorder %s5015_s27, 1 }
   0xd   : > { %p5103_p6 = por %p201_p3, %p45_p0  ;;  %p208_p7 = scmp.lt.s32.totalorder %s5015_s27, 3 }
   0xe   : > { %s6604_s1 = sld [smem:[#allocation112_spill]]  ;;  %s5017_s13 = smov [#allocation7]  }
   0xf   : > { %p5111_p8 = pnand %p4214_p5, %p208_p7  ;;  %s221_s14 = sshll.u32 %s5017_s13, 4  ;;  %s222_s14 = int_to_ptr.vmem [resolvable:$true] %s221_s14 }
  0x10   : > { %s236_s18 = sshll.u32 %s6582_s3, 4  ;;  %s5018_s19 = smov 64   ;;  %s237_s18 = int_to_ptr.hbm [resolvable:$true] %s236_s18 }
  0x11   : > { %p4715_p9 = pneg %p5111_p8  ;;  %s5019_s20 = smov 4  }
  0x12   : > { %s5020_s21 = smov [#allocation9]   ;;  %s253_s9 = sshll.u32 %s6584_s5, 4  ;;  %s254_s9 = int_to_ptr.hbm [resolvable:$true] %s253_s9 }
  0x13   : > { %p5119_p10 = pnand %p4715_p9, %p46_p1  ;;  %s238_s22 = sshll.u32 %s5020_s21, 4  ;;  %s239_s22 = int_to_ptr.vmem [resolvable:$true] %s238_s22 }
  0x14   : > { %s219_s11 = sshll.u32 %s6604_s1, 4  ;;  %s5021_s10 = smov [#allocation10]   ;;  %s220_s11 = int_to_ptr.hbm [resolvable:$true] %s219_s11 }
  0x15   : > { %4718 = dma.hbm_to_vmem [thread:$0]  (!%p5119_p10), %s220_s11, 1024, %s222_s14, [#allocation8], %s5018_s19, %s5018_s19, %s5019_s20  }
  0x16   : > { %4721 = dma.hbm_to_vmem [thread:$0]  (!%p5119_p10), %s237_s18, 9216, %s239_s22, [#allocation8], %s5018_s19, %s5018_s19, %s5019_s20  }
  0x17   : > { %s255_s13 = sshll.u32 %s5021_s10, 4  ;;  %s5135_s11 = sadd.s32 1, %s5015_s27   ;;  %s256_s13 = int_to_ptr.vmem [resolvable:$true] %s255_s13 }
  0x18   : > { %4724 = dma.hbm_to_vmem [thread:$0]  (!%p5119_p10), %s254_s9, 1024, %s256_s13, [#allocation11], %s5018_s19, %s5018_s19, %s5019_s20  }
  0x19   : > { %s29_s14 = ssub.s32 %s5015_s27, %s5135_s11  ;;  %s32_s16 = sadd.s32 1, %s5011_s26 }
  0x1a   : > { %p30_p12 = scmp.eq.s32.totalorder %s29_s14, 0  ;;  %p39_p13 = scmp.ne.s32.totalorder %s5011_s26, %s5007_s25 }
  0x1b   : > { %p40_p0 = scmp.eq.s32.totalorder %s5015_s27, 0  ;;  %p4736_p3 = scmp.lt.s32.totalorder %s5015_s27, 2 }
  0x1c   : > { %s5147_s17 = scalar_select %p30_p12, %s5011_s26, %s32_s16  }
  0x1d   : > { %p41_p5 = por %p40_p0, %p39_p13  ;;  %p5151_p7 = por %p195_p2, %p39_p13 }
  0x1e   : > { %s272_s21 = sand.u32 1, %s5011_s26   ;;  %s4585_s22 = sshll.u32 %s5015_s27, 8 }
  0x1f   : > { %s4219_s15 = sshll.u32 %s272_s21, 8  ;;  %s281_s20 = scalar_lea.hbm %s6579_s0, %s4585_s22 }
  0x20   : > { %s282_s29 = sshll.u32 %s281_s20, 4  ;;  %s276_s9 = scalar_lea.vmem [#allocation4], %s4219_s15  ;;  %s283_s29 = int_to_ptr.hbm [resolvable:$true] %s282_s29 }
  0x21   : > { %s284_s10 = sshll.u32 %s276_s9, 4  ;;  %p5162_p9 = pnand %p4736_p3, %p41_p5  ;;  %s285_s10 = int_to_ptr.vmem [resolvable:$true] %s284_s10 }
  0x22   : > { %s273_s14 = scalar_lea.sflag [#allocation5], %s272_s21  ;;  %s4911_s16 = sshra.s32 %s283_s29, 4  ;;  %s4912_s16 = int_to_ptr.hbm [resolvable:$true] %s4911_s16 }
  0x23   : > { %s4913_s1 = scalar_lea.hbm %s4912_s16, 256  ;;  %p4915_p10 = pneg %p5162_p9 }
  0x24   : > { %p4914_p2 = scmp.ne.s32.totalorder %s4912_s16, %s4913_s1  ;;  %s4918_s23 = scalar_lea.hbm %s6579_s0, 512 }
  0x25   : > { %p4919_p0 = scmp.lt.s32.totalorder %s4912_s16, %s6579_s0  ;;  %p4920_p3 = scmp.lt.s32.totalorder %s4918_s23, %s4913_s1 }
  0x26   : > { %p4916_p12 = pnand %p4915_p10, %p4914_p2 }
  0x27   : > { %p4921_p5 = por %p4920_p3, %p4919_p0 }
  0x28   : > { %p4917_p13 = pneg %p4916_p12 }
  0x2a   : > { %p4922_p11 = pnand %p4921_p5, %p4917_p13 }
  0x2c   : > { %4925 = shalt.err (!%p4922_p11)
}
  0x2d   : > { %s5022_s21 = smov 128   ;;  %s5023_s9 = smov 8  }
  0x2e   : > { %4728 = dma.hbm_to_vmem [thread:$0]  (!%p5162_p9), %s283_s29, 4096, %s285_s10, %s273_s14, %s5022_s21, %s5022_s21, %s5023_s9  }
  0x2f   : > { %296 = sbr.rel (%p5111_p8) target bundleno = 1324 (0x52c), region = 48 }
  0x34   : > { %s5179_s22 = sand.u32 1, %s5007_s25  }
  0x35   : > { %s4223_s16 = sshll.u32 %s5179_s22, 8  ;;  %s299_s1 = scalar_lea.sflag [#allocation5], %s5179_s22 }
  0x36   : > { %s5185_s15 = scalar_lea.vmem [#allocation4], %s4223_s16 }
  0x37   : > { %4986 = dma.done.wait (%p5098_p4), %s299_s1, 4096  }
  0x38   : > { %4988 = vsyncadd (%p5098_p4), %s299_s1, 4294963200 }
  0x39   : > { %4990 = dma.done.wait (%p46_p1), [#allocation8], 10240  }
  0x3a   : > { %4992 = vsyncadd (%p46_p1), [#allocation8], 4294957056 }
  0x3b   : > { %4994 = dma.done.wait (%p46_p1), [#allocation11], 1024  }
  0x3c   : > { %4996 = vsyncadd (%p46_p1), [#allocation11], 4294966272  ;;  %v4593_v0 = vld [vmem:[#allocation7 + $0x38] sm:$0xff]  ;;  %v4592_v1 = vld [vmem:[#allocation7 + $0x30] sm:$0xff]  ;;  %v664_v29 = vlaneseq  ;;  %v6587_v34 = vmov 0.0   ;;  %s6409_s9 = scalar_lea.vmem [#allocation12], %s4223_s16 }
  0x3d   : > { %474 = vmatpush.bf16.msra.mxu0 %v4593_v0  ;;  %4675 = vmatpush.bf16.msra.mxu3 %v4593_v0  ;;  %v4591_v2 = vld [vmem:[#allocation7 + $0x28] sm:$0xff]  ;;  %v4590_v3 = vld [vmem:[#allocation7 + $0x20] sm:$0xff]  ;;  %v4589_v4 = vld [vmem:[#allocation7 + $0x18] sm:$0xff]  ;;  %v707_v35 = vrot.slane %v6587_v34, 6  ;;  %s4674_s16 = sshll.u32 %s5089_s28, 8  ;;  %s4108_s29 = sshll.u32 %s6409_s9, 4  ;;  %s4109_s29 = int_to_ptr.vmem [resolvable:$true] %s4108_s29 }
  0x3e   : > { %v4588_v5 = vld [vmem:[#allocation7 + $0x10] sm:$0xff]  ;;  %v4587_v6 = vld [vmem:[#allocation7 + $0x8] sm:$0xff]  ;;  %v4586_v7 = vld [vmem:[#allocation7] sm:$0xff]  ;;  %v5211_v33 = vshrl.u32 %v664_v29, 7  ;;  %s4107_s12 = scalar_lea.hbm %s6586_s7, %s4674_s16  ;;  %s4096_s28 = scalar_lea.sflag [#allocation6], %s5179_s22 }
  0x3f   : > { %v358_v8 = vld [vmem:[%s5185_s15] sm:$0xff]  ;;  %v359_v9 = vld [vmem:[%s5185_s15 + $0x8] sm:$0xff]  ;;  %v360_v11 = vld [vmem:[%s5185_s15 + $0x10] sm:$0xff]  ;;  %v831_v39 = vpack.c.bf16 %v707_v35, %v707_v35  ;;  %s4110_s10 = sshll.u32 %s4107_s12, 4  ;;  %s4961_s20 = scalar_lea.hbm %s6586_s7, 512  ;;  %s4111_s10 = int_to_ptr.hbm [resolvable:$true] %s4110_s10 }
  0x40   : > { %v390_v10 = vpack.c.bf16 %v359_v9, %v358_v8  ;;  %v361_v12 = vld [vmem:[%s5185_s15 + $0x18] sm:$0xff]  ;;  %v362_v14 = vld [vmem:[%s5185_s15 + $0x20] sm:$0xff]  ;;  %v363_v15 = vld [vmem:[%s5185_s15 + $0x28] sm:$0xff]  ;;  %vm788_vm0 = vcmp.ge.s32.totalorder %v5211_v33, 2  ;;  %vm747_vm1 = vcmp.lt.s32.totalorder %v5211_v33, 2  ;;  %vm2769_vm2 = vcmp.lt.s32.totalorder %v5211_v33, 6 }
  0x41   : > { %475 = vmatpush.bf16.msra.mxu0 %v4592_v1  ;;  %4676 = vmatpush.bf16.msra.mxu3 %v4592_v1  ;;  %v391_v13 = vpack.c.bf16 %v361_v12, %v360_v11  ;;  %v392_v16 = vpack.c.bf16 %v363_v15, %v362_v14  ;;  %v364_v17 = vld [vmem:[%s5185_s15 + $0x30] sm:$0xff]  ;;  %v365_v18 = vld [vmem:[%s5185_s15 + $0x38] sm:$0xff]  ;;  %v4599_v22 = vld [vmem:[#allocation9 + $0x28] sm:$0xff]  ;;  %v790_v37 = vsel %vm788_vm0, %v707_v35, 0.0  ;;  %v951_v42 = vunpack.c.l.b16 %v831_v39  ;;  %s4955_s13 = sshra.s32 %s4111_s10, 4  ;;  %s4956_s13 = int_to_ptr.hbm [resolvable:$true] %s4955_s13 }
  0x42   : > { %v393_v19 = vpack.c.bf16 %v365_v18, %v364_v17  ;;  %v4601_v20 = vld [vmem:[#allocation9 + $0x38] sm:$0xff]  ;;  %v4600_v21 = vld [vmem:[#allocation9 + $0x30] sm:$0xff]  ;;  %v366_v23 = vld [vmem:[%s5185_s15 + $0x40] sm:$0xff]  ;;  %v830_v38 = vpack.c.bf16 %v790_v37, %v790_v37  ;;  %s4957_s14 = scalar_lea.hbm %s4956_s13, 256  ;;  %p4962_p11 = scmp.lt.s32.totalorder %s4956_s13, %s6586_s7 }
  0x43   : > { %1062 = vmatpush.bf16.msra.mxu1 %v4601_v20  ;;  %v367_v24 = vld [vmem:[%s5185_s15 + $0x48] sm:$0xff]  ;;  %v4598_v26 = vld [vmem:[#allocation9 + $0x20] sm:$0xff]  ;;  %v4597_v27 = vld [vmem:[#allocation9 + $0x18] sm:$0xff]  ;;  %p4958_p1 = scmp.ne.s32.totalorder %s4956_s13, %s4957_s14  ;;  %p4963_p9 = scmp.lt.s32.totalorder %s4961_s20, %s4957_s14 }
  0x44   : > { %v394_v25 = vpack.c.bf16 %v367_v24, %v366_v23  ;;  %v4596_v28 = vld [vmem:[#allocation9 + $0x10] sm:$0xff]  ;;  %v369_v31 = vld [vmem:[%s5185_s15 + $0x58] sm:$0xff]  ;;  %v4595_v32 = vld [vmem:[#allocation9 + $0x8] sm:$0xff]  ;;  %v950_v41 = vunpack.c.l.b16 %v830_v38 }
  0x45   : > { %476 = vmatpush.bf16.msra.mxu0 %v4591_v2  ;;  %4677 = vmatpush.bf16.msra.mxu3 %v4591_v2  ;;  %v368_v30 = vld [vmem:[%s5185_s15 + $0x50] sm:$0xff]  ;;  %v4594_v40 = vld [vmem:[#allocation9] sm:$0xff]  ;;  %v5217_v43 = vld [vmem:[#allocation9 + $0xf8] sm:$0xff]  ;;  %p4959_p4 = pnand %p4958_p1, %p5151_p7  ;;  %p4964_p2 = por %p4963_p9, %p4962_p11 }
  0x46   : > { %v395_v36 = vpack.c.bf16 %v369_v31, %v368_v30  ;;  %v5219_v44 = vpack.c.b16 %v951_v42, %v950_v41  ;;  %1324 = vmatpush.bf16.msra.mxu2 %v5217_v43  ;;  %v5222_v45 = vld [vmem:[#allocation9 + $0xf0] sm:$0xff]  ;;  %v370_v46 = vld [vmem:[%s5185_s15 + $0x60] sm:$0xff]  ;;  %v371_v47 = vld [vmem:[%s5185_s15 + $0x68] sm:$0xff] }
  0x47   : > { %1063 = vmatpush.bf16.msra.mxu1 %v4600_v21  ;;  %v5228_v48 = vld [vmem:[#allocation9 + $0xe8] sm:$0xff]  ;;  %v396_v49 = vpack.c.bf16 %v371_v47, %v370_v46  ;;  %v5231_v50 = vld [vmem:[#allocation9 + $0xe0] sm:$0xff]  ;;  %v5234_v51 = vld [vmem:[#allocation9 + $0xd8] sm:$0xff]  ;;  %p4960_p8 = pneg %p4959_p4 }
  0x48   : > { %6609 = vst [vmem:[#allocation17_spill] sm:$0xff] %v5219_v44  ;;  %v5238_v52 = vld [vmem:[#allocation9 + $0xd0] sm:$0xff]  ;;  %v373_v54 = vld [vmem:[%s5185_s15 + $0x78] sm:$0xff]  ;;  %v5243_v55 = vld [vmem:[#allocation9 + $0xc8] sm:$0xff] }
  0x49   : > { %477 = vmatpush.bf16.msra.mxu0 %v4590_v3  ;;  %4678 = vmatpush.bf16.msra.mxu3 %v4590_v3  ;;  %v372_v53 = vld [vmem:[%s5185_s15 + $0x70] sm:$0xff]  ;;  %v5246_v57 = vld [vmem:[#allocation9 + $0xc0] sm:$0xff]  ;;  %v375_v59 = vld [vmem:[%s5185_s15 + $0x88] sm:$0xff]  ;;  %p4965_p10 = pnand %p4964_p2, %p4960_p8 }
  0x4a   : > { %1325 = vmatpush.bf16.msra.mxu2 %v5222_v45  ;;  %v397_v56 = vpack.c.bf16 %v373_v54, %v372_v53  ;;  %v374_v58 = vld [vmem:[%s5185_s15 + $0x80] sm:$0xff]  ;;  %v4625_v63 = vld [vmem:[#allocation9 + $0x78] sm:$0xff]  ;;  %v4624_v1 = vld [vmem:[#allocation9 + $0x70] sm:$0xff] }
  0x4b   : > { %1064 = vmatpush.bf16.msra.mxu1 %v4599_v22  ;;  %v398_v60 = vpack.c.bf16 %v375_v59, %v374_v58  ;;  %v5254_v61 = vld [vmem:[%s6581_s2] ss:$0 sm:$0xff]  ;;  %v376_v8 = vld [vmem:[%s5185_s15 + $0x90] sm:$0xff]  ;;  %v377_v9 = vld [vmem:[%s5185_s15 + $0x98] sm:$0xff] }
  0x4c   : > { %v399_v15 = vpack.c.bf16 %v377_v9, %v376_v8  ;;  %v382_v29 = vld [vmem:[%s5185_s15 + $0xc0] sm:$0xff]  ;;  %v383_v30 = vld [vmem:[%s5185_s15 + $0xc8] sm:$0xff]  ;;  %v4621_v37 = vld [vmem:[#allocation9 + $0x58] sm:$0xff] }
  0x4d   : > { %478 = vmatpush.bf16.msra.mxu0 %v4589_v4  ;;  %4679 = vmatpush.bf16.msra.mxu3 %v4589_v4  ;;  %v5258_v4 = vadd.s32 8, %v5211_v33  ;;  %v4620_v47 = vld [vmem:[#allocation9 + $0x50] sm:$0xff]  ;;  %v4619_v58 = vld [vmem:[#allocation9 + $0x48] sm:$0xff] }
  0x4e   : > { %1326 = vmatpush.bf16.msra.mxu2 %v5228_v48 }
  0x4f   : > { %1065 = vmatpush.bf16.msra.mxu1 %v4598_v26  ;;  %vm2811_vm3 = vcmp.lt.s32.totalorder %v5258_v4, 14 }
  0x51   : > { %479 = vmatpush.bf16.msra.mxu0 %v4588_v5  ;;  %4680 = vmatpush.bf16.msra.mxu3 %v4588_v5 }
  0x52   : > { %1327 = vmatpush.bf16.msra.mxu2 %v5231_v50 }
  0x53   : > { %1066 = vmatpush.bf16.msra.mxu1 %v4597_v27 }
  0x55   : > { %480 = vmatpush.bf16.msra.mxu0 %v4587_v6  ;;  %4681 = vmatpush.bf16.msra.mxu3 %v4587_v6  ;;  %v4623_v6 = vld [vmem:[#allocation9 + $0x68] sm:$0xff] }
  0x56   : > { %1328 = vmatpush.bf16.msra.mxu2 %v5234_v51 }
  0x57   : > { %1067 = vmatpush.bf16.msra.mxu1 %v4596_v28 }
  0x59   : > { %481 = vmatpush.bf16.msra.mxu0 %v4586_v7  ;;  %4682 = vmatpush.bf16.msra.mxu3 %v4586_v7 }
  0x5a   : > { %1329 = vmatpush.bf16.msra.mxu2 %v5238_v52 }
  0x5b   : > { %1068 = vmatpush.bf16.msra.mxu1 %v4595_v32 }
  0x5c   : > { %482 = vmatmul.bf16.vlgmr.msra.gmra.mxu0 %v390_v10 }
  0x5d   : > { %4683 = vmatpush.bf16.msrb.mxu3 %v4601_v20  ;;  %2012 = vmatpush.bf16.msrb.mxu0 %v4625_v63  ;;  %v379_v63 = vld [vmem:[%s5185_s15 + $0xa8] sm:$0xff] }
  0x5e   : > { %1330 = vmatpush.bf16.msra.mxu2 %v5243_v55 }
  0x5f   : > { %1069 = vmatpush.bf16.msra.mxu1 %v4594_v40 }
  0x61   : > { %4684 = vmatpush.bf16.msrb.mxu3 %v4600_v21  ;;  %2013 = vmatpush.bf16.msrb.mxu0 %v4624_v1 }
  0x62   : > { %1070 = vmatmul.bf16.vlgmr.msra.gmra.mxu1 %v5219_v44  ;;  %1331 = vmatpush.bf16.msra.mxu2 %v5246_v57 }
  0x65   : > { %4685 = vmatpush.bf16.msrb.mxu3 %v4599_v22  ;;  %2014 = vmatpush.bf16.msrb.mxu0 %v4623_v6  ;;  %v4618_v6 = vld [vmem:[#allocation9 + $0x40] sm:$0xff] }
  0x69   : > { %4686 = vmatpush.bf16.msrb.mxu3 %v4598_v26 }
  0x6c   : > { %487 = vmatmul.bf16.gmra.mxu0 %v391_v13 }
  0x6d   : > { %4687 = vmatpush.bf16.msrb.mxu3 %v4597_v27 }
  0x71   : > { %4688 = vmatpush.bf16.msrb.mxu3 %v4596_v28 }
  0x72   : > { %1075 = vmatmul.bf16.gmra.mxu1 %v5219_v44 }
  0x75   : > { %4689 = vmatpush.bf16.msrb.mxu3 %v4595_v32 }
  0x79   : > { %4690 = vmatpush.bf16.msrb.mxu3 %v4594_v40 }
  0x7c   : > { %492 = vmatmul.bf16.gmra.mxu0 %v392_v16  ;;  %v4622_v16 = vld [vmem:[#allocation9 + $0x60] sm:$0xff] }
  0x7d   : > { %2015 = vmatpush.bf16.msrb.mxu0 %v4622_v16  ;;  %v384_v16 = vld [vmem:[%s5185_s15 + $0xd0] sm:$0xff] }
  0x81   : > { %2016 = vmatpush.bf16.msrb.mxu0 %v4621_v37 }
  0x85   : > { %2017 = vmatpush.bf16.msrb.mxu0 %v4620_v47 }
  0x89   : > { %2018 = vmatpush.bf16.msrb.mxu0 %v4619_v58 }
  0x8c   : > { %497 = vmatmul.bf16.gmra.mxu0 %v393_v19 }
  0x8d   : > { %2019 = vmatpush.bf16.msrb.mxu0 %v4618_v6 }
  0x9c   : > { %502 = vmatmul.bf16.gmra.mxu0 %v394_v25 }
  0xac   : > { %507 = vmatmul.bf16.gmra.mxu0 %v395_v36  ;;  %v402_v36 = vpack.c.bf16 %v383_v30, %v382_v29 }
  0xae   : > { %542 = vmatmul.bf16.vlgmr.msra.gmra.mxu3 %v402_v36  ;;  %v381_v36 = vld [vmem:[%s5185_s15 + $0xb8] sm:$0xff] }
  0xaf   : > { %4691 = vmatpush.bf16.msra.mxu3 %v5217_v43 }
  0xb3   : > { %4692 = vmatpush.bf16.msra.mxu3 %v5222_v45 }
  0xb7   : > { %4693 = vmatpush.bf16.msra.mxu3 %v5228_v48 }
  0xbb   : > { %4694 = vmatpush.bf16.msra.mxu3 %v5231_v50 }
  0xbc   : > { %512 = vmatmul.bf16.gmra.mxu0 %v396_v49 }
  0xbf   : > { %4695 = vmatpush.bf16.msra.mxu3 %v5234_v51 }
  0xc3   : > { %4696 = vmatpush.bf16.msra.mxu3 %v5238_v52 }
  0xc7   : > { %4697 = vmatpush.bf16.msra.mxu3 %v5243_v55 }
  0xcb   : > { %4698 = vmatpush.bf16.msra.mxu3 %v5246_v57 }
  0xcc   : > { %517 = vmatmul.bf16.gmra.mxu0 %v397_v56 }
  0xd9   : > { %v483_v62 = vpop.f32.mrf.mxu0 }
  0xda   : > { %v484_v0 = vadd.f32 %v5254_v61, %v483_v62  ;;  %v378_v62 = vld [vmem:[%s5185_s15 + $0xa0] sm:$0xff] }
  0xdc   : > { %522 = vmatmul.bf16.gmra.mxu0 %v398_v60  ;;  %v563_v2 = vmax.f32 %v484_v0, 0.0 }
  0xde   : > { %v709_v10 = vrot.slane %v563_v2, 6  ;;  %v1783_v11 = vpack.c.bf16 %v563_v2, %v563_v2  ;;  %v2731_v12 = vrot.slane %v563_v2, 2 }
  0xe0   : > { %v1904_v31 = vunpack.c.l.b16 %v1783_v11 }
  0xe1   : > { %v485_v3 = vpop.f32.mrf.mxu0 }
  0xe2   : > { %v486_v5 = vadd.f32 %v5254_v61, %v485_v3 }
  0xe4   : > { %v564_v7 = vmax.f32 %v486_v5, 0.0  ;;  %v400_v5 = vpack.c.bf16 %v379_v63, %v378_v62 }
  0xe6   : > { %v729_v13 = vrot.slane %v564_v7, 6  ;;  %v2751_v14 = vrot.slane %v564_v7, 2  ;;  %v1784_v17 = vpack.c.bf16 %v564_v7, %v564_v7 }
  0xe8   : > { %v2772_v18 = vsel %vm2769_vm2, %v2731_v12, %v2751_v14  ;;  %v2792_v19 = vsel %vm2769_vm2, %v2751_v14, %v2731_v12  ;;  %v750_v20 = vsel %vm747_vm1, %v709_v10, %v729_v13  ;;  %v770_v21 = vsel %vm747_vm1, %v729_v13, %v709_v10 }
  0xe9   : > { %v2817_v22 = vsel %vm2811_vm3, %v2792_v19, 0.0  ;;  %v2856_v23 = vpack.c.bf16 %v2772_v18, %v2772_v18  ;;  %v488_v24 = vpop.f32.mrf.mxu0  ;;  %v794_v25 = vsel %vm788_vm0, %v770_v21, 0.0  ;;  %v835_v26 = vpack.c.bf16 %v750_v20, %v750_v20 }
  0xea   : > { %v2857_v27 = vpack.c.bf16 %v2817_v22, %v2817_v22  ;;  %v834_v28 = vpack.c.bf16 %v794_v25, %v794_v25  ;;  %v1905_v38 = vunpack.c.l.b16 %v1784_v17  ;;  %v489_v40 = vadd.f32 %v5254_v61, %v488_v24  ;;  %v385_v17 = vld [vmem:[%s5185_s15 + $0xd8] sm:$0xff] }
  0xeb   : > { %v2977_v32 = vunpack.c.l.b16 %v2856_v23  ;;  %v955_v35 = vunpack.c.l.b16 %v835_v26  ;;  %v403_v20 = vpack.c.bf16 %v385_v17, %v384_v16 }
  0xec   : > { %v2978_v39 = vunpack.c.l.b16 %v2857_v27  ;;  %527 = vmatmul.bf16.gmra.mxu0 %v399_v15  ;;  %v954_v41 = vunpack.c.l.b16 %v834_v28  ;;  %v5281_v42 = vpack.c.b16 %v1905_v38, %v1904_v31  ;;  %v565_v53 = vmax.f32 %v489_v40, 0.0 }
  0xed   : > { %547 = vmatmul.bf16.gmra.mxu3 %v403_v20 }
  0xee   : > { %v984_v46 = vpack.c.b16 %v955_v35, %v954_v41  ;;  %v5284_v49 = vpack.c.b16 %v2978_v39, %v2977_v32  ;;  %v1785_v59 = vpack.c.bf16 %v565_v53, %v565_v53  ;;  %v710_v0 = vrot.slane %v565_v53, 6  ;;  %v380_v35 = vld [vmem:[%s5185_s15 + $0xb0] sm:$0xff] }
  0xef   : > { %v2732_v3 = vrot.slane %v565_v53, 2  ;;  %v401_v41 = vpack.c.bf16 %v381_v36, %v380_v35 }
  0xf0   : > { %1080 = vmatmul.bf16.gmra.mxu1 %v984_v46  ;;  %1332 = vmatmul.bf16.vlgmr.msra.gmra.mxu2 %v984_v46  ;;  %v1906_v8 = vunpack.c.l.b16 %v1785_v59 }
  0xf1   : > { %v490_v54 = vpop.f32.mrf.mxu0 }
  0xf2   : > { %v491_v56 = vadd.f32 %v5254_v61, %v490_v54 }
  0xf4   : > { %v566_v60 = vmax.f32 %v491_v56, 0.0 }
  0xf6   : > { %v730_v43 = vrot.slane %v566_v60, 6  ;;  %v2752_v1 = vrot.slane %v566_v60, 2  ;;  %v1786_v2 = vpack.c.bf16 %v566_v60, %v566_v60 }
  0xf8   : > { %v751_v45 = vsel %vm747_vm1, %v710_v0, %v730_v43  ;;  %v771_v7 = vsel %vm747_vm1, %v730_v43, %v710_v0  ;;  %v1907_v9 = vunpack.c.l.b16 %v1786_v2  ;;  %v2773_v48 = vsel %vm2769_vm2, %v2732_v3, %v2752_v1 }
  0xf9   : > { %v493_v10 = vpop.f32.mrf.mxu0  ;;  %v796_v11 = vsel %vm788_vm0, %v771_v7, 0.0  ;;  %v837_v12 = vpack.c.bf16 %v751_v45, %v751_v45  ;;  %v2793_v13 = vsel %vm2769_vm2, %v2752_v1, %v2732_v3  ;;  %v2858_v22 = vpack.c.bf16 %v2773_v48, %v2773_v48 }
  0xfa   : > { %v494_v14 = vadd.f32 %v5254_v61, %v493_v10  ;;  %v836_v15 = vpack.c.bf16 %v796_v11, %v796_v11  ;;  %v5304_v18 = vpack.c.b16 %v1907_v9, %v1906_v8  ;;  %v2819_v21 = vsel %vm2811_vm3, %v2793_v13, 0.0 }
  0xfb   : > { %v957_v19 = vunpack.c.l.b16 %v837_v12  ;;  %v2859_v24 = vpack.c.bf16 %v2819_v21, %v2819_v21  ;;  %v2979_v25 = vunpack.c.l.b16 %v2858_v22  ;;  %v5025_v11 = vmov 0.0|0.0  }
  0xfc   : > { %532 = vmatmul.bf16.gmra.mxu0 %v400_v5  ;;  %v956_v23 = vunpack.c.l.b16 %v836_v15  ;;  %v567_v27 = vmax.f32 %v494_v14, 0.0  ;;  %v1900_v12 = vunpack.c.l.b16 %v5025_v11 }
  0xfd   : > { %v2980_v28 = vunpack.c.l.b16 %v2859_v24 }
  0xfe   : > { %v985_v26 = vpack.c.b16 %v957_v19, %v956_v23  ;;  %v1787_v31 = vpack.c.bf16 %v567_v27, %v567_v27  ;;  %v711_v37 = vrot.slane %v567_v27, 6  ;;  %v2733_v38 = vrot.slane %v567_v27, 2 }
  0xff   : > { %v5310_v29 = vpack.c.b16 %v2980_v28, %v2979_v25  ;;  %v5340_v19 = vpack.c.b16 %v1900_v12, %v1900_v12 }
 0x100   : > { %1085 = vmatmul.bf16.gmra.mxu1 %v985_v26  ;;  %1337 = vmatmul.bf16.gmra.mxu2 %v985_v26  ;;  %v1908_v46 = vunpack.c.l.b16 %v1787_v31 }
 0x101   : > { %v495_v50 = vpop.f32.mrf.mxu0  ;;  %6610 = vst [vmem:[#allocation18_spill] sm:$0xff] %v5340_v19 }
 0x102   : > { %v496_v30 = vadd.f32 %v5254_v61, %v495_v50 }
 0x104   : > { %v568_v32 = vmax.f32 %v496_v30, 0.0 }
 0x106   : > { %v731_v39 = vrot.slane %v568_v32, 6  ;;  %v2753_v40 = vrot.slane %v568_v32, 2  ;;  %v1788_v51 = vpack.c.bf16 %v568_v32, %v568_v32 }
 0x108   : > { %v752_v47 = vsel %vm747_vm1, %v711_v37, %v731_v39  ;;  %v772_v53 = vsel %vm747_vm1, %v731_v39, %v711_v37  ;;  %v1909_v52 = vunpack.c.l.b16 %v1788_v51  ;;  %v2774_v54 = vsel %vm2769_vm2, %v2733_v38, %v2753_v40 }
 0x109   : > { %v498_v56 = vpop.f32.mrf.mxu0  ;;  %v798_v58 = vsel %vm788_vm0, %v772_v53, 0.0  ;;  %v839_v59 = vpack.c.bf16 %v752_v47, %v752_v47  ;;  %v2794_v55 = vsel %vm2769_vm2, %v2753_v40, %v2733_v38  ;;  %v2860_v60 = vpack.c.bf16 %v2774_v54, %v2774_v54 }
 0x10a   : > { %v838_v62 = vpack.c.bf16 %v798_v58, %v798_v58  ;;  %v5327_v63 = vpack.c.b16 %v1909_v52, %v1908_v46  ;;  %v2821_v0 = vsel %vm2811_vm3, %v2794_v55, 0.0  ;;  %v499_v43 = vadd.f32 %v5254_v61, %v498_v56 }
 0x10b   : > { %v959_v1 = vunpack.c.l.b16 %v839_v59  ;;  %v2861_v2 = vpack.c.bf16 %v2821_v0, %v2821_v0  ;;  %v2981_v3 = vunpack.c.l.b16 %v2860_v60 }
 0x10c   : > { %537 = vmatmul.bf16.gmra.mxu0 %v401_v41  ;;  %v958_v5 = vunpack.c.l.b16 %v838_v62  ;;  %v569_v7 = vmax.f32 %v499_v43, 0.0 }
 0x10d   : > { %v2982_v6 = vunpack.c.l.b16 %v2861_v2 }
 0x10e   : > { %v5333_v45 = vpack.c.b16 %v959_v1, %v958_v5  ;;  %v1789_v10 = vpack.c.bf16 %v569_v7, %v569_v7  ;;  %v712_v13 = vrot.slane %v569_v7, 6  ;;  %v2734_v14 = vrot.slane %v569_v7, 2 }
 0x10f   : > { %v5335_v8 = vpack.c.b16 %v2982_v6, %v2981_v3 }
 0x110   : > { %1090 = vmatmul.bf16.gmra.mxu1 %v5333_v45  ;;  %1342 = vmatmul.bf16.gmra.mxu2 %v5333_v45  ;;  %v1910_v20 = vunpack.c.l.b16 %v1789_v10 }
 0x111   : > { %v500_v57 = vpop.f32.mrf.mxu0 }
 0x112   : > { %v501_v9 = vadd.f32 %v5254_v61, %v500_v57 }
 0x114   : > { %v570_v48 = vmax.f32 %v501_v9, 0.0 }
 0x116   : > { %v732_v15 = vrot.slane %v570_v48, 6  ;;  %v2754_v16 = vrot.slane %v570_v48, 2  ;;  %v1790_v17 = vpack.c.bf16 %v570_v48, %v570_v48 }
 0x118   : > { %v753_v21 = vsel %vm747_vm1, %v712_v13, %v732_v15  ;;  %v773_v22 = vsel %vm747_vm1, %v732_v15, %v712_v13  ;;  %v1911_v23 = vunpack.c.l.b16 %v1790_v17  ;;  %v2775_v24 = vsel %vm2769_vm2, %v2734_v14, %v2754_v16  ;;  %v387_v17 = vld [vmem:[%s5185_s15 + $0xe8] sm:$0xff] }
 0x119   : > { %v503_v25 = vpop.f32.mrf.mxu0  ;;  %v800_v26 = vsel %vm788_vm0, %v773_v22, 0.0  ;;  %v841_v27 = vpack.c.bf16 %v753_v21, %v753_v21  ;;  %v2795_v28 = vsel %vm2769_vm2, %v2754_v16, %v2734_v14  ;;  %v2862_v50 = vpack.c.bf16 %v2775_v24, %v2775_v24  ;;  %v386_v16 = vld [vmem:[%s5185_s15 + $0xe0] sm:$0xff] }
 0x11a   : > { %v840_v30 = vpack.c.bf16 %v800_v26, %v800_v26  ;;  %v5352_v31 = vpack.c.b16 %v1911_v23, %v1910_v20  ;;  %v2823_v32 = vsel %vm2811_vm3, %v2795_v28, 0.0  ;;  %v504_v35 = vadd.f32 %v5254_v61, %v503_v25 }
 0x11b   : > { %v961_v36 = vunpack.c.l.b16 %v841_v27  ;;  %v2863_v37 = vpack.c.bf16 %v2823_v32, %v2823_v32  ;;  %v2983_v38 = vunpack.c.l.b16 %v2862_v50  ;;  %v404_v23 = vpack.c.bf16 %v387_v17, %v386_v16  ;;  %v5415_v16 = vpop.f32.mrf.mxu1 }
 0x11c   : > { %2020 = vmatmul.bf16.vlgmr.msrb.gmra.mxu0 %v5340_v19  ;;  %v960_v39 = vunpack.c.l.b16 %v840_v30  ;;  %v571_v41 = vmax.f32 %v504_v35, 0.0 }
 0x11d   : > { %v2984_v40 = vunpack.c.l.b16 %v2863_v37  ;;  %552 = vmatmul.bf16.gmra.mxu3 %v404_v23 }
 0x11e   : > { %v5358_v51 = vpack.c.b16 %v961_v36, %v960_v39  ;;  %v1791_v52 = vpack.c.bf16 %v571_v41, %v571_v41  ;;  %v713_v56 = vrot.slane %v571_v41, 6  ;;  %v2735_v58 = vrot.slane %v571_v41, 2 }
 0x11f   : > { %v5360_v46 = vpack.c.b16 %v2984_v40, %v2983_v38 }
 0x120   : > { %1095 = vmatmul.bf16.gmra.mxu1 %v5358_v51  ;;  %1347 = vmatmul.bf16.gmra.mxu2 %v5358_v51  ;;  %v1912_v62 = vunpack.c.l.b16 %v1791_v52 }
 0x121   : > { %v505_v47 = vpop.f32.mrf.mxu0 }
 0x122   : > { %v506_v53 = vadd.f32 %v5254_v61, %v505_v47 }
 0x124   : > { %v572_v54 = vmax.f32 %v506_v53, 0.0 }
 0x126   : > { %v733_v59 = vrot.slane %v572_v54, 6  ;;  %v2755_v55 = vrot.slane %v572_v54, 2  ;;  %v1792_v60 = vpack.c.bf16 %v572_v54, %v572_v54 }
 0x128   : > { %v754_v0 = vsel %vm747_vm1, %v713_v56, %v733_v59  ;;  %v774_v43 = vsel %vm747_vm1, %v733_v59, %v713_v56  ;;  %v1913_v1 = vunpack.c.l.b16 %v1792_v60  ;;  %v2776_v2 = vsel %vm2769_vm2, %v2735_v58, %v2755_v55 }
 0x129   : > { %v508_v3 = vpop.f32.mrf.mxu0  ;;  %v802_v5 = vsel %vm788_vm0, %v774_v43, 0.0  ;;  %v843_v6 = vpack.c.bf16 %v754_v0, %v754_v0  ;;  %v2796_v7 = vsel %vm2769_vm2, %v2755_v55, %v2735_v58  ;;  %v2864_v57 = vpack.c.bf16 %v2776_v2, %v2776_v2  ;;  %v388_v2 = vld [vmem:[%s5185_s15 + $0xf0] sm:$0xff] }
 0x12a   : > { %v842_v9 = vpack.c.bf16 %v802_v5, %v802_v5  ;;  %v5375_v10 = vpack.c.b16 %v1913_v1, %v1912_v62  ;;  %v2825_v11 = vsel %vm2811_vm3, %v2796_v7, 0.0  ;;  %v509_v12 = vadd.f32 %v5254_v61, %v508_v3  ;;  %v389_v3 = vld [vmem:[%s5185_s15 + $0xf8] sm:$0xff] }
 0x12b   : > { %v963_v48 = vunpack.c.l.b16 %v843_v6  ;;  %v2865_v13 = vpack.c.bf16 %v2825_v11, %v2825_v11  ;;  %v2985_v14 = vunpack.c.l.b16 %v2864_v57  ;;  %v4633_v7 = vld [vmem:[#allocation9 + $0x138] sm:$0xff] }
 0x12c   : > { %2025 = vmatmul.bf16.gmra.mxu0 %v5340_v19  ;;  %v962_v15 = vunpack.c.l.b16 %v842_v9  ;;  %v573_v22 = vmax.f32 %v509_v12, 0.0  ;;  %v405_v9 = vpack.c.bf16 %v389_v3, %v388_v2  ;;  %2274 = vmatpush.bf16.msrb.mxu1 %v4633_v7 }
 0x12d   : > { %v2986_v20 = vunpack.c.l.b16 %v2865_v13 }
 0x12e   : > { %v5383_v21 = vpack.c.b16 %v963_v48, %v962_v15  ;;  %v1793_v27 = vpack.c.bf16 %v573_v22, %v573_v22  ;;  %v714_v50 = vrot.slane %v573_v22, 6  ;;  %v2736_v30 = vrot.slane %v573_v22, 2  ;;  %557 = vmatmul.bf16.gmra.mxu3 %v405_v9  ;;  %v4632_v9 = vld [vmem:[#allocation9 + $0x130] sm:$0xff] }
 0x12f   : > { %v5385_v24 = vpack.c.b16 %v2986_v20, %v2985_v14 }
 0x130   : > { %1100 = vmatmul.bf16.gmra.mxu1 %v5383_v21  ;;  %1352 = vmatmul.bf16.gmra.mxu2 %v5383_v21  ;;  %v1914_v37 = vunpack.c.l.b16 %v1793_v27 }
 0x131   : > { %v510_v25 = vpop.f32.mrf.mxu0  ;;  %2275 = vmatpush.bf16.msrb.mxu1 %v4632_v9  ;;  %v4628_v9 = vld [vmem:[#allocation9 + $0x110] sm:$0xff] }
 0x132   : > { %v511_v26 = vadd.f32 %v5254_v61, %v510_v25 }
 0x134   : > { %v574_v28 = vmax.f32 %v511_v26, 0.0 }
 0x136   : > { %v734_v32 = vrot.slane %v574_v28, 6  ;;  %v2756_v35 = vrot.slane %v574_v28, 2  ;;  %v1794_v36 = vpack.c.bf16 %v574_v28, %v574_v28 }
 0x138   : > { %v755_v38 = vsel %vm747_vm1, %v714_v50, %v734_v32  ;;  %v775_v39 = vsel %vm747_vm1, %v734_v32, %v714_v50  ;;  %v1915_v40 = vunpack.c.l.b16 %v1794_v36  ;;  %v2777_v41 = vsel %vm2769_vm2, %v2736_v30, %v2756_v35 }
 0x139   : > { %v513_v47 = vpop.f32.mrf.mxu0  ;;  %v804_v53 = vsel %vm788_vm0, %v775_v39, 0.0  ;;  %v845_v52 = vpack.c.bf16 %v755_v38, %v755_v38  ;;  %v2797_v54 = vsel %vm2769_vm2, %v2756_v35, %v2736_v30  ;;  %v2866_v56 = vpack.c.bf16 %v2777_v41, %v2777_v41 }
 0x13a   : > { %v844_v58 = vpack.c.bf16 %v804_v53, %v804_v53  ;;  %v5400_v59 = vpack.c.b16 %v1915_v40, %v1914_v37  ;;  %v2827_v55 = vsel %vm2811_vm3, %v2797_v54, 0.0  ;;  %v514_v60 = vadd.f32 %v5254_v61, %v513_v47 }
 0x13b   : > { %v965_v62 = vunpack.c.l.b16 %v845_v52  ;;  %v2867_v0 = vpack.c.bf16 %v2827_v55, %v2827_v55  ;;  %v2987_v43 = vunpack.c.l.b16 %v2866_v56 }
 0x13c   : > { %2030 = vmatmul.bf16.gmra.mxu0 %v5281_v42  ;;  %v964_v1 = vunpack.c.l.b16 %v844_v58  ;;  %v575_v57 = vmax.f32 %v514_v60, 0.0  ;;  %v5435_v60 = vpop.f32.mrf.mxu1 }
 0x13d   : > { %v2988_v5 = vunpack.c.l.b16 %v2867_v0  ;;  %6611 = vst [vmem:[#allocation19_spill] sm:$0xff] %v5435_v60 }
 0x13e   : > { %v5408_v6 = vpack.c.b16 %v965_v62, %v964_v1  ;;  %v1795_v13 = vpack.c.bf16 %v575_v57, %v575_v57  ;;  %v715_v15 = vrot.slane %v575_v57, 6  ;;  %v2737_v17 = vrot.slane %v575_v57, 2 }
 0x13f   : > { %v5410_v11 = vpack.c.b16 %v2988_v5, %v2987_v43 }
 0x140   : > { %1105 = vmatmul.bf16.gmra.mxu1 %v5408_v6  ;;  %1357 = vmatmul.bf16.gmra.mxu2 %v5408_v6  ;;  %v1916_v25 = vunpack.c.l.b16 %v1795_v13 }
 0x141   : > { %v515_v12 = vpop.f32.mrf.mxu0 }
 0x142   : > { %v516_v48 = vadd.f32 %v5254_v61, %v515_v12 }
 0x144   : > { %v576_v14 = vmax.f32 %v516_v48, 0.0 }
 0x146   : > { %v735_v20 = vrot.slane %v576_v14, 6  ;;  %v2757_v22 = vrot.slane %v576_v14, 2  ;;  %v1796_v23 = vpack.c.bf16 %v576_v14, %v576_v14 }
 0x148   : > { %v756_v26 = vsel %vm747_vm1, %v715_v15, %v735_v20  ;;  %v776_v27 = vsel %vm747_vm1, %v735_v20, %v715_v15  ;;  %v1917_v28 = vunpack.c.l.b16 %v1796_v23  ;;  %v2778_v50 = vsel %vm2769_vm2, %v2737_v17, %v2757_v22 }
 0x149   : > { %v518_v30 = vpop.f32.mrf.mxu0  ;;  %v806_v32 = vsel %vm788_vm0, %v776_v27, 0.0  ;;  %v847_v35 = vpack.c.bf16 %v756_v26, %v756_v26  ;;  %v2798_v36 = vsel %vm2769_vm2, %v2757_v22, %v2737_v17  ;;  %v2868_v37 = vpack.c.bf16 %v2778_v50, %v2778_v50  ;;  %v5448_v22 = vpop.f32.mrf.mxu1  ;;  %v4631_v50 = vld [vmem:[#allocation9 + $0x128] sm:$0xff] }
 0x14a   : > { %v846_v38 = vpack.c.bf16 %v806_v32, %v806_v32  ;;  %v5427_v39 = vpack.c.b16 %v1917_v28, %v1916_v25  ;;  %v2829_v40 = vsel %vm2811_vm3, %v2798_v36, 0.0  ;;  %v519_v41 = vadd.f32 %v5254_v61, %v518_v30  ;;  %2276 = vmatpush.bf16.msrb.mxu1 %v4631_v50  ;;  %v4627_v50 = vld [vmem:[#allocation9 + $0x108] sm:$0xff] }
 0x14b   : > { %v967_v47 = vunpack.c.l.b16 %v847_v35  ;;  %v2869_v53 = vpack.c.bf16 %v2829_v40, %v2829_v40  ;;  %v2989_v52 = vunpack.c.l.b16 %v2868_v37 }
 0x14c   : > { %2035 = vmatmul.bf16.gmra.mxu0 %v5304_v18  ;;  %v966_v54 = vunpack.c.l.b16 %v846_v38  ;;  %v577_v55 = vmax.f32 %v519_v41, 0.0 }
 0x14d   : > { %v2990_v56 = vunpack.c.l.b16 %v2869_v53  ;;  %v4630_v53 = vld [vmem:[#allocation9 + $0x120] sm:$0xff] }
 0x14e   : > { %v5433_v58 = vpack.c.b16 %v967_v47, %v966_v54  ;;  %v1797_v1 = vpack.c.bf16 %v577_v55, %v577_v55  ;;  %v716_v3 = vrot.slane %v577_v55, 6  ;;  %v2738_v5 = vrot.slane %v577_v55, 2  ;;  %2277 = vmatpush.bf16.msrb.mxu1 %v4630_v53 }
 0x14f   : > { %v5437_v62 = vpack.c.b16 %v2990_v56, %v2989_v52 }
 0x150   : > { %1110 = vmatmul.bf16.gmra.mxu1 %v5433_v58  ;;  %1362 = vmatmul.bf16.gmra.mxu2 %v5433_v58  ;;  %v1918_v48 = vunpack.c.l.b16 %v1797_v1 }
 0x151   : > { %v520_v0 = vpop.f32.mrf.mxu0  ;;  %v5467_v1 = vpop.f32.mrf.mxu1 }
 0x152   : > { %v521_v43 = vadd.f32 %v5254_v61, %v520_v0  ;;  %v4629_v0 = vld [vmem:[#allocation9 + $0x118] sm:$0xff]  ;;  %6612 = vst [vmem:[#allocation20_spill] sm:$0xff] %v5467_v1 }
 0x153   : > { %2278 = vmatpush.bf16.msrb.mxu1 %v4629_v0 }
 0x154   : > { %v578_v2 = vmax.f32 %v521_v43, 0.0 }
 0x156   : > { %v736_v7 = vrot.slane %v578_v2, 6  ;;  %v2758_v57 = vrot.slane %v578_v2, 2  ;;  %v1798_v12 = vpack.c.bf16 %v578_v2, %v578_v2 }
 0x157   : > { %2279 = vmatpush.bf16.msrb.mxu1 %v4628_v9  ;;  %v4641_v9 = vld [vmem:[#allocation9 + $0x1f8] sm:$0xff] }
 0x158   : > { %v757_v13 = vsel %vm747_vm1, %v716_v3, %v736_v7  ;;  %v777_v14 = vsel %vm747_vm1, %v736_v7, %v716_v3  ;;  %v1919_v15 = vunpack.c.l.b16 %v1798_v12  ;;  %v2779_v17 = vsel %vm2769_vm2, %v2738_v5, %v2758_v57  ;;  %2536 = vmatpush.bf16.msrb.mxu2 %v4641_v9 }
 0x159   : > { %v523_v20 = vpop.f32.mrf.mxu0  ;;  %v808_v23 = vsel %vm788_vm0, %v777_v14, 0.0  ;;  %v849_v25 = vpack.c.bf16 %v757_v13, %v757_v13  ;;  %v2799_v26 = vsel %vm2769_vm2, %v2758_v57, %v2738_v5  ;;  %v2870_v27 = vpack.c.bf16 %v2779_v17, %v2779_v17 }
 0x15a   : > { %v848_v28 = vpack.c.bf16 %v808_v23, %v808_v23  ;;  %v5454_v30 = vpack.c.b16 %v1919_v15, %v1918_v48  ;;  %v2831_v32 = vsel %vm2811_vm3, %v2799_v26, 0.0  ;;  %v524_v35 = vadd.f32 %v5254_v61, %v523_v20 }
 0x15b   : > { %v969_v36 = vunpack.c.l.b16 %v849_v25  ;;  %v2871_v37 = vpack.c.bf16 %v2831_v32, %v2831_v32  ;;  %v2991_v38 = vunpack.c.l.b16 %v2870_v27  ;;  %2280 = vmatpush.bf16.msrb.mxu1 %v4627_v50 }
 0x15c   : > { %2040 = vmatmul.bf16.gmra.mxu0 %v5327_v63  ;;  %v968_v40 = vunpack.c.l.b16 %v848_v28  ;;  %v579_v52 = vmax.f32 %v524_v35, 0.0 }
 0x15d   : > { %v2992_v41 = vunpack.c.l.b16 %v2871_v37 }
 0x15e   : > { %v5460_v47 = vpack.c.b16 %v969_v36, %v968_v40  ;;  %v1799_v43 = vpack.c.bf16 %v579_v52, %v579_v52  ;;  %v717_v3 = vrot.slane %v579_v52, 6  ;;  %v2739_v5 = vrot.slane %v579_v52, 2 }
 0x15f   : > { %v5462_v54 = vpack.c.b16 %v2992_v41, %v2991_v38 }
 0x160   : > { %1115 = vmatmul.bf16.gmra.mxu1 %v5460_v47  ;;  %1367 = vmatmul.bf16.gmra.mxu2 %v5460_v47  ;;  %v1920_v48 = vunpack.c.l.b16 %v1799_v43 }
 0x161   : > { %v525_v56 = vpop.f32.mrf.mxu0 }
 0x162   : > { %v526_v55 = vadd.f32 %v5254_v61, %v525_v56  ;;  %v5490_v56 = vld [vmem:[%s6583_s4] ss:$0 sm:$0xff] }
 0x164   : > { %v580_v2 = vmax.f32 %v526_v55, 0.0  ;;  %v4626_v55 = vld [vmem:[#allocation9 + $0x100] sm:$0xff] }
 0x165   : > { %2281 = vmatpush.bf16.msrb.mxu1 %v4626_v55 }
 0x166   : > { %v737_v7 = vrot.slane %v580_v2, 6  ;;  %v2759_v57 = vrot.slane %v580_v2, 2  ;;  %v1800_v12 = vpack.c.bf16 %v580_v2, %v580_v2 }
 0x168   : > { %v758_v13 = vsel %vm747_vm1, %v717_v3, %v737_v7  ;;  %v778_v14 = vsel %vm747_vm1, %v737_v7, %v717_v3  ;;  %v1921_v15 = vunpack.c.l.b16 %v1800_v12  ;;  %v2780_v17 = vsel %vm2769_vm2, %v2739_v5, %v2759_v57 }
 0x169   : > { %v528_v20 = vpop.f32.mrf.mxu0  ;;  %v810_v23 = vsel %vm788_vm0, %v778_v14, 0.0  ;;  %v851_v25 = vpack.c.bf16 %v758_v13, %v758_v13  ;;  %v2800_v26 = vsel %vm2769_vm2, %v2759_v57, %v2739_v5  ;;  %v2872_v27 = vpack.c.bf16 %v2780_v17, %v2780_v17  ;;  %v543_v5 = vpop.f32.mrf.mxu3 }
 0x16a   : > { %v850_v28 = vpack.c.bf16 %v810_v23, %v810_v23  ;;  %v5479_v32 = vpack.c.b16 %v1921_v15, %v1920_v48  ;;  %v2833_v35 = vsel %vm2811_vm3, %v2800_v26, 0.0  ;;  %v529_v36 = vadd.f32 %v5254_v61, %v528_v20  ;;  %v4640_v26 = vld [vmem:[#allocation9 + $0x1f0] sm:$0xff] }
 0x16b   : > { %v971_v37 = vunpack.c.l.b16 %v851_v25  ;;  %v2873_v38 = vpack.c.bf16 %v2833_v35, %v2833_v35  ;;  %v2993_v40 = vunpack.c.l.b16 %v2872_v27  ;;  %v1151_v3 = vadd.f32 %v5490_v56, %v5415_v16  ;;  %2537 = vmatpush.bf16.msrb.mxu2 %v4640_v26 }
 0x16c   : > { %2045 = vmatmul.bf16.gmra.mxu0 %v5352_v31  ;;  %v970_v41 = vunpack.c.l.b16 %v850_v28  ;;  %v581_v0 = vmax.f32 %v529_v36, 0.0  ;;  %v544_v25 = vadd.f32 %v5254_v61, %v543_v5 }
 0x16d   : > { %v5485_v53 = vpop.f32.mrf.mxu1  ;;  %v2994_v52 = vunpack.c.l.b16 %v2873_v38 }
 0x16e   : > { %v5492_v43 = vpack.c.b16 %v971_v37, %v970_v41  ;;  %v1801_v12 = vpack.c.bf16 %v581_v0, %v581_v0  ;;  %v718_v15 = vrot.slane %v581_v0, 6  ;;  %v2740_v17 = vrot.slane %v581_v0, 2  ;;  %v4639_v0 = vld [vmem:[#allocation9 + $0x1e8] sm:$0xff] }
 0x16f   : > { %v5494_v2 = vpack.c.b16 %v2994_v52, %v2993_v40  ;;  %2538 = vmatpush.bf16.msrb.mxu2 %v4639_v0 }
 0x170   : > { %1120 = vmatmul.bf16.gmra.mxu1 %v5492_v43  ;;  %1372 = vmatmul.bf16.gmra.mxu2 %v5492_v43  ;;  %v1922_v28 = vunpack.c.l.b16 %v1801_v12 }
 0x171   : > { %6613 = vst [vmem:[#allocation21_spill] sm:$0xff] %v5494_v2  ;;  %v530_v7 = vpop.f32.mrf.mxu0  ;;  %v545_v36 = vpop.f32.mrf.mxu3 }
 0x172   : > { %v531_v57 = vadd.f32 %v5254_v61, %v530_v7  ;;  %v546_v55 = vadd.f32 %v5254_v61, %v545_v36  ;;  %v5517_v7 = vmax.f32 %v544_v25, 0.0 }
 0x173   : > { %v1333_v48 = vpop.f32.mrf.mxu2 }
 0x174   : > { %v582_v13 = vmax.f32 %v531_v57, 0.0  ;;  %v5501_v14 = vadd.f32 %v1333_v48, %v1151_v3 }
 0x175   : > { %v5503_v20 = vpop.f32.mrf.mxu1 }
 0x176   : > { %6614 = vst [vmem:[#allocation22_spill] sm:$0xff] %v5501_v14  ;;  %v738_v16 = vrot.slane %v582_v13, 6  ;;  %v2760_v23 = vrot.slane %v582_v13, 2  ;;  %v1802_v27 = vpack.c.bf16 %v582_v13, %v582_v13  ;;  %v5525_v13 = vmax.f32 %v546_v55, 0.0 }
 0x178   : > { %v759_v50 = vsel %vm747_vm1, %v718_v15, %v738_v16  ;;  %v779_v35 = vsel %vm747_vm1, %v738_v16, %v718_v15  ;;  %v1923_v37 = vunpack.c.l.b16 %v1802_v27  ;;  %v2781_v38 = vsel %vm2769_vm2, %v2740_v17, %v2760_v23 }
 0x179   : > { %v533_v40 = vpop.f32.mrf.mxu0  ;;  %v812_v41 = vsel %vm788_vm0, %v779_v35, 0.0  ;;  %v853_v52 = vpack.c.bf16 %v759_v50, %v759_v50  ;;  %v2801_v3 = vsel %vm2769_vm2, %v2760_v23, %v2740_v17  ;;  %v2874_v15 = vpack.c.bf16 %v2781_v38, %v2781_v38  ;;  %v4638_v35 = vld [vmem:[#allocation9 + $0x1e0] sm:$0xff] }
 0x17a   : > { %v852_v5 = vpack.c.bf16 %v812_v41, %v812_v41  ;;  %v5519_v57 = vpack.c.b16 %v1923_v37, %v1922_v28  ;;  %v2835_v9 = vsel %vm2811_vm3, %v2801_v3, 0.0  ;;  %v534_v17 = vadd.f32 %v5254_v61, %v533_v40  ;;  %2539 = vmatpush.bf16.msrb.mxu2 %v4638_v35  ;;  %v548_v40 = vpop.f32.mrf.mxu3 }
 0x17b   : > { %v5523_v12 = vpop.f32.mrf.mxu2  ;;  %v973_v48 = vunpack.c.l.b16 %v853_v52  ;;  %v2875_v16 = vpack.c.bf16 %v2835_v9, %v2835_v9  ;;  %v2995_v25 = vunpack.c.l.b16 %v2874_v15  ;;  %v2743_v28 = vrot.slane %v5517_v7, 2 }
 0x17c   : > { %6615 = vst [vmem:[#allocation23_spill] sm:$0xff] %v5523_v12  ;;  %2050 = vmatmul.bf16.gmra.mxu0 %v5375_v10  ;;  %v972_v26 = vunpack.c.l.b16 %v852_v5  ;;  %v2763_v50 = vrot.slane %v5525_v13, 2  ;;  %v1807_v37 = vpack.c.bf16 %v5517_v7, %v5517_v7  ;;  %v1153_v41 = vadd.f32 %v5490_v56, %v5448_v22  ;;  %v4637_v5 = vld [vmem:[#allocation9 + $0x1d8] sm:$0xff] }
 0x17d   : > { %v5529_v23 = vpop.f32.mrf.mxu1  ;;  %v2996_v27 = vunpack.c.l.b16 %v2875_v16  ;;  %v583_v52 = vmax.f32 %v534_v17, 0.0  ;;  %v1808_v0 = vpack.c.bf16 %v5525_v13, %v5525_v13 }
 0x17e   : > { %v5533_v36 = vpack.c.b16 %v973_v48, %v972_v26  ;;  %v2804_v9 = vsel %vm2769_vm2, %v2763_v50, %v2743_v28  ;;  %v1928_v15 = vunpack.c.l.b16 %v1807_v37  ;;  %2540 = vmatpush.bf16.msrb.mxu2 %v4637_v5  ;;  %v2784_v37 = vsel %vm2769_vm2, %v2743_v28, %v2763_v50  ;;  %v4635_v50 = vld [vmem:[#allocation9 + $0x1c8] sm:$0xff] }
 0x17f   : > { %v5537_v38 = vpack.c.b16 %v2996_v27, %v2995_v25  ;;  %v719_v26 = vrot.slane %v583_v52, 6  ;;  %v1803_v17 = vpack.c.bf16 %v583_v52, %v583_v52  ;;  %v1929_v27 = vunpack.c.l.b16 %v1808_v0 }
 0x180   : > { %1125 = vmatmul.bf16.gmra.mxu1 %v5533_v36  ;;  %1377 = vmatmul.bf16.gmra.mxu2 %v5533_v36  ;;  %v2741_v35 = vrot.slane %v583_v52, 2 }
 0x181   : > { %6616 = vst [vmem:[#allocation24_spill] sm:$0xff] %v5537_v38  ;;  %v535_v55 = vpop.f32.mrf.mxu0  ;;  %v4636_v38 = vld [vmem:[#allocation9 + $0x1d0] sm:$0xff]  ;;  %v5553_v2 = vpack.c.b16 %v1929_v27, %v1928_v15 }
 0x182   : > { %v536_v3 = vadd.f32 %v5254_v61, %v535_v55  ;;  %v549_v55 = vadd.f32 %v5254_v61, %v548_v40  ;;  %2541 = vmatpush.bf16.msrb.mxu2 %v4636_v38  ;;  %v550_v0 = vpop.f32.mrf.mxu3 }
 0x183   : > { %v1338_v48 = vpop.f32.mrf.mxu2  ;;  %v551_v28 = vadd.f32 %v5254_v61, %v550_v0 }
 0x184   : > { %v584_v22 = vmax.f32 %v536_v3, 0.0  ;;  %v5548_v16 = vadd.f32 %v1338_v48, %v1153_v41 }
 0x185   : > { %v5550_v25 = vpop.f32.mrf.mxu1 }
 0x186   : > { %6617 = vst [vmem:[#allocation25_spill] sm:$0xff] %v5548_v16  ;;  %v739_v34 = vrot.slane %v584_v22, 6  ;;  %v2761_v44 = vrot.slane %v584_v22, 2  ;;  %v1804_v1 = vpack.c.bf16 %v584_v22, %v584_v22  ;;  %v1924_v22 = vunpack.c.l.b16 %v1803_v17  ;;  %2542 = vmatpush.bf16.msrb.mxu2 %v4635_v50 }
 0x187   : > { %v5568_v16 = vmax.f32 %v549_v55, 0.0  ;;  %v2880_v50 = vpack.c.bf16 %v2784_v37, %v2784_v37 }
 0x188   : > { %v760_v41 = vsel %vm747_vm1, %v719_v26, %v739_v34  ;;  %v780_v3 = vsel %vm747_vm1, %v739_v34, %v719_v26  ;;  %v2782_v52 = vsel %vm2769_vm2, %v2741_v35, %v2761_v44  ;;  %v2802_v40 = vsel %vm2769_vm2, %v2761_v44, %v2741_v35 }
 0x189   : > { %v538_v5 = vpop.f32.mrf.mxu0  ;;  %v814_v48 = vsel %vm788_vm0, %v780_v3, 0.0  ;;  %v855_v15 = vpack.c.bf16 %v760_v41, %v760_v41  ;;  %v1925_v34 = vunpack.c.l.b16 %v1804_v1  ;;  %v2837_v38 = vsel %vm2811_vm3, %v2802_v40, 0.0 }
 0x18a   : > { %v854_v27 = vpack.c.bf16 %v814_v48, %v814_v48  ;;  %v5574_v44 = vmax.f32 %v551_v28, 0.0  ;;  %v2876_v35 = vpack.c.bf16 %v2782_v52, %v2782_v52  ;;  %v2877_v60 = vpack.c.bf16 %v2837_v38, %v2837_v38 }
 0x18b   : > { %v5572_v26 = vpop.f32.mrf.mxu2  ;;  %v975_v12 = vunpack.c.l.b16 %v855_v15  ;;  %v539_v41 = vadd.f32 %v5254_v61, %v538_v5  ;;  %v5578_v17 = vpack.c.b16 %v1925_v34, %v1924_v22  ;;  %v1809_v40 = vpack.c.bf16 %v5568_v16, %v5568_v16  ;;  %v4634_v15 = vld [vmem:[#allocation9 + $0x1c0] sm:$0xff] }
 0x18c   : > { %6618 = vst [vmem:[#allocation26_spill] sm:$0xff] %v5572_v26  ;;  %2055 = vmatmul.bf16.gmra.mxu0 %v5400_v59  ;;  %v974_v3 = vunpack.c.l.b16 %v854_v27  ;;  %v2997_v1 = vunpack.c.l.b16 %v2876_v35  ;;  %v2998_v0 = vunpack.c.l.b16 %v2877_v60  ;;  %v2744_v48 = vrot.slane %v5568_v16, 2  ;;  %2543 = vmatpush.bf16.msrb.mxu2 %v4634_v15 }
 0x18d   : > { %v5580_v55 = vpop.f32.mrf.mxu1  ;;  %v2764_v52 = vrot.slane %v5574_v44, 2  ;;  %v2841_v5 = vsel %vm2811_vm3, %v2804_v9, 0.0  ;;  %v585_v22 = vmax.f32 %v539_v41, 0.0  ;;  %v1810_v34 = vpack.c.bf16 %v5574_v44, %v5574_v44  ;;  %v5602_v9 = vld [vmem:[%s6581_s2] ss:$0 sm:$0xff] }
 0x18e   : > { %v5586_v28 = vpack.c.b16 %v975_v12, %v974_v3  ;;  %v5588_v61 = vpack.c.b16 %v2998_v0, %v2997_v1  ;;  %v2881_v27 = vpack.c.bf16 %v2841_v5, %v2841_v5  ;;  %v3001_v38 = vunpack.c.l.b16 %v2880_v50 }
 0x18f   : > { %v1155_v12 = vadd.f32 %v5490_v56, %v5485_v53  ;;  %v2805_v41 = vsel %vm2769_vm2, %v2764_v52, %v2744_v48  ;;  %v1930_v1 = vunpack.c.l.b16 %v1809_v40  ;;  %v1931_v0 = vunpack.c.l.b16 %v1810_v34 }
 0x190   : > { %6619 = vst [vmem:[#allocation27_spill] sm:$0xff] %v5586_v28  ;;  %1130 = vmatmul.bf16.vlgmr.msrb.gmra.mxu3 %v5586_v28  ;;  %1382 = vmatmul.bf16.gmra.mxu2 %v5586_v28  ;;  %v3002_v35 = vunpack.c.l.b16 %v2881_v27  ;;  %v1805_v15 = vpack.c.bf16 %v585_v22, %v585_v22  ;;  %v2843_v27 = vsel %vm2811_vm3, %v2805_v41, 0.0  ;;  %v720_v26 = vrot.slane %v585_v22, 6 }
 0x191   : > { %6620 = vst [vmem:[#allocation28_spill] sm:$0xff] %v5588_v61  ;;  %v540_v60 = vpop.f32.mrf.mxu0  ;;  %2282 = vmatmul.bf16.vlgmr.msrb.gmra.mxu1 %v5281_v42  ;;  %v5611_v42 = vpack.c.b16 %v1931_v0, %v1930_v1  ;;  %v2742_v14 = vrot.slane %v585_v22, 2 }
 0x192   : > { %v541_v37 = vadd.f32 %v5602_v9, %v540_v60  ;;  %v5613_v61 = vpack.c.b16 %v3002_v35, %v3001_v38  ;;  %v2785_v60 = vsel %vm2769_vm2, %v2744_v48, %v2764_v52  ;;  %v1926_v1 = vunpack.c.l.b16 %v1805_v15 }
 0x193   : > { %v1343_v3 = vpop.f32.mrf.mxu2  ;;  %v721_v15 = vrot.slane %v5517_v7, 6 }
 0x194   : > { %v586_v5 = vmax.f32 %v541_v37, 0.0  ;;  %v5607_v50 = vadd.f32 %v1343_v3, %v1155_v12  ;;  %6622 = vst [vmem:[#allocation30_spill] sm:$0xff] %v5613_v61  ;;  %v1156_v12 = vadd.f32 %v5490_v56, %v5503_v20  ;;  %v2882_v3 = vpack.c.bf16 %v2785_v60, %v2785_v60 }
 0x195   : > { %v5609_v53 = vpop.f32.mrf.mxu1 }
 0x196   : > { %6621 = vst [vmem:[#allocation29_spill] sm:$0xff] %v5607_v50  ;;  %v740_v40 = vrot.slane %v586_v5, 6  ;;  %v2762_v34 = vrot.slane %v586_v5, 2  ;;  %v1806_v37 = vpack.c.bf16 %v586_v5, %v586_v5  ;;  %v2883_v50 = vpack.c.bf16 %v2843_v27, %v2843_v27 }
 0x198   : > { %v761_v38 = vsel %vm747_vm1, %v720_v26, %v740_v40  ;;  %v781_v35 = vsel %vm747_vm1, %v740_v40, %v720_v26  ;;  %v2783_v48 = vsel %vm2769_vm2, %v2742_v14, %v2762_v34  ;;  %v2803_v52 = vsel %vm2769_vm2, %v2762_v34, %v2742_v14 }
 0x199   : > { %v5629_v22 = vpop.f32.mrf.mxu0  ;;  %v816_v20 = vsel %vm788_vm0, %v781_v35, 0.0  ;;  %v857_v41 = vpack.c.bf16 %v761_v38, %v761_v38  ;;  %v1927_v0 = vunpack.c.l.b16 %v1806_v37  ;;  %v2839_v60 = vsel %vm2811_vm3, %v2803_v52, 0.0 }
 0x19a   : > { %6623 = vst [vmem:[#allocation31_spill] sm:$0xff] %v5629_v22  ;;  %v856_v5 = vpack.c.bf16 %v816_v20, %v816_v20  ;;  %v2878_v27 = vpack.c.bf16 %v2783_v48, %v2783_v48  ;;  %v3003_v26 = vunpack.c.l.b16 %v2882_v3  ;;  %v2879_v28 = vpack.c.bf16 %v2839_v60, %v2839_v60 }
 0x19b   : > { %v1345_v40 = vpop.f32.mrf.mxu2  ;;  %v977_v61 = vunpack.c.l.b16 %v857_v41  ;;  %v5635_v19 = vpack.c.b16 %v1927_v0, %v1926_v1  ;;  %v3004_v14 = vunpack.c.l.b16 %v2883_v50  ;;  %v741_v37 = vrot.slane %v5525_v13, 6 }
 0x19c   : > { %v5637_v34 = vadd.f32 %v1345_v40, %v1156_v12  ;;  %2060 = vmatmul.bf16.gmra.mxu0 %v5427_v39  ;;  %v976_v35 = vunpack.c.l.b16 %v856_v5  ;;  %v2999_v38 = vunpack.c.l.b16 %v2878_v27  ;;  %v3000_v48 = vunpack.c.l.b16 %v2879_v28 }
 0x19d   : > { %v5642_v20 = vpop.f32.mrf.mxu1  ;;  %v5644_v3 = vpack.c.b16 %v3004_v14, %v3003_v26  ;;  %v782_v7 = vsel %vm747_vm1, %v741_v37, %v721_v15  ;;  %v1157_v13 = vadd.f32 %v5490_v56, %v5529_v23  ;;  %v1158_v23 = vadd.f32 %v5490_v56, %v5550_v25 }
 0x19e   : > { %v5646_v52 = vpack.c.b16 %v977_v61, %v976_v35  ;;  %v5648_v41 = vpack.c.b16 %v3000_v48, %v2999_v38  ;;  %v762_v61 = vsel %vm747_vm1, %v721_v15, %v741_v37  ;;  %v818_v1 = vsel %vm788_vm0, %v782_v7, 0.0  ;;  %v4617_v7 = vld [vmem:[#allocation9 + $0x1b8] sm:$0xff] }
 0x19f   : > { %6624 = vst [vmem:[#allocation32_spill] sm:$0xff] %v5644_v3  ;;  %v858_v5 = vpack.c.bf16 %v818_v1, %v818_v1  ;;  %v859_v60 = vpack.c.bf16 %v762_v61, %v762_v61  ;;  %v722_v35 = vrot.slane %v5568_v16, 6  ;;  %v742_v38 = vrot.slane %v5574_v44, 6  ;;  %1586 = vmatpush.bf16.msrb.mxu3 %v4617_v7 }
 0x1a0   : > { %1135 = vmatmul.bf16.gmra.mxu3 %v5646_v52  ;;  %1387 = vmatmul.bf16.gmra.mxu2 %v5646_v52  ;;  %v553_v1 = vpop.f32.mrf.mxu3 }
 0x1a1   : > { %v5652_v50 = vpop.f32.mrf.mxu0  ;;  %2287 = vmatmul.bf16.gmra.mxu1 %v5304_v18  ;;  %v978_v18 = vunpack.c.l.b16 %v858_v5  ;;  %v979_v40 = vunpack.c.l.b16 %v859_v60  ;;  %v783_v48 = vsel %vm747_vm1, %v742_v38, %v722_v35  ;;  %v4616_v60 = vld [vmem:[#allocation9 + $0x1b0] sm:$0xff] }
 0x1a2   : > { %6625 = vst [vmem:[#allocation33_spill] sm:$0xff] %v5652_v50  ;;  %v820_v61 = vsel %vm788_vm0, %v783_v48, 0.0 }
 0x1a3   : > { %v1348_v28 = vpop.f32.mrf.mxu2  ;;  %v5678_v37 = vpack.c.b16 %v979_v40, %v978_v18  ;;  %1587 = vmatpush.bf16.msrb.mxu3 %v4616_v60  ;;  %v1160_v18 = vadd.f32 %v5490_v56, %v5609_v53 }
 0x1a4   : > { %v5659_v12 = vadd.f32 %v1348_v28, %v1157_v13  ;;  %v1159_v13 = vadd.f32 %v5490_v56, %v5580_v55  ;;  %v763_v28 = vsel %vm747_vm1, %v722_v35, %v742_v38  ;;  %v554_v55 = vadd.f32 %v5602_v9, %v553_v1 }
 0x1a5   : > { %v5665_v0 = vpop.f32.mrf.mxu1 }
 0x1a6   : > { %v5702_v38 = vmax.f32 %v554_v55, 0.0  ;;  %v4615_v55 = vld [vmem:[#allocation9 + $0x1a8] sm:$0xff]  ;;  %v1162_v22 = vadd.f32 %v5490_v56, %v5665_v0 }
 0x1a7   : > { %1588 = vmatpush.bf16.msrb.mxu3 %v4615_v55 }
 0x1a8   : > { %v1811_v1 = vpack.c.bf16 %v5702_v38, %v5702_v38  ;;  %v2745_v60 = vrot.slane %v5702_v38, 2 }
 0x1a9   : > { %v5667_v27 = vpop.f32.mrf.mxu0 }
 0x1aa   : > { %6626 = vst [vmem:[#allocation34_spill] sm:$0xff] %v5667_v27 }
 0x1ab   : > { %v1350_v26 = vpop.f32.mrf.mxu2 }
 0x1ac   : > { %v5671_v14 = vadd.f32 %v1350_v26, %v1158_v23  ;;  %2065 = vmatmul.bf16.gmra.mxu0 %v5454_v30  ;;  %v860_v23 = vpack.c.bf16 %v820_v61, %v820_v61  ;;  %v861_v26 = vpack.c.bf16 %v763_v28, %v763_v28 }
 0x1ad   : > { %v5676_v15 = vpop.f32.mrf.mxu1 }
 0x1ae   : > { %v980_v7 = vunpack.c.l.b16 %v860_v23  ;;  %v981_v35 = vunpack.c.l.b16 %v861_v26 }
 0x1b0   : > { %1140 = vmatmul.bf16.gmra.mxu3 %v5678_v37  ;;  %2544 = vmatmul.bf16.vlgmr.msrb.gmra.mxu2 %v5327_v63  ;;  %v5710_v61 = vpack.c.b16 %v981_v35, %v980_v7  ;;  %v2218_v35 = vunpack.c.l.b16 %v1811_v1 }
 0x1b1   : > { %v5682_v25 = vpop.f32.mrf.mxu0  ;;  %2292 = vmatmul.bf16.gmra.mxu1 %v5327_v63 }
 0x1b2   : > { %6627 = vst [vmem:[#allocation35_spill] sm:$0xff] %v5682_v25 }
 0x1b3   : > { %v1353_v16 = vpop.f32.mrf.mxu2 }
 0x1b4   : > { %v5689_v44 = vadd.f32 %v1353_v16, %v1159_v13  ;;  %v555_v13 = vpop.f32.mrf.mxu3 }
 0x1b5   : > { %v5695_v5 = vpop.f32.mrf.mxu1  ;;  %v556_v28 = vadd.f32 %v5602_v9, %v555_v13 }
 0x1b7   : > { %v5714_v53 = vmax.f32 %v556_v28, 0.0 }
 0x1b9   : > { %v5698_v63 = vpop.f32.mrf.mxu0  ;;  %v2765_v26 = vrot.slane %v5714_v53, 2 }
 0x1ba   : > { %6628 = vst [vmem:[#allocation36_spill] sm:$0xff] %v5698_v63 }
 0x1bb   : > { %v1355_v40 = vpop.f32.mrf.mxu2  ;;  %v2806_v50 = vsel %vm2769_vm2, %v2765_v26, %v2745_v60 }
 0x1bc   : > { %v5704_v48 = vadd.f32 %v1355_v40, %v1160_v18  ;;  %2070 = vmatmul.bf16.gmra.mxu0 %v5479_v32  ;;  %v1812_v18 = vpack.c.bf16 %v5714_v53, %v5714_v53  ;;  %v1161_v40 = vadd.f32 %v5490_v56, %v5642_v20  ;;  %v558_v63 = vpop.f32.mrf.mxu3  ;;  %v4614_v20 = vld [vmem:[#allocation9 + $0x1a0] sm:$0xff] }
 0x1bd   : > { %v5707_v16 = vpop.f32.mrf.mxu1  ;;  %v559_v1 = vadd.f32 %v5602_v9, %v558_v63  ;;  %1589 = vmatpush.bf16.msrb.mxu3 %v4614_v20 }
 0x1be   : > { %v2219_v13 = vunpack.c.l.b16 %v1812_v18 }
 0x1bf   : > { %v5744_v3 = vmax.f32 %v559_v1, 0.0  ;;  %v4613_v1 = vld [vmem:[#allocation9 + $0x198] sm:$0xff] }
 0x1c0   : > { %1145 = vmatmul.bf16.gmra.mxu3 %v5710_v61  ;;  %2549 = vmatmul.bf16.gmra.mxu2 %v5352_v31  ;;  %v5733_v27 = vpack.c.b16 %v2219_v13, %v2218_v35 }
 0x1c1   : > { %v5719_v23 = vpop.f32.mrf.mxu0  ;;  %2297 = vmatmul.bf16.gmra.mxu1 %v5352_v31  ;;  %v2845_v31 = vsel %vm2811_vm3, %v2806_v50, 0.0  ;;  %v1813_v20 = vpack.c.bf16 %v5744_v3, %v5744_v3  ;;  %v2746_v0 = vrot.slane %v5744_v3, 2  ;;  %1590 = vmatpush.bf16.msrb.mxu3 %v4613_v1 }
 0x1c2   : > { %6629 = vst [vmem:[#allocation37_spill] sm:$0xff] %v5719_v23  ;;  %v2786_v23 = vsel %vm2769_vm2, %v2745_v60, %v2765_v26  ;;  %v2885_v18 = vpack.c.bf16 %v2845_v31, %v2845_v31 }
 0x1c3   : > { %v1358_v7 = vpop.f32.mrf.mxu2  ;;  %v2884_v55 = vpack.c.bf16 %v2786_v23, %v2786_v23 }
 0x1c4   : > { %v5727_v28 = vadd.f32 %v1358_v7, %v1161_v40  ;;  %v3292_v35 = vunpack.c.l.b16 %v2885_v18  ;;  %v560_v50 = vpop.f32.mrf.mxu3 }
 0x1c5   : > { %v5731_v25 = vpop.f32.mrf.mxu1  ;;  %v3291_v40 = vunpack.c.l.b16 %v2884_v55  ;;  %v561_v26 = vadd.f32 %v5602_v9, %v560_v50  ;;  %v1163_v9 = vadd.f32 %v5490_v56, %v5676_v15  ;;  %v4612_v15 = vld [vmem:[#allocation9 + $0x190] sm:$0xff] }
 0x1c6   : > { %1591 = vmatpush.bf16.msrb.mxu3 %v4612_v15 }
 0x1c7   : > { %v5749_v23 = vpack.c.b16 %v3292_v35, %v3291_v40  ;;  %v5756_v31 = vmax.f32 %v561_v26, 0.0  ;;  %v2220_v35 = vunpack.c.l.b16 %v1813_v20 }
 0x1c9   : > { %v5740_v7 = vpop.f32.mrf.mxu0  ;;  %6632 = vst [vmem:[#allocation40_spill] sm:$0xff] %v5749_v23  ;;  %v2766_v55 = vrot.slane %v5756_v31, 2  ;;  %v1814_v18 = vpack.c.bf16 %v5756_v31, %v5756_v31 }
 0x1ca   : > { %6630 = vst [vmem:[#allocation38_spill] sm:$0xff] %v5740_v7 }
 0x1cb   : > { %v1360_v13 = vpop.f32.mrf.mxu2  ;;  %v2787_v26 = vsel %vm2769_vm2, %v2746_v0, %v2766_v55  ;;  %v2807_v23 = vsel %vm2769_vm2, %v2766_v55, %v2746_v0  ;;  %v723_v0 = vrot.slane %v5702_v38, 6  ;;  %v4656_v38 = vld [vmem:[#allocation9 + $0x170] sm:$0xff] }
 0x1cc   : > { %v5746_v60 = vadd.f32 %v1360_v13, %v1162_v22  ;;  %2075 = vmatmul.bf16.gmra.mxu0 %v5519_v57  ;;  %v2221_v13 = vunpack.c.l.b16 %v1814_v18 }
 0x1cd   : > { %v5751_v63 = vpop.f32.mrf.mxu1 }
 0x1ce   : > { %6631 = vst [vmem:[#allocation39_spill] sm:$0xff] %v5746_v60  ;;  %v5775_v7 = vpack.c.b16 %v2221_v13, %v2220_v35  ;;  %v2886_v60 = vpack.c.bf16 %v2787_v26, %v2787_v26  ;;  %v4611_v26 = vld [vmem:[#allocation9 + $0x188] sm:$0xff] }
 0x1cf   : > { %1592 = vmatpush.bf16.msrb.mxu3 %v4611_v26  ;;  %v1166_v26 = vadd.f32 %v5490_v56, %v5731_v25 }
 0x1d0   : > { %1392 = vmatmul.bf16.vlgmr.msra.gmra.mxu3 %v5678_v37  ;;  %2554 = vmatmul.bf16.gmra.mxu2 %v5375_v10  ;;  %v3293_v20 = vunpack.c.l.b16 %v2886_v60  ;;  %v4657_v60 = vld [vmem:[#allocation9 + $0x178] sm:$0xff] }
 0x1d1   : > { %v5761_v22 = vpop.f32.mrf.mxu0  ;;  %2302 = vmatmul.bf16.gmra.mxu1 %v5375_v10  ;;  %v2847_v10 = vsel %vm2811_vm3, %v2807_v23, 0.0  ;;  %v743_v23 = vrot.slane %v5714_v53, 6  ;;  %3347 = vmatpush.bf16.msra.mxu0 %v4657_v60 }
 0x1d2   : > { %6633 = vst [vmem:[#allocation41_spill] sm:$0xff] %v5761_v22  ;;  %v2887_v1 = vpack.c.bf16 %v2847_v10, %v2847_v10  ;;  %v1165_v10 = vadd.f32 %v5490_v56, %v5707_v16 }
 0x1d3   : > { %v1363_v40 = vpop.f32.mrf.mxu2 }
 0x1d4   : > { %v5769_v50 = vadd.f32 %v1363_v40, %v1163_v9  ;;  %v3294_v9 = vunpack.c.l.b16 %v2887_v1  ;;  %v1164_v40 = vadd.f32 %v5490_v56, %v5695_v5  ;;  %v764_v1 = vsel %vm747_vm1, %v723_v0, %v743_v23 }
 0x1d5   : > { %v5773_v22 = vpop.f32.mrf.mxu1  ;;  %3348 = vmatpush.bf16.msra.mxu0 %v4656_v38  ;;  %v744_v38 = vrot.slane %v5756_v31, 6 }
 0x1d6   : > { %6634 = vst [vmem:[#allocation42_spill] sm:$0xff] %v5769_v50  ;;  %v5785_v35 = vpack.c.b16 %v3294_v9, %v3293_v20 }
 0x1d8   : > { %6636 = vst [vmem:[#allocation44_spill] sm:$0xff] %v5785_v35 }
 0x1d9   : > { %v5781_v18 = vpop.f32.mrf.mxu0 }
 0x1da   : > { %6635 = vst [vmem:[#allocation43_spill] sm:$0xff] %v5781_v18  ;;  %v4610_v18 = vld [vmem:[#allocation9 + $0x180] sm:$0xff] }
 0x1db   : > { %v1365_v50 = vpop.f32.mrf.mxu2  ;;  %1593 = vmatpush.bf16.msrb.mxu3 %v4610_v18  ;;  %v4649_v18 = vld [vmem:[#allocation9 + $0xb8] sm:$0xff] }
 0x1dc   : > { %v5787_v13 = vadd.f32 %v1365_v50, %v1164_v40  ;;  %2080 = vmatmul.bf16.gmra.mxu0 %v5578_v17  ;;  %v784_v50 = vsel %vm747_vm1, %v743_v23, %v723_v0  ;;  %v4655_v40 = vld [vmem:[#allocation9 + $0x168] sm:$0xff] }
 0x1dd   : > { %v5792_v55 = vpop.f32.mrf.mxu1  ;;  %v822_v20 = vsel %vm788_vm0, %v784_v50, 0.0  ;;  %3349 = vmatpush.bf16.msra.mxu0 %v4655_v40  ;;  %v724_v50 = vrot.slane %v5744_v3, 6  ;;  %v1167_v3 = vadd.f32 %v5490_v56, %v5751_v63  ;;  %v4650_v63 = vld [vmem:[#allocation9 + $0x140] sm:$0xff] }
 0x1de   : > { %v862_v60 = vpack.c.bf16 %v822_v20, %v822_v20  ;;  %v4653_v20 = vld [vmem:[#allocation9 + $0x158] sm:$0xff] }
 0x1df   : > { %v785_v25 = vsel %vm747_vm1, %v744_v38, %v724_v50  ;;  %3085 = vmatpush.bf16.msra.mxu3 %v4649_v18 }
 0x1e0   : > { %1397 = vmatmul.bf16.gmra.mxu3 %v5710_v61  ;;  %2559 = vmatmul.bf16.gmra.mxu2 %v5400_v59 }
 0x1e1   : > { %v5796_v5 = vpop.f32.mrf.mxu0  ;;  %2307 = vmatmul.bf16.gmra.mxu1 %v5400_v59  ;;  %v4654_v59 = vld [vmem:[#allocation9 + $0x160] sm:$0xff] }
 0x1e2   : > { %6637 = vst [vmem:[#allocation45_spill] sm:$0xff] %v5796_v5  ;;  %v863_v5 = vpack.c.bf16 %v764_v1, %v764_v1  ;;  %3350 = vmatpush.bf16.msra.mxu0 %v4654_v59  ;;  %v765_v59 = vsel %vm747_vm1, %v724_v50, %v744_v38 }
 0x1e3   : > { %v1368_v53 = vpop.f32.mrf.mxu2 }
 0x1e4   : > { %v5803_v15 = vadd.f32 %v1368_v53, %v1165_v10  ;;  %v1268_v53 = vunpack.c.l.b16 %v862_v60  ;;  %v1269_v0 = vunpack.c.l.b16 %v863_v5  ;;  %v4652_v5 = vld [vmem:[#allocation9 + $0x150] sm:$0xff] }
 0x1e5   : > { %v1118_v9 = vpop.f32.mrf.mxu1 }
 0x1e6   : > { %v5818_v40 = vpack.c.b16 %v1269_v0, %v1268_v53  ;;  %3351 = vmatpush.bf16.msra.mxu0 %v4653_v20  ;;  %v865_v20 = vpack.c.bf16 %v765_v59, %v765_v59 }
 0x1e8   : > { %v1271_v35 = vunpack.c.l.b16 %v865_v20 }
 0x1e9   : > { %v5809_v16 = vpop.f32.mrf.mxu0 }
 0x1ea   : > { %6638 = vst [vmem:[#allocation46_spill] sm:$0xff] %v5809_v16  ;;  %3352 = vmatpush.bf16.msra.mxu0 %v4652_v5  ;;  %v4665_v16 = vld [vmem:[#allocation9 + $0x238] sm:$0xff] }
 0x1eb   : > { %v1370_v10 = vpop.f32.mrf.mxu2  ;;  %3609 = vmatpush.bf16.msra.mxu1 %v4665_v16 }
 0x1ec   : > { %v5813_v23 = vadd.f32 %v1370_v10, %v1166_v26  ;;  %2085 = vmatmul.bf16.gmra.mxu0 %v5635_v19  ;;  %v824_v26 = vsel %vm788_vm0, %v785_v25, 0.0 }
 0x1ed   : > { %v1121_v1 = vpop.f32.mrf.mxu1  ;;  %v864_v0 = vpack.c.bf16 %v824_v26, %v824_v26 }
 0x1ee   : > { %6639 = vst [vmem:[#allocation47_spill] sm:$0xff] %v5813_v23 }
 0x1ef   : > { %v1270_v23 = vunpack.c.l.b16 %v864_v0 }
 0x1f0   : > { %1402 = vmatmul.bf16.gmra.mxu3 %v5818_v40  ;;  %2564 = vmatmul.bf16.gmra.mxu2 %v5427_v39 }
 0x1f1   : > { %2312 = vmatmul.bf16.gmra.mxu1 %v5427_v39  ;;  %v5827_v31 = vpop.f32.mrf.mxu0  ;;  %v4651_v39 = vld [vmem:[#allocation9 + $0x148] sm:$0xff]  ;;  %v5842_v18 = vpack.c.b16 %v1271_v35, %v1270_v23 }
 0x1f2   : > { %6640 = vst [vmem:[#allocation48_spill] sm:$0xff] %v5827_v31  ;;  %3353 = vmatpush.bf16.msra.mxu0 %v4651_v39  ;;  %v1168_v31 = vadd.f32 %v5490_v56, %v5773_v22  ;;  %v1169_v22 = vadd.f32 %v5490_v56, %v5792_v55  ;;  %v1171_v55 = vadd.f32 %v5490_v56, %v1121_v1 }
 0x1f3   : > { %v1373_v60 = vpop.f32.mrf.mxu2 }
 0x1f4   : > { %v5833_v10 = vadd.f32 %v1373_v60, %v1167_v3 }
 0x1f5   : > { %v1123_v53 = vpop.f32.mrf.mxu1  ;;  %v6730_v4 = vld [vmem:[#allocation47_spill] sm:$0xff] }
 0x1f6   : > { %3354 = vmatpush.bf16.msra.mxu0 %v4650_v63  ;;  %v4664_v63 = vld [vmem:[#allocation9 + $0x230] sm:$0xff] }
 0x1f7   : > { %3610 = vmatpush.bf16.msra.mxu1 %v4664_v63 }
 0x1f9   : > { %v5838_v33 = vpop.f32.mrf.mxu0 }
 0x1fa   : > { %6641 = vst [vmem:[#allocation49_spill] sm:$0xff] %v5838_v33 }
 0x1fb   : > { %v1375_v50 = vpop.f32.mrf.mxu2 }
 0x1fc   : > { %2090 = vmatmul.bf16.gmra.mxu0 %v5553_v2  ;;  %v5840_v38 = vadd.f32 %v1375_v50, %v1168_v31  ;;  %v1170_v31 = vadd.f32 %v5490_v56, %v1118_v9  ;;  %v1172_v50 = vadd.f32 %v5490_v56, %v1123_v53 }
 0x1fd   : > { %v1126_v25 = vpop.f32.mrf.mxu1 }
 0x200   : > { %1407 = vmatmul.bf16.gmra.mxu3 %v5842_v18  ;;  %2569 = vmatmul.bf16.gmra.mxu2 %v5454_v30 }
 0x201   : > { %2317 = vmatmul.bf16.gmra.mxu1 %v5454_v30  ;;  %v5851_v60 = vpop.f32.mrf.mxu0  ;;  %v4648_v30 = vld [vmem:[#allocation9 + $0xb0] sm:$0xff] }
 0x202   : > { %6642 = vst [vmem:[#allocation50_spill] sm:$0xff] %v5851_v60  ;;  %3086 = vmatpush.bf16.msra.mxu3 %v4648_v30 }
 0x203   : > { %v1378_v16 = vpop.f32.mrf.mxu2 }
 0x204   : > { %v5849_v5 = vadd.f32 %v1378_v16, %v1169_v22 }
 0x205   : > { %v1128_v3 = vpop.f32.mrf.mxu1 }
 0x206   : > { %v1174_v63 = vadd.f32 %v5490_v56, %v1128_v3 }
 0x209   : > { %v5859_v26 = vpop.f32.mrf.mxu0 }
 0x20a   : > { %6643 = vst [vmem:[#allocation51_spill] sm:$0xff] %v5859_v26 }
 0x20b   : > { %v1380_v59 = vpop.f32.mrf.mxu2 }
 0x20c   : > { %2095 = vmatmul.bf16.gmra.mxu0 %v5611_v42  ;;  %v5855_v35 = vadd.f32 %v1380_v59, %v1170_v31  ;;  %v1173_v31 = vadd.f32 %v5490_v56, %v1126_v25  ;;  %v4647_v25 = vld [vmem:[#allocation9 + $0xa8] sm:$0xff] }
 0x20d   : > { %3087 = vmatpush.bf16.msra.mxu3 %v4647_v25 }
 0x20e   : > { %v5857_v23 = vpop.f32.mrf.mxu1 }
 0x210   : > { %1594 = vmatmul.bf16.vlgmr.msrb.gmra.mxu3 %v5333_v45  ;;  %2574 = vmatmul.bf16.gmra.mxu2 %v5479_v32 }
 0x211   : > { %2322 = vmatmul.bf16.gmra.mxu1 %v5479_v32  ;;  %v5870_v22 = vpop.f32.mrf.mxu0 }
 0x212   : > { %6644 = vst [vmem:[#allocation52_spill] sm:$0xff] %v5870_v22 }
 0x213   : > { %v1131_v39 = vpop.f32.mrf.mxu3  ;;  %v1383_v9 = vpop.f32.mrf.mxu2 }
 0x214   : > { %v5865_v0 = vadd.f32 %v1383_v9, %v1171_v55 }
 0x216   : > { %v5867_v20 = vpop.f32.mrf.mxu1 }
 0x219   : > { %v5883_v55 = vpop.f32.mrf.mxu0 }
 0x21a   : > { %6645 = vst [vmem:[#allocation53_spill] sm:$0xff] %v5883_v55 }
 0x21b   : > { %v1133_v45 = vpop.f32.mrf.mxu3  ;;  %v1385_v16 = vpop.f32.mrf.mxu2 }
 0x21c   : > { %3355 = vmatmul.bf16.vlgmr.msra.gmra.mxu0 %v5284_v49  ;;  %v5873_v32 = vadd.f32 %v1385_v16, %v1172_v50 }
 0x21e   : > { %v5875_v1 = vpop.f32.mrf.mxu1 }
 0x220   : > { %1599 = vmatmul.bf16.gmra.mxu3 %v5358_v51  ;;  %2579 = vmatmul.bf16.gmra.mxu2 %v5519_v57 }
 0x221   : > { %2327 = vmatmul.bf16.gmra.mxu1 %v5519_v57  ;;  %v5893_v57 = vpop.f32.mrf.mxu0 }
 0x222   : > { %6648 = vst [vmem:[#allocation56_spill] sm:$0xff] %v5893_v57 }
 0x223   : > { %v1136_v53 = vpop.f32.mrf.mxu3  ;;  %v1388_v59 = vpop.f32.mrf.mxu2 }
 0x224   : > { %v5881_v30 = vadd.f32 %v1388_v59, %v1173_v31  ;;  %v4663_v59 = vld [vmem:[#allocation9 + $0x228] sm:$0xff] }
 0x225   : > { %3611 = vmatpush.bf16.msra.mxu1 %v4663_v59 }
 0x226   : > { %v5885_v9 = vpop.f32.mrf.mxu1 }
 0x227   : > { %6646 = vst [vmem:[#allocation54_spill] sm:$0xff] %v5885_v9 }
 0x229   : > { %v5902_v55 = vpop.f32.mrf.mxu0 }
 0x22a   : > { %6650 = vst [vmem:[#allocation58_spill] sm:$0xff] %v5902_v55 }
 0x22b   : > { %v1138_v50 = vpop.f32.mrf.mxu3  ;;  %v1390_v16 = vpop.f32.mrf.mxu2 }
 0x22c   : > { %3360 = vmatmul.bf16.gmra.mxu0 %v5310_v29  ;;  %v5889_v51 = vadd.f32 %v1390_v16, %v1174_v63 }
 0x22e   : > { %v5891_v22 = vpop.f32.mrf.mxu1 }
 0x22f   : > { %6647 = vst [vmem:[#allocation55_spill] sm:$0xff] %v5891_v22 }
 0x230   : > { %1604 = vmatmul.bf16.gmra.mxu3 %v5383_v21  ;;  %2584 = vmatmul.bf16.gmra.mxu2 %v5578_v17 }
 0x231   : > { %2332 = vmatmul.bf16.gmra.mxu1 %v5578_v17  ;;  %v5912_v21 = vpop.f32.mrf.mxu0 }
 0x232   : > { %6652 = vst [vmem:[#allocation60_spill] sm:$0xff] %v5912_v21 }
 0x233   : > { %v5898_v31 = vpop.f32.mrf.mxu3 }
 0x236   : > { %v5900_v3 = vpop.f32.mrf.mxu1 }
 0x237   : > { %6649 = vst [vmem:[#allocation57_spill] sm:$0xff] %v5900_v3 }
 0x239   : > { %v5921_v59 = vpop.f32.mrf.mxu0 }
 0x23a   : > { %6654 = vst [vmem:[#allocation62_spill] sm:$0xff] %v5921_v59  ;;  %v4662_v59 = vld [vmem:[#allocation9 + $0x220] sm:$0xff] }
 0x23b   : > { %v5904_v63 = vpop.f32.mrf.mxu3  ;;  %3612 = vmatpush.bf16.msra.mxu1 %v4662_v59 }
 0x23c   : > { %3365 = vmatmul.bf16.gmra.mxu0 %v5335_v8 }
 0x23e   : > { %v5907_v16 = vpop.f32.mrf.mxu1 }
 0x23f   : > { %6651 = vst [vmem:[#allocation59_spill] sm:$0xff] %v5907_v16 }
 0x240   : > { %1609 = vmatmul.bf16.gmra.mxu3 %v5408_v6  ;;  %2589 = vmatmul.bf16.gmra.mxu2 %v5635_v19  ;;  %v1175_v6 = vadd.f32 %v5490_v56, %v1131_v39 }
 0x241   : > { %2337 = vmatmul.bf16.gmra.mxu1 %v5635_v19  ;;  %v4646_v19 = vld [vmem:[#allocation9 + $0xa0] sm:$0xff]  ;;  %v5933_v33 = vpop.f32.mrf.mxu0 }
 0x242   : > { %3088 = vmatpush.bf16.msra.mxu3 %v4646_v19  ;;  %6657 = vst [vmem:[#allocation65_spill] sm:$0xff] %v5933_v33  ;;  %v4661_v19 = vld [vmem:[#allocation9 + $0x218] sm:$0xff] }
 0x243   : > { %v5914_v17 = vpop.f32.mrf.mxu3  ;;  %3613 = vmatpush.bf16.msra.mxu1 %v4661_v19 }
 0x246   : > { %v5916_v25 = vpop.f32.mrf.mxu1 }
 0x247   : > { %6653 = vst [vmem:[#allocation61_spill] sm:$0xff] %v5916_v25  ;;  %v5936_v25 = vpop.f32.mrf.mxu2 }
 0x24b   : > { %v5918_v55 = vpop.f32.mrf.mxu3 }
 0x24c   : > { %3370 = vmatmul.bf16.gmra.mxu0 %v5360_v46 }
 0x24e   : > { %v5923_v57 = vpop.f32.mrf.mxu1 }
 0x24f   : > { %6655 = vst [vmem:[#allocation63_spill] sm:$0xff] %v5923_v57  ;;  %v1176_v57 = vadd.f32 %v5490_v56, %v1133_v45  ;;  %v1177_v45 = vadd.f32 %v5490_v56, %v1136_v53  ;;  %v5949_v59 = vpop.f32.mrf.mxu2  ;;  %v4658_v53 = vld [vmem:[#allocation9 + $0x200] sm:$0xff] }
 0x250   : > { %1614 = vmatmul.bf16.gmra.mxu3 %v5433_v58  ;;  %2594 = vmatmul.bf16.gmra.mxu2 %v5553_v2 }
 0x251   : > { %2342 = vmatmul.bf16.gmra.mxu1 %v5553_v2 }
 0x253   : > { %v1393_v21 = vpop.f32.mrf.mxu3 }
 0x254   : > { %v5929_v26 = vadd.f32 %v1393_v21, %v1175_v6  ;;  %v5945_v21 = vpop.f32.mrf.mxu0 }
 0x255   : > { %6659 = vst [vmem:[#allocation67_spill] sm:$0xff] %v5945_v21 }
 0x256   : > { %v5931_v60 = vpop.f32.mrf.mxu1 }
 0x257   : > { %6656 = vst [vmem:[#allocation64_spill] sm:$0xff] %v5931_v60  ;;  %v5961_v19 = vpop.f32.mrf.mxu2 }
 0x25b   : > { %v1395_v58 = vpop.f32.mrf.mxu3 }
 0x25c   : > { %3375 = vmatmul.bf16.gmra.mxu0 %v5385_v24  ;;  %v5939_v2 = vadd.f32 %v1395_v58, %v1176_v57  ;;  %v4660_v57 = vld [vmem:[#allocation9 + $0x210] sm:$0xff]  ;;  %v4659_v58 = vld [vmem:[#allocation9 + $0x208] sm:$0xff]  ;;  %v5956_v60 = vpop.f32.mrf.mxu0 }
 0x25d   : > { %3614 = vmatpush.bf16.msra.mxu1 %v4660_v57  ;;  %6661 = vst [vmem:[#allocation69_spill] sm:$0xff] %v5956_v60 }
 0x25e   : > { %v5941_v39 = vpop.f32.mrf.mxu1 }
 0x25f   : > { %6658 = vst [vmem:[#allocation66_spill] sm:$0xff] %v5941_v39 }
 0x260   : > { %1619 = vmatmul.bf16.gmra.mxu3 %v5460_v47  ;;  %2599 = vmatmul.bf16.gmra.mxu2 %v5611_v42  ;;  %v1178_v47 = vadd.f32 %v5490_v56, %v1138_v50  ;;  %v1179_v50 = vadd.f32 %v5490_v56, %v5898_v31 }
 0x261   : > { %2347 = vmatmul.bf16.gmra.mxu1 %v5611_v42 }
 0x262   : > { %3615 = vmatpush.bf16.msra.mxu1 %v4659_v58 }
 0x263   : > { %v1398_v6 = vpop.f32.mrf.mxu3 }
 0x264   : > { %v5951_v33 = vadd.f32 %v1398_v6, %v1177_v45  ;;  %v4645_v45 = vld [vmem:[#allocation9 + $0x98] sm:$0xff]  ;;  %v5972_v58 = vpop.f32.mrf.mxu0 }
 0x265   : > { %3089 = vmatpush.bf16.msra.mxu3 %v4645_v45  ;;  %6663 = vst [vmem:[#allocation71_spill] sm:$0xff] %v5972_v58  ;;  %v4788_v45 = vld [vmem:[%s6583_s4] ss:$0 sm:$0xff] }
 0x266   : > { %v5953_v39 = vpop.f32.mrf.mxu1  ;;  %3616 = vmatpush.bf16.msra.mxu1 %v4658_v53 }
 0x267   : > { %6660 = vst [vmem:[#allocation68_spill] sm:$0xff] %v5953_v39  ;;  %v6676_v39 = vld [vmem:[#allocation19_spill] sm:$0xff] }
 0x268   : > { %v1152_v16 = vadd.f32 %v4788_v45, %v6676_v39 }
 0x26b   : > { %v1400_v21 = vpop.f32.mrf.mxu3 }
 0x26c   : > { %3380 = vmatmul.bf16.gmra.mxu0 %v5410_v11  ;;  %v5959_v42 = vadd.f32 %v1400_v21, %v1178_v47  ;;  %v5974_v47 = vpop.f32.mrf.mxu2  ;;  %v5983_v31 = vpop.f32.mrf.mxu0 }
 0x26d   : > { %6664 = vst [vmem:[#allocation72_spill] sm:$0xff] %v5974_v47 }
 0x26e   : > { %v5968_v6 = vpop.f32.mrf.mxu1  ;;  %6666 = vst [vmem:[#allocation74_spill] sm:$0xff] %v5983_v31  ;;  %v1182_v31 = vadd.f32 %v4788_v45, %v5918_v55 }
 0x26f   : > { %6662 = vst [vmem:[#allocation70_spill] sm:$0xff] %v5968_v6  ;;  %v4644_v6 = vld [vmem:[#allocation9 + $0x90] sm:$0xff] }
 0x270   : > { %1624 = vmatmul.bf16.gmra.mxu3 %v5492_v43  ;;  %2604 = vmatmul.bf16.gmra.mxu2 %v5733_v27  ;;  %v1180_v43 = vadd.f32 %v5490_v56, %v5904_v63  ;;  %v1181_v56 = vadd.f32 %v4788_v45, %v5914_v17  ;;  %v6671_v17 = vld [vmem:[#allocation27_spill] sm:$0xff] }
 0x271   : > { %2352 = vmatmul.bf16.gmra.mxu1 %v5733_v27  ;;  %3090 = vmatpush.bf16.msra.mxu3 %v4644_v6 }
 0x273   : > { %v1403_v57 = vpop.f32.mrf.mxu3 }
 0x274   : > { %v5970_v21 = vadd.f32 %v1403_v57, %v1179_v50  ;;  %v5992_v63 = vpop.f32.mrf.mxu2 }
 0x275   : > { %6667 = vst [vmem:[#allocation75_spill] sm:$0xff] %v5992_v63  ;;  %v6680_v63 = vld [vmem:[#allocation21_spill] sm:$0xff] }
 0x276   : > { %v5981_v60 = vpop.f32.mrf.mxu1 }
 0x277   : > { %6665 = vst [vmem:[#allocation73_spill] sm:$0xff] %v5981_v60 }
 0x27b   : > { %v1405_v53 = vpop.f32.mrf.mxu3 }
 0x27c   : > { %3385 = vmatmul.bf16.gmra.mxu0 %v5437_v62  ;;  %v5979_v27 = vadd.f32 %v1405_v53, %v1180_v43  ;;  %v4673_v43 = vld [vmem:[#allocation10 + $0x38] sm:$0xff]  ;;  %v6002_v58 = vpop.f32.mrf.mxu2 }
 0x27d   : > { %3910 = vmatpush.bf16.msra.mxu2 %v4673_v43  ;;  %6670 = vst [vmem:[#allocation78_spill] sm:$0xff] %v6002_v58 }
 0x27e   : > { %v5996_v53 = vpop.f32.mrf.mxu1 }
 0x27f   : > { %6668 = vst [vmem:[#allocation76_spill] sm:$0xff] %v5996_v53 }
 0x280   : > { %1629 = vmatmul.bf16.gmra.mxu3 %v5533_v36  ;;  %2609 = vmatmul.bf16.gmra.mxu2 %v5775_v7  ;;  %v5998_v36 = vpop.f32.mrf.mxu0 }
 0x281   : > { %2357 = vmatmul.bf16.gmra.mxu1 %v5775_v7  ;;  %6669 = vst [vmem:[#allocation77_spill] sm:$0xff] %v5998_v36  ;;  %v6675_v36 = vld [vmem:[#allocation22_spill] sm:$0xff] }
 0x283   : > { %v1408_v50 = vpop.f32.mrf.mxu3 }
 0x284   : > { %v5994_v57 = vadd.f32 %v1408_v50, %v1181_v56  ;;  %v6672_v56 = vld [vmem:[#allocation18_spill] sm:$0xff] }
 0x286   : > { %v6008_v50 = vpop.f32.mrf.mxu1 }
 0x287   : > { %6673 = vst [vmem:[#allocation27_spill] sm:$0xff] %v6008_v50 }
 0x288   : > { %v6011_v43 = vpop.f32.mrf.mxu0 }
 0x289   : > { %6674 = vst [vmem:[#allocation18_spill] sm:$0xff] %v6011_v43 }
 0x28b   : > { %v1410_v7 = vpop.f32.mrf.mxu3 }
 0x28c   : > { %3390 = vmatmul.bf16.gmra.mxu0 %v5462_v54  ;;  %v6004_v60 = vadd.f32 %v1410_v7, %v1182_v31  ;;  %v6017_v31 = vpop.f32.mrf.mxu2  ;;  %v6678_v7 = vld [vmem:[#allocation23_spill] sm:$0xff] }
 0x28d   : > { %6677 = vst [vmem:[#allocation22_spill] sm:$0xff] %v6017_v31  ;;  %v6686_v31 = vld [vmem:[#allocation26_spill] sm:$0xff] }
 0x28e   : > { %v6020_v58 = vpop.f32.mrf.mxu1 }
 0x28f   : > { %6679 = vst [vmem:[#allocation19_spill] sm:$0xff] %v6020_v58 }
 0x290   : > { %1634 = vmatmul.bf16.gmra.mxu3 %v6671_v17  ;;  %2614 = vmatmul.bf16.gmra.mxu2 %v6672_v56  ;;  %v1414_v17 = vadd.f32 %v6678_v7, %v1152_v16  ;;  %v6025_v6 = vpop.f32.mrf.mxu0  ;;  %v6684_v7 = vld [vmem:[#allocation20_spill] sm:$0xff] }
 0x291   : > { %3617 = vmatmul.bf16.vlgmr.msra.gmra.mxu1 %v5335_v8  ;;  %v1154_v58 = vadd.f32 %v4788_v45, %v6684_v7  ;;  %v6690_v7 = vld [vmem:[#allocation29_spill] sm:$0xff] }
 0x293   : > { %v1595_v55 = vpop.f32.mrf.mxu3 }
 0x294   : > { %v6014_v53 = vadd.f32 %v1595_v55, %v6675_v36  ;;  %v6027_v43 = vpop.f32.mrf.mxu2  ;;  %v6682_v36 = vld [vmem:[#allocation25_spill] sm:$0xff] }
 0x295   : > { %6681 = vst [vmem:[#allocation23_spill] sm:$0xff] %v6027_v43  ;;  %v1416_v43 = vadd.f32 %v6686_v31, %v1154_v58 }
 0x296   : > { %v6035_v55 = vpop.f32.mrf.mxu1 }
 0x297   : > { %6683 = vst [vmem:[#allocation21_spill] sm:$0xff] %v6035_v55 }
 0x29b   : > { %v1597_v3 = vpop.f32.mrf.mxu3 }
 0x29c   : > { %3395 = vmatmul.bf16.gmra.mxu0 %v6680_v63  ;;  %v6023_v50 = vadd.f32 %v1597_v3, %v1414_v17  ;;  %v4672_v3 = vld [vmem:[#allocation10 + $0x30] sm:$0xff]  ;;  %v6038_v17 = vpop.f32.mrf.mxu0  ;;  %v6044_v47 = vpop.f32.mrf.mxu2 }
 0x29d   : > { %6685 = vst [vmem:[#allocation25_spill] sm:$0xff] %v6038_v17  ;;  %3911 = vmatpush.bf16.msra.mxu2 %v4672_v3  ;;  %v6694_v17 = vld [vmem:[#allocation28_spill] sm:$0xff] }
 0x29e   : > { %6688 = vst [vmem:[#allocation20_spill] sm:$0xff] %v6044_v47  ;;  %v6046_v9 = vpop.f32.mrf.mxu1 }
 0x29f   : > { %6689 = vst [vmem:[#allocation26_spill] sm:$0xff] %v6046_v9 }
 0x2a0   : > { %1639 = vmatmul.bf16.gmra.mxu3 %v5646_v52  ;;  %2619 = vmatmul.bf16.gmra.mxu2 %v6672_v56  ;;  %v6687_v52 = vld [vmem:[#allocation24_spill] sm:$0xff] }
 0x2a1   : > { %3622 = vmatmul.bf16.gmra.mxu1 %v5360_v46 }
 0x2a3   : > { %v1600_v39 = vpop.f32.mrf.mxu3 }
 0x2a4   : > { %v6033_v16 = vadd.f32 %v1600_v39, %v6682_v36  ;;  %v4643_v39 = vld [vmem:[#allocation9 + $0x88] sm:$0xff]  ;;  %v6049_v36 = vpop.f32.mrf.mxu0  ;;  %v6055_v31 = vpop.f32.mrf.mxu2 }
 0x2a5   : > { %3091 = vmatpush.bf16.msra.mxu3 %v4643_v39  ;;  %6691 = vst [vmem:[#allocation29_spill] sm:$0xff] %v6055_v31 }
 0x2ab   : > { %v1602_v22 = vpop.f32.mrf.mxu3 }
 0x2ac   : > { %3400 = vmatmul.bf16.gmra.mxu0 %v6687_v52  ;;  %v6042_v56 = vadd.f32 %v1602_v22, %v1416_v43  ;;  %v6057_v22 = vpop.f32.mrf.mxu1  ;;  %v6059_v43 = vpop.f32.mrf.mxu0 }
 0x2ad   : > { %6692 = vst [vmem:[#allocation79_spill] sm:$0xff] %v6057_v22  ;;  %v6066_v9 = vpop.f32.mrf.mxu2 }
 0x2ae   : > { %6693 = vst [vmem:[#allocation80_spill] sm:$0xff] %v6059_v43  ;;  %v4671_v43 = vld [vmem:[#allocation10 + $0x28] sm:$0xff] }
 0x2af   : > { %6696 = vst [vmem:[#allocation81_spill] sm:$0xff] %v6066_v9  ;;  %3912 = vmatpush.bf16.msra.mxu2 %v4671_v43 }
 0x2b0   : > { %1644 = vmatmul.bf16.gmra.mxu3 %v5678_v37 }
 0x2b1   : > { %3627 = vmatmul.bf16.gmra.mxu1 %v5385_v24 }
 0x2b3   : > { %v1605_v45 = vpop.f32.mrf.mxu3 }
 0x2b4   : > { %v6053_v58 = vadd.f32 %v1605_v45, %v6690_v7  ;;  %v6069_v39 = vpop.f32.mrf.mxu1  ;;  %v6074_v22 = vpop.f32.mrf.mxu0 }
 0x2b5   : > { %6697 = vst [vmem:[#allocation82_spill] sm:$0xff] %v6069_v39  ;;  %v6076_v55 = vpop.f32.mrf.mxu2 }
 0x2b6   : > { %6699 = vst [vmem:[#allocation84_spill] sm:$0xff] %v6076_v55 }
 0x2bb   : > { %v1607_v3 = vpop.f32.mrf.mxu3 }
 0x2bc   : > { %3405 = vmatmul.bf16.gmra.mxu0 %v6694_v17  ;;  %v6063_v37 = vadd.f32 %v1607_v3, %v5637_v34  ;;  %v6082_v3 = vpop.f32.mrf.mxu1  ;;  %v6084_v9 = vpop.f32.mrf.mxu0 }
 0x2bd   : > { %6701 = vst [vmem:[#allocation86_spill] sm:$0xff] %v6082_v3  ;;  %v6091_v39 = vpop.f32.mrf.mxu2  ;;  %v6705_v3 = vld [vmem:[#allocation30_spill] sm:$0xff] }
 0x2be   : > { %6695 = vst [vmem:[#allocation28_spill] sm:$0xff] %v6063_v37 }
 0x2bf   : > { %6703 = vst [vmem:[#allocation88_spill] sm:$0xff] %v6091_v39  ;;  %v4670_v39 = vld [vmem:[#allocation10 + $0x20] sm:$0xff] }
 0x2c0   : > { %1649 = vmatmul.bf16.gmra.mxu3 %v5710_v61  ;;  %3913 = vmatpush.bf16.msra.mxu2 %v4670_v39  ;;  %v6718_v39 = vld [vmem:[#allocation42_spill] sm:$0xff] }
 0x2c1   : > { %3632 = vmatmul.bf16.gmra.mxu1 %v5410_v11 }
 0x2c3   : > { %v1610_v45 = vpop.f32.mrf.mxu3 }
 0x2c4   : > { %v6072_v7 = vadd.f32 %v1610_v45, %v5659_v12  ;;  %v4642_v12 = vld [vmem:[#allocation9 + $0x80] sm:$0xff]  ;;  %v6093_v55 = vpop.f32.mrf.mxu1 }
 0x2c5   : > { %3092 = vmatpush.bf16.msra.mxu3 %v4642_v12  ;;  %6704 = vst [vmem:[#allocation89_spill] sm:$0xff] %v6093_v55 }
 0x2c6   : > { %6698 = vst [vmem:[#allocation83_spill] sm:$0xff] %v6072_v7  ;;  %v6722_v7 = vld [vmem:[#allocation40_spill] sm:$0xff] }
 0x2cb   : > { %v1612_v34 = vpop.f32.mrf.mxu3 }
 0x2cc   : > { %3410 = vmatmul.bf16.gmra.mxu0 %v5648_v41  ;;  %v6080_v61 = vadd.f32 %v1612_v34, %v5671_v14  ;;  %v6095_v14 = vpop.f32.mrf.mxu0  ;;  %v6104_v12 = vpop.f32.mrf.mxu1 }
 0x2cd   : > { %6708 = vst [vmem:[#allocation91_spill] sm:$0xff] %v6104_v12 }
 0x2ce   : > { %6700 = vst [vmem:[#allocation85_spill] sm:$0xff] %v6080_v61 }
 0x2d0   : > { %1654 = vmatmul.bf16.gmra.mxu3 %v5818_v40  ;;  %v6101_v40 = vpop.f32.mrf.mxu2 }
 0x2d1   : > { %3637 = vmatmul.bf16.gmra.mxu1 %v5437_v62  ;;  %6707 = vst [vmem:[#allocation90_spill] sm:$0xff] %v6101_v40  ;;  %v6712_v40 = vld [vmem:[#allocation32_spill] sm:$0xff] }
 0x2d3   : > { %v1615_v45 = vpop.f32.mrf.mxu3 }
 0x2d4   : > { %v6089_v43 = vadd.f32 %v1615_v45, %v5689_v44  ;;  %v6107_v44 = vpop.f32.mrf.mxu0 }
 0x2d6   : > { %6702 = vst [vmem:[#allocation87_spill] sm:$0xff] %v6089_v43  ;;  %v6716_v43 = vld [vmem:[#allocation17_spill] sm:$0xff] }
 0x2d8   : > { %v6112_v47 = vpop.f32.mrf.mxu2 }
 0x2d9   : > { %6710 = vst [vmem:[#allocation93_spill] sm:$0xff] %v6112_v47 }
 0x2db   : > { %v1617_v34 = vpop.f32.mrf.mxu3 }
 0x2dc   : > { %3415 = vmatmul.bf16.gmra.mxu0 %v6705_v3  ;;  %v6099_v31 = vadd.f32 %v1617_v34, %v5704_v48  ;;  %v6114_v48 = vpop.f32.mrf.mxu1  ;;  %v6120_v12 = vpop.f32.mrf.mxu0 }
 0x2dd   : > { %6711 = vst [vmem:[#allocation94_spill] sm:$0xff] %v6114_v48 }
 0x2de   : > { %6706 = vst [vmem:[#allocation30_spill] sm:$0xff] %v6099_v31 }
 0x2e0   : > { %1659 = vmatmul.bf16.gmra.mxu3 %v5842_v18  ;;  %v6713_v18 = vld [vmem:[#allocation39_spill] sm:$0xff] }
 0x2e1   : > { %3642 = vmatmul.bf16.gmra.mxu1 %v5462_v54  ;;  %6715 = vst [vmem:[#allocation39_spill] sm:$0xff] %v6120_v12 }
 0x2e3   : > { %v1620_v45 = vpop.f32.mrf.mxu3 }
 0x2e4   : > { %v6110_v55 = vadd.f32 %v1620_v45, %v5727_v28  ;;  %v6124_v28 = vpop.f32.mrf.mxu2  ;;  %v6129_v47 = vpop.f32.mrf.mxu1 }
 0x2e5   : > { %6717 = vst [vmem:[#allocation17_spill] sm:$0xff] %v6124_v28  ;;  %v6131_v48 = vpop.f32.mrf.mxu0 }
 0x2e6   : > { %6709 = vst [vmem:[#allocation92_spill] sm:$0xff] %v6110_v55 }
 0x2e7   : > { %6720 = vst [vmem:[#allocation95_spill] sm:$0xff] %v6129_v47 }
 0x2e8   : > { %6721 = vst [vmem:[#allocation96_spill] sm:$0xff] %v6131_v48 }
 0x2eb   : > { %v1622_v34 = vpop.f32.mrf.mxu3 }
 0x2ec   : > { %3420 = vmatmul.bf16.gmra.mxu0 %v6712_v40  ;;  %v6118_v31 = vadd.f32 %v1622_v34, %v6713_v18  ;;  %v6724_v18 = vmov 0.0   ;;  %v6138_v12 = vpop.f32.mrf.mxu2  ;;  %v6140_v37 = vpop.f32.mrf.mxu1 }
 0x2ed   : > { %6725 = vst [vmem:[#allocation97_spill] sm:$0xff] %v6138_v12 }
 0x2ee   : > { %6714 = vst [vmem:[#allocation32_spill] sm:$0xff] %v6118_v31  ;;  %v2729_v31 = vrot.slane %v6724_v18, 2  ;;  %v4669_v18 = vld [vmem:[#allocation10 + $0x18] sm:$0xff] }
 0x2ef   : > { %6726 = vst [vmem:[#allocation98_spill] sm:$0xff] %v6140_v37  ;;  %3914 = vmatpush.bf16.msra.mxu2 %v4669_v18 }
 0x2f0   : > { %1664 = vmatmul.bf16.gmra.mxu3 %v6716_v43 }
 0x2f1   : > { %3647 = vmatmul.bf16.gmra.mxu1 %v6680_v63 }
 0x2f3   : > { %v1625_v45 = vpop.f32.mrf.mxu3 }
 0x2f4   : > { %v6127_v55 = vadd.f32 %v1625_v45, %v6718_v39  ;;  %v6143_v45 = vpop.f32.mrf.mxu0  ;;  %v2813_v39 = vsel %vm2811_vm3, %v2729_v31, 0.0 }
 0x2f5   : > { %6727 = vst [vmem:[#allocation99_spill] sm:$0xff] %v6143_v45 }
 0x2f6   : > { %6719 = vst [vmem:[#allocation42_spill] sm:$0xff] %v6127_v55 }
 0x2fb   : > { %v1627_v61 = vpop.f32.mrf.mxu3 }
 0x2fc   : > { %3425 = vmatmul.bf16.gmra.mxu0 %v6722_v7  ;;  %v6135_v34 = vadd.f32 %v1627_v61, %v5787_v13  ;;  %v2852_v13 = vpack.c.bf16 %v2729_v31, %v2729_v31  ;;  %v2853_v61 = vpack.c.bf16 %v2813_v39, %v2813_v39  ;;  %v6155_v55 = vpop.f32.mrf.mxu0 }
 0x2fe   : > { %6723 = vst [vmem:[#allocation40_spill] sm:$0xff] %v6135_v34  ;;  %v6151_v34 = vpop.f32.mrf.mxu2  ;;  %v2973_v12 = vunpack.c.l.b16 %v2852_v13  ;;  %v2974_v37 = vunpack.c.l.b16 %v2853_v61 }
 0x300   : > { %1669 = vmatmul.bf16.gmra.mxu3 %v6716_v43  ;;  %v6153_v43 = vpop.f32.mrf.mxu1 }
 0x301   : > { %3652 = vmatmul.bf16.gmra.mxu1 %v6687_v52  ;;  %6728 = vst [vmem:[#allocation100_spill] sm:$0xff] %v6153_v43  ;;  %v6729_v52 = vld [vmem:[#allocation44_spill] sm:$0xff] }
 0x303   : > { %v1630_v47 = vpop.f32.mrf.mxu3 }
 0x304   : > { %v6149_v28 = vadd.f32 %v1630_v47, %v5803_v15  ;;  %v6161_v15 = vpack.c.b16 %v2974_v37, %v2973_v12 }
 0x306   : > { %v6164_v47 = vpop.f32.mrf.mxu2 }
 0x307   : > { %6731 = vst [vmem:[#allocation44_spill] sm:$0xff] %v6164_v47 }
 0x308   : > { %v6167_v31 = vpop.f32.mrf.mxu1 }
 0x30b   : > { %v1632_v45 = vpop.f32.mrf.mxu3 }
 0x30c   : > { %3430 = vmatmul.bf16.gmra.mxu0 %v6729_v52  ;;  %v6159_v48 = vadd.f32 %v1632_v45, %v6730_v4 }
 0x30e   : > { %v6172_v61 = vpop.f32.mrf.mxu2 }
 0x30f   : > { %6732 = vst [vmem:[#allocation47_spill] sm:$0xff] %v6172_v61 }
 0x310   : > { %3093 = vmatmul.bf16.vlgmr.msra.gmra.mxu3 %v6161_v15  ;;  %v6177_v37 = vpop.f32.mrf.mxu1 }
 0x311   : > { %3657 = vmatmul.bf16.gmra.mxu1 %v6694_v17  ;;  %6733 = vst [vmem:[#allocation101_spill] sm:$0xff] %v6177_v37 }
 0x313   : > { %v1635_v39 = vpop.f32.mrf.mxu3 }
 0x314   : > { %v6170_v13 = vadd.f32 %v1635_v39, %v5833_v10  ;;  %v4668_v10 = vld [vmem:[#allocation10 + $0x10] sm:$0xff] }
 0x315   : > { %3915 = vmatpush.bf16.msra.mxu2 %v4668_v10 }
 0x316   : > { %v6184_v43 = vpop.f32.mrf.mxu2 }
 0x317   : > { %6734 = vst [vmem:[#allocation102_spill] sm:$0xff] %v6184_v43 }
 0x318   : > { %v6186_v39 = vpop.f32.mrf.mxu1 }
 0x31b   : > { %v1637_v18 = vpop.f32.mrf.mxu3 }
 0x31c   : > { %v6175_v45 = vadd.f32 %v1637_v18, %v5840_v38 }
 0x31e   : > { %v6191_v18 = vpop.f32.mrf.mxu2 }
 0x31f   : > { %6735 = vst [vmem:[#allocation103_spill] sm:$0xff] %v6191_v18 }
 0x320   : > { %3098 = vmatmul.bf16.gmra.mxu3 %v6161_v15  ;;  %v6194_v37 = vpop.f32.mrf.mxu1 }
 0x321   : > { %3662 = vmatmul.bf16.gmra.mxu1 %v5648_v41  ;;  %6736 = vst [vmem:[#allocation104_spill] sm:$0xff] %v6194_v37 }
 0x323   : > { %v1640_v12 = vpop.f32.mrf.mxu3 }
 0x324   : > { %v6182_v4 = vadd.f32 %v1640_v12, %v5849_v5 }
 0x326   : > { %v6200_v43 = vpop.f32.mrf.mxu2 }
 0x327   : > { %6737 = vst [vmem:[#allocation105_spill] sm:$0xff] %v6200_v43 }
 0x328   : > { %v6202_v47 = vpop.f32.mrf.mxu1 }
 0x32b   : > { %v1642_v61 = vpop.f32.mrf.mxu3 }
 0x32c   : > { %v6189_v38 = vadd.f32 %v1642_v61, %v5855_v35 }
 0x330   : > { %3103 = vmatmul.bf16.gmra.mxu3 %v5284_v49  ;;  %v6209_v49 = vpop.f32.mrf.mxu2 }
 0x331   : > { %3667 = vmatmul.bf16.gmra.mxu1 %v6705_v3  ;;  %6738 = vst [vmem:[#allocation106_spill] sm:$0xff] %v6209_v49 }
 0x333   : > { %v1645_v5 = vpop.f32.mrf.mxu3 }
 0x334   : > { %v6198_v12 = vadd.f32 %v1645_v5, %v5865_v0  ;;  %v6214_v0 = vpop.f32.mrf.mxu1  ;;  %v4667_v5 = vld [vmem:[#allocation10 + $0x8] sm:$0xff] }
 0x335   : > { %3916 = vmatpush.bf16.msra.mxu2 %v4667_v5 }
 0x33b   : > { %v1647_v10 = vpop.f32.mrf.mxu3 }
 0x33c   : > { %v6205_v35 = vadd.f32 %v1647_v10, %v5873_v32  ;;  %v6219_v32 = vpop.f32.mrf.mxu2  ;;  %v6221_v10 = vpop.f32.mrf.mxu1 }
 0x33d   : > { %6739 = vst [vmem:[#allocation107_spill] sm:$0xff] %v6219_v32 }
 0x340   : > { %3108 = vmatmul.bf16.gmra.mxu3 %v5310_v29 }
 0x341   : > { %3672 = vmatmul.bf16.gmra.mxu1 %v6712_v40 }
 0x343   : > { %v1650_v61 = vpop.f32.mrf.mxu3 }
 0x344   : > { %v6212_v37 = vadd.f32 %v1650_v61, %v5881_v30  ;;  %v6228_v61 = vpop.f32.mrf.mxu2  ;;  %v6230_v49 = vpop.f32.mrf.mxu1 }
 0x345   : > { %6740 = vst [vmem:[#allocation108_spill] sm:$0xff] %v6228_v61 }
 0x34b   : > { %v1652_v43 = vpop.f32.mrf.mxu3 }
 0x34c   : > { %v6217_v18 = vadd.f32 %v1652_v43, %v5889_v51  ;;  %v6236_v43 = vpop.f32.mrf.mxu2 }
 0x34d   : > { %6741 = vst [vmem:[#allocation109_spill] sm:$0xff] %v6236_v43 }
 0x350   : > { %3113 = vmatmul.bf16.gmra.mxu3 %v5335_v8  ;;  %v6239_v8 = vpop.f32.mrf.mxu1 }
 0x351   : > { %3677 = vmatmul.bf16.gmra.mxu1 %v6722_v7 }
 0x353   : > { %v1655_v29 = vpop.f32.mrf.mxu3 }
 0x354   : > { %v6226_v30 = vadd.f32 %v1655_v29, %v5929_v26  ;;  %v4666_v29 = vld [vmem:[#allocation10] sm:$0xff]  ;;  %v6244_v61 = vpop.f32.mrf.mxu2 }
 0x355   : > { %3917 = vmatpush.bf16.msra.mxu2 %v4666_v29  ;;  %6742 = vst [vmem:[#allocation110_spill] sm:$0xff] %v6244_v61 }
 0x35b   : > { %v1657_v5 = vpop.f32.mrf.mxu3 }
 0x35c   : > { %v6233_v51 = vadd.f32 %v1657_v5, %v5939_v2  ;;  %v6249_v5 = vpop.f32.mrf.mxu1 }
 0x360   : > { %3118 = vmatmul.bf16.gmra.mxu3 %v5360_v46 }
 0x361   : > { %3682 = vmatmul.bf16.gmra.mxu1 %v6729_v52  ;;  %v2615_v52 = vpop.f32.mrf.mxu2 }
 0x363   : > { %v1660_v7 = vpop.f32.mrf.mxu3 }
 0x364   : > { %v6242_v26 = vadd.f32 %v1660_v7, %v5951_v33  ;;  %v6255_v7 = vpop.f32.mrf.mxu1 }
 0x36b   : > { %v1662_v32 = vpop.f32.mrf.mxu3 }
 0x36c   : > { %v6247_v2 = vadd.f32 %v1662_v32, %v5959_v42 }
 0x36e   : > { %6743 = vst [vmem:[#allocation111_spill] sm:$0xff] %v6247_v2  ;;  %v6263_v2 = vpop.f32.mrf.mxu2 }
 0x370   : > { %3123 = vmatmul.bf16.gmra.mxu3 %v5385_v24  ;;  %v6266_v24 = vpop.f32.mrf.mxu1 }
 0x371   : > { %3687 = vmatmul.bf16.gmra.mxu1 %v6161_v15 }
 0x373   : > { %v1665_v46 = vpop.f32.mrf.mxu3 }
 0x374   : > { %v1703_v43 = vadd.f32 %v1665_v46, %v5970_v21 }
 0x376   : > { %v2129_v33 = vadd.f32 %v6025_v6, %v1703_v43 }
 0x378   : > { %v2391_v29 = vadd.f32 %v6167_v31, %v2129_v33  ;;  %v2620_v31 = vpop.f32.mrf.mxu2  ;;  %v6744_v33 = vld [vmem:[#allocation31_spill] sm:$0xff] }
 0x37a   : > { %v6258_v61 = vadd.f32 %v2615_v52, %v2391_v29  ;;  %v2101_v29 = vadd.f32 %v6744_v33, %v6014_v53 }
 0x37b   : > { %v1667_v42 = vpop.f32.mrf.mxu3 }
 0x37c   : > { %v6261_v32 = vadd.f32 %v1667_v42, %v5979_v27 }
 0x380   : > { %3128 = vmatmul.bf16.gmra.mxu3 %v5410_v11 }
 0x381   : > { %3692 = vmatmul.bf16.gmra.mxu1 %v6161_v15  ;;  %v2363_v15 = vadd.f32 %v5857_v23, %v2101_v29 }
 0x383   : > { %v1670_v21 = vpop.f32.mrf.mxu3 }
 0x384   : > { %v1705_v6 = vadd.f32 %v1670_v21, %v5994_v57  ;;  %v6745_v57 = vld [vmem:[#allocation33_spill] sm:$0xff]  ;;  %v2625_v21 = vadd.f32 %v5936_v25, %v2363_v15 }
 0x385   : > { %v2102_v42 = vadd.f32 %v6745_v57, %v6023_v50 }
 0x386   : > { %v2131_v43 = vadd.f32 %v6049_v36, %v1705_v6 }
 0x387   : > { %v2364_v6 = vadd.f32 %v5867_v20, %v2102_v42  ;;  %v6747_v20 = vld [vmem:[#allocation35_spill] sm:$0xff] }
 0x388   : > { %v2393_v46 = vadd.f32 %v6186_v39, %v2131_v43 }
 0x389   : > { %v2626_v53 = vadd.f32 %v5949_v59, %v2364_v6 }
 0x38a   : > { %v6272_v52 = vadd.f32 %v2620_v31, %v2393_v46 }
 0x38b   : > { %v1672_v27 = vpop.f32.mrf.mxu3 }
 0x38c   : > { %v6277_v11 = vadd.f32 %v1672_v27, %v6004_v60  ;;  %v6746_v60 = vld [vmem:[#allocation34_spill] sm:$0xff] }
 0x38d   : > { %v2103_v46 = vadd.f32 %v6746_v60, %v6033_v16 }
 0x38f   : > { %v2365_v25 = vadd.f32 %v5875_v1, %v2103_v46  ;;  %v6302_v1 = vpop.f32.mrf.mxu1  ;;  %v6752_v46 = vld [vmem:[#allocation28_spill] sm:$0xff] }
 0x390   : > { %3133 = vmatmul.bf16.gmra.mxu3 %v5437_v62 }
 0x391   : > { %v2627_v16 = vadd.f32 %v5961_v19, %v2365_v25 }
 0x393   : > { %v3094_v36 = vpop.f32.mrf.mxu3 }
 0x394   : > { %v3174_v39 = vadd.f32 %v3094_v36, %v2625_v21 }
 0x396   : > { %v3436_v43 = vadd.f32 %v6074_v22, %v3174_v39  ;;  %v2104_v22 = vadd.f32 %v6747_v20, %v6042_v56  ;;  %v6750_v56 = vld [vmem:[#allocation36_spill] sm:$0xff] }
 0x397   : > { %v2105_v39 = vadd.f32 %v6750_v56, %v6053_v58  ;;  %v6754_v58 = vld [vmem:[#allocation75_spill] sm:$0xff] }
 0x398   : > { %v3698_v23 = vadd.f32 %v6202_v47, %v3436_v43  ;;  %v6748_v47 = vld [vmem:[#allocation54_spill] sm:$0xff] }
 0x399   : > { %v2366_v42 = vadd.f32 %v6748_v47, %v2104_v22  ;;  %v6758_v47 = vld [vmem:[#allocation83_spill] sm:$0xff] }
 0x39a   : > { %v3794_v33 = vmax.f32 %v3698_v23, 0.0 }
 0x39b   : > { %v3096_v31 = vpop.f32.mrf.mxu3 }
 0x39c   : > { %v3175_v62 = vadd.f32 %v3096_v31, %v2626_v53  ;;  %v6751_v31 = vld [vmem:[#allocation55_spill] sm:$0xff] }
 0x39d   : > { %v2367_v60 = vadd.f32 %v6751_v31, %v2105_v39  ;;  %v6763_v31 = vld [vmem:[#allocation85_spill] sm:$0xff] }
 0x39e   : > { %v3437_v27 = vadd.f32 %v6084_v9, %v3175_v62  ;;  %v6298_v9 = vpop.f32.mrf.mxu0  ;;  %v6753_v62 = vld [vmem:[#allocation37_spill] sm:$0xff] }
 0x39f   : > { %v2106_v23 = vadd.f32 %v6753_v62, %v6752_v46  ;;  %v2629_v20 = vadd.f32 %v6754_v58, %v2367_v60  ;;  %v6764_v60 = vld [vmem:[#allocation41_spill] sm:$0xff] }
 0x3a0   : > { %v3699_v50 = vadd.f32 %v6214_v0, %v3437_v27  ;;  %3138 = vmatmul.bf16.gmra.mxu3 %v5462_v54  ;;  %v6749_v54 = vld [vmem:[#allocation72_spill] sm:$0xff]  ;;  %v2108_v46 = vadd.f32 %v6764_v60, %v6763_v31 }
 0x3a1   : > { %v2628_v36 = vadd.f32 %v6749_v54, %v2366_v42  ;;  %v6759_v42 = vld [vmem:[#allocation38_spill] sm:$0xff] }
 0x3a2   : > { %v3795_v59 = vmax.f32 %v3699_v50, 0.0 }
 0x3a3   : > { %v3099_v29 = vpop.f32.mrf.mxu3 }
 0x3a4   : > { %v3826_v15 = vpack.c.bf16 %v3795_v59, %v3794_v33  ;;  %v3176_v57 = vadd.f32 %v3099_v29, %v2627_v16  ;;  %v6756_v59 = vld [vmem:[#allocation39_spill] sm:$0xff]  ;;  %v6757_v29 = vld [vmem:[#allocation78_spill] sm:$0xff] }
 0x3a6   : > { %3918 = vmatmul.bf16.vlgmr.msra.gmra.mxu2 %v3826_v15  ;;  %v3438_v0 = vadd.f32 %v6095_v14, %v3176_v57  ;;  %v6311_v14 = vpop.f32.mrf.mxu0 }
 0x3a8   : > { %v3700_v43 = vadd.f32 %v6221_v10, %v3438_v0  ;;  %v3640_v10 = vpop.f32.mrf.mxu1  ;;  %v2107_v0 = vadd.f32 %v6759_v42, %v6758_v47 }
 0x3aa   : > { %v3796_v27 = vmax.f32 %v3700_v43, 0.0  ;;  %v6761_v43 = vld [vmem:[#allocation24_spill] sm:$0xff] }
 0x3ab   : > { %v3101_v21 = vpop.f32.mrf.mxu3 }
 0x3ac   : > { %v3177_v6 = vadd.f32 %v3101_v21, %v2628_v36  ;;  %v6760_v21 = vld [vmem:[#allocation96_spill] sm:$0xff] }
 0x3ae   : > { %v3439_v19 = vadd.f32 %v6107_v44, %v3177_v6  ;;  %v6755_v44 = vld [vmem:[#allocation57_spill] sm:$0xff]  ;;  %v6319_v16 = vpop.f32.mrf.mxu0 }
 0x3b0   : > { %v3701_v53 = vadd.f32 %v6230_v49, %v3439_v19  ;;  %3143 = vmatmul.bf16.gmra.mxu3 %v6680_v63  ;;  %v2368_v49 = vadd.f32 %v6755_v44, %v2106_v23  ;;  %v6325_v39 = vpop.f32.mrf.mxu1  ;;  %v6762_v19 = vld [vmem:[#allocation59_spill] sm:$0xff] }
 0x3b2   : > { %v3797_v50 = vmax.f32 %v3701_v53, 0.0  ;;  %v2630_v15 = vadd.f32 %v6757_v29, %v2368_v49  ;;  %v2369_v53 = vadd.f32 %v6762_v19, %v2107_v0  ;;  %v6773_v19 = vld [vmem:[#allocation45_spill] sm:$0xff] }
 0x3b3   : > { %v3104_v25 = vpop.f32.mrf.mxu3 }
 0x3b4   : > { %v3827_v22 = vpack.c.bf16 %v3797_v50, %v3796_v27  ;;  %v3178_v33 = vadd.f32 %v3104_v25, %v2629_v20  ;;  %v6765_v50 = vld [vmem:[#allocation22_spill] sm:$0xff] }
 0x3b5   : > { %v2631_v25 = vadd.f32 %v6765_v50, %v2369_v53 }
 0x3b6   : > { %3923 = vmatmul.bf16.gmra.mxu2 %v3827_v22  ;;  %v3440_v63 = vadd.f32 %v6756_v59, %v3178_v33  ;;  %v6766_v22 = vld [vmem:[#allocation61_spill] sm:$0xff]  ;;  %v6768_v59 = vld [vmem:[#allocation23_spill] sm:$0xff] }
 0x3b7   : > { %v2370_v33 = vadd.f32 %v6766_v22, %v2108_v46 }
 0x3b8   : > { %v3702_v36 = vadd.f32 %v6239_v8, %v3440_v63  ;;  %v3383_v8 = vpop.f32.mrf.mxu0  ;;  %v3645_v44 = vpop.f32.mrf.mxu1 }
 0x3b9   : > { %v2632_v63 = vadd.f32 %v6768_v59, %v2370_v33  ;;  %v6777_v33 = vld [vmem:[#allocation92_spill] sm:$0xff] }
 0x3ba   : > { %v3798_v62 = vmax.f32 %v3702_v36, 0.0 }
 0x3bb   : > { %v3106_v57 = vpop.f32.mrf.mxu3 }
 0x3bc   : > { %v3179_v54 = vadd.f32 %v3106_v57, %v2630_v15  ;;  %v6769_v15 = vld [vmem:[#allocation87_spill] sm:$0xff] }
 0x3bd   : > { %v6770_v57 = vld [vmem:[#allocation43_spill] sm:$0xff] }
 0x3be   : > { %v3441_v56 = vadd.f32 %v6760_v21, %v3179_v54  ;;  %v2109_v47 = vadd.f32 %v6770_v57, %v6769_v15 }
 0x3c0   : > { %v3703_v6 = vadd.f32 %v6249_v5, %v3441_v56  ;;  %3148 = vmatmul.bf16.gmra.mxu3 %v6761_v43  ;;  %v6767_v5 = vld [vmem:[#allocation99_spill] sm:$0xff]  ;;  %v3386_v36 = vpop.f32.mrf.mxu0  ;;  %v6772_v43 = vld [vmem:[#allocation30_spill] sm:$0xff]  ;;  %v3648_v46 = vpop.f32.mrf.mxu1 }
 0x3c1   : > { %v6771_v56 = vld [vmem:[#allocation63_spill] sm:$0xff]  ;;  %v2110_v53 = vadd.f32 %v6773_v19, %v6772_v43  ;;  %v6782_v19 = vld [vmem:[#allocation81_spill] sm:$0xff] }
 0x3c2   : > { %v3799_v23 = vmax.f32 %v3703_v6, 0.0  ;;  %v2371_v6 = vadd.f32 %v6771_v56, %v2109_v47  ;;  %v6779_v47 = vld [vmem:[#allocation66_spill] sm:$0xff] }
 0x3c3   : > { %v3109_v27 = vpop.f32.mrf.mxu3 }
 0x3c4   : > { %v3828_v58 = vpack.c.bf16 %v3799_v23, %v3798_v62  ;;  %v3180_v20 = vadd.f32 %v3109_v27, %v2631_v25  ;;  %v6774_v23 = vld [vmem:[#allocation20_spill] sm:$0xff] }
 0x3c5   : > { %v2633_v27 = vadd.f32 %v6774_v23, %v2371_v6 }
 0x3c6   : > { %3928 = vmatmul.bf16.gmra.mxu2 %v3828_v58  ;;  %v3442_v49 = vadd.f32 %v6767_v5, %v3180_v20  ;;  %v6778_v5 = vld [vmem:[#allocation46_spill] sm:$0xff] }
 0x3c8   : > { %v3704_v0 = vadd.f32 %v6255_v7, %v3442_v49  ;;  %v3388_v58 = vpop.f32.mrf.mxu0  ;;  %v2111_v49 = vadd.f32 %v6778_v5, %v6777_v33  ;;  %v6787_v33 = vld [vmem:[#allocation70_spill] sm:$0xff] }
 0x3ca   : > { %v3800_v31 = vmax.f32 %v3704_v0, 0.0  ;;  %v6780_v0 = vld [vmem:[#allocation32_spill] sm:$0xff] }
 0x3cb   : > { %v3111_v29 = vpop.f32.mrf.mxu3 }
 0x3cc   : > { %v3181_v42 = vadd.f32 %v3111_v29, %v2632_v63  ;;  %v3650_v63 = vpop.f32.mrf.mxu1 }
 0x3ce   : > { %v3443_v54 = vadd.f32 %v6155_v55, %v3181_v42  ;;  %v6775_v55 = vld [vmem:[#allocation64_spill] sm:$0xff]  ;;  %v2373_v42 = vadd.f32 %v6779_v47, %v2111_v49 }
 0x3cf   : > { %v2372_v25 = vadd.f32 %v6775_v55, %v2110_v53 }
 0x3d0   : > { %v3705_v21 = vadd.f32 %v6266_v24, %v3443_v54  ;;  %3153 = vmatmul.bf16.gmra.mxu3 %v6694_v17  ;;  %v6776_v17 = vld [vmem:[#allocation29_spill] sm:$0xff]  ;;  %v6781_v54 = vld [vmem:[#allocation48_spill] sm:$0xff]  ;;  %v3391_v6 = vpop.f32.mrf.mxu0  ;;  %v2635_v53 = vadd.f32 %v6782_v19, %v2373_v42 }
 0x3d1   : > { %v2634_v20 = vadd.f32 %v6776_v17, %v2372_v25  ;;  %v6790_v42 = vld [vmem:[#allocation88_spill] sm:$0xff] }
 0x3d2   : > { %v3801_v60 = vmax.f32 %v3705_v21, 0.0 }
 0x3d3   : > { %v3114_v62 = vpop.f32.mrf.mxu3 }
 0x3d4   : > { %v3829_v50 = vpack.c.bf16 %v3801_v60, %v3800_v31  ;;  %v3182_v7 = vadd.f32 %v3114_v62, %v2633_v27 }
 0x3d6   : > { %3933 = vmatmul.bf16.gmra.mxu2 %v3829_v50  ;;  %v3444_v24 = vadd.f32 %v6298_v9, %v3182_v7  ;;  %v2112_v9 = vadd.f32 %v6781_v54, %v6780_v0  ;;  %v6785_v50 = vld [vmem:[#allocation42_spill] sm:$0xff]  ;;  %v6786_v7 = vld [vmem:[#allocation49_spill] sm:$0xff] }
 0x3d7   : > { %v2113_v55 = vadd.f32 %v6786_v7, %v6785_v50  ;;  %v6795_v50 = vld [vmem:[#allocation52_spill] sm:$0xff] }
 0x3d8   : > { %v3706_v29 = vadd.f32 %v6302_v1, %v3444_v24  ;;  %v6783_v1 = vld [vmem:[#allocation68_spill] sm:$0xff]  ;;  %v3393_v24 = vpop.f32.mrf.mxu0  ;;  %v2116_v7 = vadd.f32 %v6795_v50, %v6159_v48 }
 0x3d9   : > { %v2374_v62 = vadd.f32 %v6783_v1, %v2112_v9  ;;  %v2375_v5 = vadd.f32 %v6787_v33, %v2113_v55 }
 0x3da   : > { %v3802_v21 = vmax.f32 %v3706_v29, 0.0  ;;  %v6789_v29 = vld [vmem:[#allocation50_spill] sm:$0xff] }
 0x3db   : > { %v3116_v22 = vpop.f32.mrf.mxu3  ;;  %v2637_v0 = vadd.f32 %v6790_v42, %v2375_v5  ;;  %v6798_v5 = vld [vmem:[#allocation17_spill] sm:$0xff] }
 0x3dc   : > { %v3183_v59 = vadd.f32 %v3116_v22, %v2634_v20 }
 0x3de   : > { %v3445_v15 = vadd.f32 %v6311_v14, %v3183_v59  ;;  %v3653_v14 = vpop.f32.mrf.mxu1  ;;  %v6788_v59 = vld [vmem:[#allocation40_spill] sm:$0xff] }
 0x3e0   : > { %v3707_v57 = vadd.f32 %v3640_v10, %v3445_v15  ;;  %3158 = vmatmul.bf16.gmra.mxu3 %v5648_v41  ;;  %v6784_v41 = vld [vmem:[#allocation84_spill] sm:$0xff] }
 0x3e1   : > { %v2636_v23 = vadd.f32 %v6784_v41, %v2374_v62  ;;  %v6794_v41 = vld [vmem:[#allocation76_spill] sm:$0xff] }
 0x3e2   : > { %v3803_v56 = vmax.f32 %v3707_v57, 0.0 }
 0x3e3   : > { %v3119_v43 = vpop.f32.mrf.mxu3 }
 0x3e4   : > { %v3830_v31 = vpack.c.bf16 %v3803_v56, %v3802_v21  ;;  %v3184_v60 = vadd.f32 %v3119_v43, %v2635_v53  ;;  %v6791_v21 = vld [vmem:[#allocation73_spill] sm:$0xff]  ;;  %v6792_v56 = vld [vmem:[#allocation90_spill] sm:$0xff]  ;;  %v6793_v53 = vld [vmem:[#allocation51_spill] sm:$0xff] }
 0x3e6   : > { %3938 = vmatmul.bf16.gmra.mxu2 %v3830_v31  ;;  %v3446_v10 = vadd.f32 %v6319_v16, %v3184_v60  ;;  %v3655_v49 = vpop.f32.mrf.mxu1  ;;  %v2114_v16 = vadd.f32 %v6789_v29, %v6788_v59  ;;  %v2115_v31 = vadd.f32 %v6793_v53, %v6149_v28 }
 0x3e8   : > { %v3708_v17 = vadd.f32 %v6325_v39, %v3446_v10  ;;  %v2376_v39 = vadd.f32 %v6791_v21, %v2114_v16  ;;  %v6799_v16 = vld [vmem:[#allocation53_spill] sm:$0xff]  ;;  %v6801_v21 = vld [vmem:[#allocation56_spill] sm:$0xff] }
 0x3ea   : > { %v3804_v15 = vmax.f32 %v3708_v17, 0.0  ;;  %v6796_v17 = vld [vmem:[#allocation93_spill] sm:$0xff] }
 0x3eb   : > { %v3121_v27 = vpop.f32.mrf.mxu3 }
 0x3ec   : > { %v3185_v25 = vadd.f32 %v3121_v27, %v2636_v23  ;;  %v2377_v23 = vadd.f32 %v6794_v41, %v2115_v31 }
 0x3ee   : > { %v3447_v20 = vadd.f32 %v3383_v8, %v3185_v25  ;;  %v3396_v8 = vpop.f32.mrf.mxu0  ;;  %v3658_v43 = vpop.f32.mrf.mxu1 }
 0x3f0   : > { %v3709_v22 = vadd.f32 %v3645_v44, %v3447_v20  ;;  %3163 = vmatmul.bf16.gmra.mxu3 %v6705_v3  ;;  %v2638_v3 = vadd.f32 %v6792_v56, %v2376_v39  ;;  %v2639_v20 = vadd.f32 %v6796_v17, %v2377_v23  ;;  %v2118_v39 = vadd.f32 %v6801_v21, %v6175_v45  ;;  %v6391_v17 = vpop.f32.mrf.mxu2 }
 0x3f2   : > { %v3805_v57 = vmax.f32 %v3709_v22, 0.0 }
 0x3f3   : > { %v3124_v47 = vpop.f32.mrf.mxu3 }
 0x3f4   : > { %v3831_v54 = vpack.c.bf16 %v3805_v57, %v3804_v15  ;;  %v3186_v9 = vadd.f32 %v3124_v47, %v2637_v0  ;;  %v2117_v15 = vadd.f32 %v6799_v16, %v6170_v13  ;;  %v6803_v13 = vld [vmem:[#allocation21_spill] sm:$0xff] }
 0x3f6   : > { %3943 = vmatmul.bf16.gmra.mxu2 %v3831_v54  ;;  %v3448_v44 = vadd.f32 %v3386_v36, %v3186_v9  ;;  %v3398_v27 = vpop.f32.mrf.mxu0  ;;  %v3660_v33 = vpop.f32.mrf.mxu1  ;;  %v6800_v54 = vld [vmem:[#allocation19_spill] sm:$0xff] }
 0x3f7   : > { %v2379_v9 = vadd.f32 %v6800_v54, %v2117_v15  ;;  %v6809_v15 = vld [vmem:[#allocation47_spill] sm:$0xff] }
 0x3f8   : > { %v3710_v1 = vadd.f32 %v3648_v46, %v3448_v44  ;;  %v6797_v46 = vld [vmem:[#allocation27_spill] sm:$0xff] }
 0x3fa   : > { %v3806_v36 = vmax.f32 %v3710_v1, 0.0  ;;  %v2380_v1 = vadd.f32 %v6803_v13, %v2118_v39 }
 0x3fb   : > { %v3126_v19 = vpop.f32.mrf.mxu3 }
 0x3fc   : > { %v3187_v60 = vadd.f32 %v3126_v19, %v2638_v3  ;;  %v6802_v3 = vld [vmem:[#allocation97_spill] sm:$0xff] }
 0x3fd   : > { %v2641_v19 = vadd.f32 %v6802_v3, %v2379_v9  ;;  %v6811_v3 = vld [vmem:[#allocation82_spill] sm:$0xff] }
 0x3fe   : > { %v3449_v62 = vadd.f32 %v3388_v58, %v3187_v60  ;;  %v2378_v58 = vadd.f32 %v6797_v46, %v2116_v7  ;;  %v3401_v59 = vpop.f32.mrf.mxu0  ;;  %v3663_v42 = vpop.f32.mrf.mxu1 }
 0x400   : > { %v3711_v10 = vadd.f32 %v3650_v63, %v3449_v62  ;;  %3168 = vmatmul.bf16.gmra.mxu3 %v6712_v40  ;;  %v2640_v40 = vadd.f32 %v6798_v5, %v2378_v58  ;;  %v6807_v58 = vld [vmem:[#allocation44_spill] sm:$0xff] }
 0x402   : > { %v3807_v55 = vmax.f32 %v3711_v10, 0.0  ;;  %v6804_v10 = vld [vmem:[#allocation58_spill] sm:$0xff] }
 0x403   : > { %v3129_v25 = vpop.f32.mrf.mxu3  ;;  %v2119_v41 = vadd.f32 %v6804_v10, %v6182_v4 }
 0x404   : > { %v3832_v22 = vpack.c.bf16 %v3807_v55, %v3806_v36  ;;  %v3188_v28 = vadd.f32 %v3129_v25, %v2639_v20  ;;  %v6805_v55 = vld [vmem:[#allocation26_spill] sm:$0xff]  ;;  %v6806_v20 = vld [vmem:[#allocation60_spill] sm:$0xff] }
 0x405   : > { %v2381_v25 = vadd.f32 %v6805_v55, %v2119_v41 }
 0x406   : > { %3948 = vmatmul.bf16.gmra.mxu2 %v3832_v22  ;;  %v3450_v63 = vadd.f32 %v3391_v6, %v3188_v28  ;;  %v3403_v31 = vpop.f32.mrf.mxu0  ;;  %v2120_v22 = vadd.f32 %v6806_v20, %v6189_v38 }
 0x408   : > { %v3712_v57 = vadd.f32 %v3653_v14, %v3450_v63  ;;  %v3665_v14 = vpop.f32.mrf.mxu1  ;;  %v2643_v63 = vadd.f32 %v6807_v58, %v2381_v25 }
 0x40a   : > { %v3808_v44 = vmax.f32 %v3712_v57, 0.0 }
 0x40b   : > { %v3131_v29 = vpop.f32.mrf.mxu3 }
 0x40c   : > { %v3189_v48 = vadd.f32 %v3131_v29, %v2640_v40 }
 0x40e   : > { %v3451_v47 = vadd.f32 %v3393_v24, %v3189_v48  ;;  %v3406_v7 = vpop.f32.mrf.mxu0 }
 0x410   : > { %v3713_v0 = vadd.f32 %v3655_v49, %v3451_v47  ;;  %v2642_v49 = vadd.f32 %v6151_v34, %v2380_v1  ;;  %v3668_v46 = vpop.f32.mrf.mxu1  ;;  %v6810_v47 = vld [vmem:[#allocation62_spill] sm:$0xff] }
 0x412   : > { %v3809_v56 = vmax.f32 %v3713_v0, 0.0  ;;  %v2121_v0 = vadd.f32 %v6810_v47, %v6198_v12  ;;  %v6818_v47 = vld [vmem:[#allocation69_spill] sm:$0xff] }
 0x413   : > { %v3134_v6 = vpop.f32.mrf.mxu3 }
 0x414   : > { %v3833_v53 = vpack.c.bf16 %v3809_v56, %v3808_v44  ;;  %v3190_v60 = vadd.f32 %v3134_v6, %v2641_v19  ;;  %v4789_v44 = vld [vmem:[%s5185_s15] sm:$0xff]  ;;  %v2383_v19 = vadd.f32 %v6811_v3, %v2121_v0  ;;  %v2124_v0 = vadd.f32 %v6818_v47, %v6217_v18  ;;  %v6820_v3 = vld [vmem:[#allocation91_spill] sm:$0xff] }
 0x416   : > { %3953 = vmatmul.bf16.gmra.mxu2 %v3833_v53  ;;  %v3452_v24 = vadd.f32 %v3396_v8, %v3190_v60  ;;  %v3408_v40 = vpop.f32.mrf.mxu0  ;;  %v6812_v60 = vld [vmem:[#allocation65_spill] sm:$0xff] }
 0x417   : > { %v2122_v12 = vadd.f32 %v6812_v60, %v6205_v35 }
 0x418   : > { %v3714_v23 = vadd.f32 %v3658_v43, %v3452_v24  ;;  %v6399_v43 = vld [vmem:[%s6585_s6] ss:$0 sm:$0xff]  ;;  %v3670_v21 = vpop.f32.mrf.mxu1 }
 0x41a   : > { %v3810_v28 = vmax.f32 %v3714_v23, 0.0 }
 0x41b   : > { %v3136_v62 = vpop.f32.mrf.mxu3 }
 0x41c   : > { %v3191_v45 = vadd.f32 %v3136_v62, %v2642_v49  ;;  %v6813_v62 = vld [vmem:[#allocation102_spill] sm:$0xff] }
 0x41d   : > { %v2645_v10 = vadd.f32 %v6813_v62, %v2383_v19  ;;  %v2386_v19 = vadd.f32 %v6820_v3, %v2124_v0  ;;  %v6829_v3 = vld [vmem:[#allocation98_spill] sm:$0xff] }
 0x41e   : > { %v3453_v50 = vadd.f32 %v3398_v27, %v3191_v45  ;;  %v6808_v27 = vld [vmem:[#allocation79_spill] sm:$0xff]  ;;  %v3411_v24 = vpop.f32.mrf.mxu0  ;;  %v4790_v45 = vld [vmem:[%s5185_s15 + $0x8] sm:$0xff] }
 0x420   : > { %v3715_v36 = vadd.f32 %v3660_v33, %v3453_v50  ;;  %v2382_v33 = vadd.f32 %v6808_v27, %v2120_v22  ;;  %v6814_v50 = vld [vmem:[#allocation86_spill] sm:$0xff]  ;;  %v3673_v55 = vpop.f32.mrf.mxu1  ;;  %v6815_v22 = vld [vmem:[#allocation103_spill] sm:$0xff] }
 0x422   : > { %v3811_v8 = vmax.f32 %v3715_v36, 0.0  ;;  %v2644_v48 = vadd.f32 %v6809_v15, %v2382_v33  ;;  %v2384_v36 = vadd.f32 %v6814_v50, %v2122_v12  ;;  %v4791_v33 = vld [vmem:[%s5185_s15 + $0x10] sm:$0xff]  ;;  %v6817_v15 = vld [vmem:[#allocation89_spill] sm:$0xff] }
 0x423   : > { %v3139_v34 = vpop.f32.mrf.mxu3 }
 0x424   : > { %v3834_v5 = vpack.c.bf16 %v3811_v8, %v3810_v28  ;;  %v3192_v4 = vadd.f32 %v3139_v34, %v2643_v63  ;;  %v2646_v28 = vadd.f32 %v6815_v22, %v2384_v36  ;;  %v6816_v34 = vld [vmem:[#allocation67_spill] sm:$0xff]  ;;  %v6824_v22 = vld [vmem:[#allocation74_spill] sm:$0xff] }
 0x425   : > { %v2123_v58 = vadd.f32 %v6816_v34, %v6212_v37 }
 0x426   : > { %3958 = vmatmul.bf16.gmra.mxu2 %v3834_v5  ;;  %v3454_v29 = vadd.f32 %v3401_v59, %v3192_v4  ;;  %v3413_v4 = vpop.f32.mrf.mxu0 }
 0x428   : > { %v3716_v39 = vadd.f32 %v3663_v42, %v3454_v29 }
 0x429   : > { %v3919_v38 = vpop.f32.mrf.mxu2 }
 0x42a   : > { %v3920_v16 = vadd.f32 %v6399_v43, %v3919_v38  ;;  %v3812_v13 = vmax.f32 %v3716_v39, 0.0 }
 0x42b   : > { %v3141_v57 = vpop.f32.mrf.mxu3 }
 0x42c   : > { %v3999_v54 = vmax.f32 %v3920_v16, 0.0  ;;  %v3193_v9 = vadd.f32 %v3141_v57, %v2644_v48  ;;  %v3675_v48 = vpop.f32.mrf.mxu1 }
 0x42e   : > { %v4031_v56 = vadd.f32 %v4789_v44, %v3999_v54  ;;  %v3455_v6 = vadd.f32 %v3403_v31, %v3193_v9  ;;  %v6819_v44 = vld [vmem:[#allocation105_spill] sm:$0xff] }
 0x430   : > { %4063 = vst [vmem:[%s6409_s9] sm:$0xff] %v4031_v56  ;;  %v3717_v59 = vadd.f32 %v3665_v14, %v3455_v6 }
 0x431   : > { %v3921_v53 = vpop.f32.mrf.mxu2 }
 0x432   : > { %v3813_v1 = vmax.f32 %v3717_v59, 0.0  ;;  %v3922_v42 = vadd.f32 %v6399_v43, %v3921_v53  ;;  %v3416_v53 = vpop.f32.mrf.mxu0 }
 0x433   : > { %v3144_v49 = vpop.f32.mrf.mxu3 }
 0x434   : > { %v4000_v31 = vmax.f32 %v3922_v42, 0.0  ;;  %v3835_v41 = vpack.c.bf16 %v3813_v1, %v3812_v13  ;;  %v3194_v14 = vadd.f32 %v3144_v49, %v2645_v10  ;;  %v6821_v13 = vld [vmem:[#allocation106_spill] sm:$0xff]  ;;  %v3678_v42 = vpop.f32.mrf.mxu1 }
 0x435   : > { %v2648_v1 = vadd.f32 %v6821_v13, %v2386_v19 }
 0x436   : > { %v4032_v23 = vadd.f32 %v4790_v45, %v4000_v31  ;;  %3963 = vmatmul.bf16.gmra.mxu2 %v3835_v41  ;;  %v3456_v25 = vadd.f32 %v3406_v7, %v3194_v14  ;;  %v2385_v7 = vadd.f32 %v6817_v15, %v2123_v58  ;;  %v6822_v31 = vld [vmem:[#allocation71_spill] sm:$0xff] }
 0x437   : > { %v2125_v62 = vadd.f32 %v6822_v31, %v6226_v30  ;;  %v6832_v31 = vld [vmem:[#allocation109_spill] sm:$0xff] }
 0x438   : > { %4064 = vst [vmem:[%s6409_s9 + $0x8] sm:$0xff] %v4032_v23  ;;  %v3718_v27 = vadd.f32 %v3668_v46, %v3456_v25  ;;  %v2647_v56 = vadd.f32 %v6819_v44, %v2385_v7  ;;  %v4793_v23 = vld [vmem:[%s5185_s15 + $0x20] sm:$0xff] }
 0x439   : > { %v3924_v35 = vpop.f32.mrf.mxu2 }
 0x43a   : > { %v3925_v20 = vadd.f32 %v6399_v43, %v3924_v35  ;;  %v3814_v54 = vmax.f32 %v3718_v27, 0.0  ;;  %v6823_v35 = vld [vmem:[#allocation94_spill] sm:$0xff]  ;;  %v3418_v25 = vpop.f32.mrf.mxu0 }
 0x43b   : > { %v3146_v8 = vpop.f32.mrf.mxu3 }
 0x43c   : > { %v4001_v63 = vmax.f32 %v3925_v20, 0.0  ;;  %v3195_v5 = vadd.f32 %v3146_v8, %v2646_v28  ;;  %v2126_v28 = vadd.f32 %v6824_v22, %v6233_v51  ;;  %v6834_v22 = vld [vmem:[#allocation110_spill] sm:$0xff] }
 0x43e   : > { %v4033_v38 = vadd.f32 %v4791_v33, %v4001_v63  ;;  %v3457_v29 = vadd.f32 %v3408_v40, %v3195_v5  ;;  %v4792_v40 = vld [vmem:[%s5185_s15 + $0x18] sm:$0xff]  ;;  %v6825_v63 = vld [vmem:[#allocation107_spill] sm:$0xff]  ;;  %v4794_v33 = vld [vmem:[%s5185_s15 + $0x28] sm:$0xff] }
 0x440   : > { %4065 = vst [vmem:[%s6409_s9 + $0x10] sm:$0xff] %v4033_v38  ;;  %v3719_v16 = vadd.f32 %v3670_v21, %v3457_v29 }
 0x441   : > { %v3926_v57 = vpop.f32.mrf.mxu2 }
 0x442   : > { %v3815_v37 = vmax.f32 %v3719_v16, 0.0  ;;  %v3927_v9 = vadd.f32 %v6399_v43, %v3926_v57  ;;  %v6826_v16 = vld [vmem:[#allocation95_spill] sm:$0xff]  ;;  %v6827_v57 = vld [vmem:[#allocation108_spill] sm:$0xff]  ;;  %v3421_v0 = vpop.f32.mrf.mxu0 }
 0x443   : > { %v3149_v39 = vpop.f32.mrf.mxu3  ;;  %v2388_v15 = vadd.f32 %v6826_v16, %v2126_v28 }
 0x444   : > { %v4002_v46 = vmax.f32 %v3927_v9, 0.0  ;;  %v3836_v6 = vpack.c.bf16 %v3815_v37, %v3814_v54  ;;  %v3196_v21 = vadd.f32 %v3149_v39, %v2647_v56  ;;  %v6828_v37 = vld [vmem:[#allocation77_spill] sm:$0xff]  ;;  %v4795_v56 = vld [vmem:[%s5185_s15 + $0x30] sm:$0xff] }
 0x445   : > { %v2650_v47 = vadd.f32 %v6827_v57, %v2388_v15  ;;  %v2127_v9 = vadd.f32 %v6828_v37, %v6242_v26  ;;  %v4798_v37 = vld [vmem:[%s5185_s15 + $0x48] sm:$0xff] }
 0x446   : > { %v4034_v59 = vadd.f32 %v4792_v40, %v4002_v46  ;;  %3968 = vmatmul.bf16.gmra.mxu2 %v3836_v6  ;;  %v3458_v60 = vadd.f32 %v3411_v24, %v3196_v21  ;;  %v2387_v24 = vadd.f32 %v6823_v35, %v2125_v62 }
 0x447   : > { %v2389_v19 = vadd.f32 %v6829_v3, %v2127_v9 }
 0x448   : > { %4066 = vst [vmem:[%s6409_s9 + $0x18] sm:$0xff] %v4034_v59  ;;  %v3720_v45 = vadd.f32 %v3673_v55, %v3458_v60  ;;  %v2649_v5 = vadd.f32 %v6825_v63, %v2387_v24  ;;  %v6831_v60 = vld [vmem:[#allocation18_spill] sm:$0xff] }
 0x449   : > { %v3929_v18 = vpop.f32.mrf.mxu2  ;;  %v2651_v62 = vadd.f32 %v6832_v31, %v2389_v19 }
 0x44a   : > { %v3930_v12 = vadd.f32 %v6399_v43, %v3929_v18  ;;  %v3816_v8 = vmax.f32 %v3720_v45, 0.0  ;;  %v6830_v18 = vld [vmem:[#allocation111_spill] sm:$0xff]  ;;  %v4796_v45 = vld [vmem:[%s5185_s15 + $0x38] sm:$0xff] }
 0x44b   : > { %v3151_v49 = vpop.f32.mrf.mxu3 }
 0x44c   : > { %v4003_v10 = vmax.f32 %v3930_v12, 0.0  ;;  %v3197_v41 = vadd.f32 %v3151_v49, %v2648_v1  ;;  %v2128_v12 = vadd.f32 %v6831_v60, %v6830_v18 }
 0x44e   : > { %v4035_v14 = vadd.f32 %v4793_v23, %v4003_v10  ;;  %v3459_v50 = vadd.f32 %v3413_v4, %v3197_v41  ;;  %v3680_v4 = vpop.f32.mrf.mxu1  ;;  %v3423_v41 = vpop.f32.mrf.mxu0 }
 0x450   : > { %4067 = vst [vmem:[%s6409_s9 + $0x20] sm:$0xff] %v4035_v14  ;;  %v3721_v36 = vadd.f32 %v3675_v48, %v3459_v50  ;;  %v6833_v50 = vld [vmem:[#allocation100_spill] sm:$0xff] }
 0x451   : > { %v3931_v20 = vpop.f32.mrf.mxu2 }
 0x452   : > { %v3817_v34 = vmax.f32 %v3721_v36, 0.0  ;;  %v3932_v30 = vadd.f32 %v6399_v43, %v3931_v20  ;;  %v2390_v36 = vadd.f32 %v6833_v50, %v2128_v12 }
 0x453   : > { %v3154_v58 = vpop.f32.mrf.mxu3 }
 0x454   : > { %v4004_v55 = vmax.f32 %v3932_v30, 0.0  ;;  %v3837_v27 = vpack.c.bf16 %v3817_v34, %v3816_v8  ;;  %v3198_v29 = vadd.f32 %v3154_v58, %v2649_v5  ;;  %v2652_v28 = vadd.f32 %v6834_v22, %v2390_v36 }
 0x456   : > { %v4036_v38 = vadd.f32 %v4794_v33, %v4004_v55  ;;  %3973 = vmatmul.bf16.gmra.mxu2 %v3837_v27  ;;  %v3460_v7 = vadd.f32 %v3416_v53, %v3198_v29  ;;  %v3683_v59 = vpop.f32.mrf.mxu1  ;;  %v4797_v55 = vld [vmem:[%s5185_s15 + $0x40] sm:$0xff]  ;;  %v3426_v27 = vpop.f32.mrf.mxu0 }
 0x457   : > { %v6835_v29 = vld [vmem:[#allocation25_spill] sm:$0xff] }
 0x458   : > { %4068 = vst [vmem:[%s6409_s9 + $0x28] sm:$0xff] %v4036_v38  ;;  %v3722_v44 = vadd.f32 %v3678_v42, %v3460_v7  ;;  %v2130_v16 = vadd.f32 %v6835_v29, %v6261_v32  ;;  %v4802_v29 = vld [vmem:[%s5185_s15 + $0x68] sm:$0xff] }
 0x459   : > { %v3934_v51 = vpop.f32.mrf.mxu2 }
 0x45a   : > { %v3935_v48 = vadd.f32 %v6399_v43, %v3934_v51  ;;  %v3818_v13 = vmax.f32 %v3722_v44, 0.0 }
 0x45b   : > { %v3156_v54 = vpop.f32.mrf.mxu3 }
 0x45c   : > { %v4005_v39 = vmax.f32 %v3935_v48, 0.0  ;;  %v3199_v46 = vadd.f32 %v3156_v54, %v2650_v47 }
 0x45e   : > { %v4037_v6 = vadd.f32 %v4795_v56, %v4005_v39  ;;  %v3461_v40 = vadd.f32 %v3418_v25, %v3199_v46  ;;  %v3685_v35 = vpop.f32.mrf.mxu1  ;;  %v3428_v46 = vpop.f32.mrf.mxu0 }
 0x460   : > { %4069 = vst [vmem:[%s6409_s9 + $0x30] sm:$0xff] %v4037_v6  ;;  %v3723_v21 = vadd.f32 %v3680_v4, %v3461_v40 }
 0x461   : > { %v3936_v53 = vpop.f32.mrf.mxu2 }
 0x462   : > { %v3819_v1 = vmax.f32 %v3723_v21, 0.0  ;;  %v3937_v26 = vadd.f32 %v6399_v43, %v3936_v53  ;;  %v4799_v53 = vld [vmem:[%s5185_s15 + $0x50] sm:$0xff] }
 0x463   : > { %v3159_v49 = vpop.f32.mrf.mxu3 }
 0x464   : > { %v4006_v42 = vmax.f32 %v3937_v26, 0.0  ;;  %v3838_v10 = vpack.c.bf16 %v3819_v1, %v3818_v13  ;;  %v3200_v14 = vadd.f32 %v3159_v49, %v2651_v62  ;;  %v6837_v13 = vld [vmem:[#allocation80_spill] sm:$0xff] }
 0x465   : > { %v2132_v1 = vadd.f32 %v6837_v13, %v6277_v11 }
 0x466   : > { %v4038_v23 = vadd.f32 %v4796_v45, %v4006_v42  ;;  %3978 = vmatmul.bf16.gmra.mxu2 %v3838_v10  ;;  %v3462_v25 = vadd.f32 %v3421_v0, %v3200_v14  ;;  %v3688_v33 = vpop.f32.mrf.mxu1  ;;  %v6836_v0 = vld [vmem:[#allocation101_spill] sm:$0xff]  ;;  %v3431_v42 = vpop.f32.mrf.mxu0  ;;  %v6838_v45 = vld [vmem:[#allocation104_spill] sm:$0xff] }
 0x467   : > { %v2392_v54 = vadd.f32 %v6836_v0, %v2130_v16  ;;  %v4800_v14 = vld [vmem:[%s5185_s15 + $0x58] sm:$0xff] }
 0x468   : > { %4070 = vst [vmem:[%s6409_s9 + $0x38] sm:$0xff] %v4038_v23  ;;  %v3724_v58 = vadd.f32 %v3683_v59, %v3462_v25  ;;  %v2394_v23 = vadd.f32 %v6838_v45, %v2132_v1 }
 0x469   : > { %v3939_v24 = vpop.f32.mrf.mxu2  ;;  %v2654_v32 = vadd.f32 %v6263_v2, %v2392_v54 }
 0x46a   : > { %v3940_v20 = vadd.f32 %v6399_v43, %v3939_v24  ;;  %v3820_v15 = vmax.f32 %v3724_v58, 0.0 }
 0x46b   : > { %v3161_v8 = vpop.f32.mrf.mxu3 }
 0x46c   : > { %v4007_v34 = vmax.f32 %v3940_v20, 0.0  ;;  %v3201_v30 = vadd.f32 %v3161_v8, %v2652_v28 }
 0x46e   : > { %v4039_v63 = vadd.f32 %v4797_v55, %v4007_v34  ;;  %v3463_v5 = vadd.f32 %v3423_v41, %v3201_v30  ;;  %v3690_v40 = vpop.f32.mrf.mxu1  ;;  %v3433_v8 = vpop.f32.mrf.mxu0  ;;  %v4801_v30 = vld [vmem:[%s5185_s15 + $0x60] sm:$0xff] }
 0x470   : > { %4071 = vst [vmem:[%s6409_s9 + $0x40] sm:$0xff] %v4039_v63  ;;  %v3725_v4 = vadd.f32 %v3685_v35, %v3463_v5  ;;  %v2656_v35 = vadd.f32 %v6391_v17, %v2394_v23 }
 0x471   : > { %v3941_v38 = vpop.f32.mrf.mxu2 }
 0x472   : > { %v3821_v51 = vmax.f32 %v3725_v4, 0.0  ;;  %v3942_v7 = vadd.f32 %v6399_v43, %v3941_v38 }
 0x473   : > { %v3164_v48 = vpop.f32.mrf.mxu3 }
 0x474   : > { %v4008_v57 = vmax.f32 %v3942_v7, 0.0  ;;  %v3839_v47 = vpack.c.bf16 %v3821_v51, %v3820_v15  ;;  %v3202_v39 = vadd.f32 %v3164_v48, %v6258_v61  ;;  %v4803_v48 = vld [vmem:[%s5185_s15 + $0x70] sm:$0xff] }
 0x476   : > { %v4040_v9 = vadd.f32 %v4798_v37, %v4008_v57  ;;  %3983 = vmatmul.bf16.gmra.mxu2 %v3839_v47  ;;  %v3464_v56 = vadd.f32 %v3426_v27, %v3202_v39  ;;  %v3693_v41 = vpop.f32.mrf.mxu1  ;;  %v4804_v37 = vld [vmem:[%s5185_s15 + $0x78] sm:$0xff] }
 0x478   : > { %4072 = vst [vmem:[%s6409_s9 + $0x48] sm:$0xff] %v4040_v9  ;;  %v3726_v19 = vadd.f32 %v3688_v33, %v3464_v56 }
 0x479   : > { %v3944_v44 = vpop.f32.mrf.mxu2 }
 0x47a   : > { %v3945_v6 = vadd.f32 %v6399_v43, %v3944_v44  ;;  %v3822_v2 = vmax.f32 %v3726_v19, 0.0 }
 0x47b   : > { %v3166_v59 = vpop.f32.mrf.mxu3 }
 0x47c   : > { %v4009_v21 = vmax.f32 %v3945_v6, 0.0  ;;  %v3203_v3 = vadd.f32 %v3166_v59, %v2654_v32  ;;  %v4805_v32 = vld [vmem:[%s5185_s15 + $0x80] sm:$0xff] }
 0x47e   : > { %v4041_v18 = vadd.f32 %v4799_v53, %v4009_v21  ;;  %v3465_v60 = vadd.f32 %v3428_v46, %v3203_v3  ;;  %v4806_v21 = vld [vmem:[%s5185_s15 + $0x88] sm:$0xff] }
 0x480   : > { %4073 = vst [vmem:[%s6409_s9 + $0x50] sm:$0xff] %v4041_v18  ;;  %v3727_v61 = vadd.f32 %v3690_v40, %v3465_v60  ;;  %v4807_v60 = vld [vmem:[%s5185_s15 + $0x90] sm:$0xff] }
 0x481   : > { %v3946_v12 = vpop.f32.mrf.mxu2 }
 0x482   : > { %v3823_v26 = vmax.f32 %v3727_v61, 0.0  ;;  %v3947_v49 = vadd.f32 %v6399_v43, %v3946_v12 }
 0x483   : > { %v3169_v31 = vpop.f32.mrf.mxu3 }
 0x484   : > { %v4010_v62 = vmax.f32 %v3947_v49, 0.0  ;;  %v3840_v10 = vpack.c.bf16 %v3823_v26, %v3822_v2  ;;  %v3204_v36 = vadd.f32 %v3169_v31, %v6272_v52  ;;  %v3695_v52 = vpop.f32.mrf.mxu1  ;;  %v4808_v2 = vld [vmem:[%s5185_s15 + $0x98] sm:$0xff] }
 0x486   : > { %v4042_v50 = vadd.f32 %v4800_v14, %v4010_v62  ;;  %3988 = vmatmul.bf16.gmra.mxu2 %v3840_v10  ;;  %v3466_v24 = vadd.f32 %v3431_v42, %v3204_v36  ;;  %v4809_v62 = vld [vmem:[%s5185_s15 + $0xa0] sm:$0xff]  ;;  %v4810_v14 = vld [vmem:[%s5185_s15 + $0xa8] sm:$0xff] }
 0x488   : > { %4074 = vst [vmem:[%s6409_s9 + $0x58] sm:$0xff] %v4042_v50  ;;  %v3728_v34 = vadd.f32 %v3693_v41, %v3466_v24  ;;  %v4811_v24 = vld [vmem:[%s5185_s15 + $0xb0] sm:$0xff] }
 0x489   : > { %v3949_v11 = vpop.f32.mrf.mxu2 }
 0x48a   : > { %v3950_v25 = vadd.f32 %v6399_v43, %v3949_v11  ;;  %v3824_v17 = vmax.f32 %v3728_v34, 0.0 }
 0x48b   : > { %v3171_v20 = vpop.f32.mrf.mxu3 }
 0x48c   : > { %v4011_v22 = vmax.f32 %v3950_v25, 0.0  ;;  %v3205_v28 = vadd.f32 %v3171_v20, %v2656_v35 }
 0x48e   : > { %v4043_v58 = vadd.f32 %v4801_v30, %v4011_v22  ;;  %v3467_v55 = vadd.f32 %v3433_v8, %v3205_v28  ;;  %v4812_v8 = vld [vmem:[%s5185_s15 + $0xb8] sm:$0xff] }
 0x490   : > { %4075 = vst [vmem:[%s6409_s9 + $0x60] sm:$0xff] %v4043_v58  ;;  %v3729_v63 = vadd.f32 %v3695_v52, %v3467_v55  ;;  %v4813_v52 = vld [vmem:[%s5185_s15 + $0xc0] sm:$0xff] }
 0x491   : > { %v3951_v5 = vpop.f32.mrf.mxu2 }
 0x492   : > { %v3825_v27 = vmax.f32 %v3729_v63, 0.0  ;;  %v3952_v4 = vadd.f32 %v6399_v43, %v3951_v5 }
 0x494   : > { %v4012_v33 = vmax.f32 %v3952_v4, 0.0  ;;  %v3841_v38 = vpack.c.bf16 %v3825_v27, %v3824_v17  ;;  %v4814_v4 = vld [vmem:[%s5185_s15 + $0xc8] sm:$0xff] }
 0x496   : > { %v4044_v16 = vadd.f32 %v4802_v29, %v4012_v33  ;;  %3993 = vmatmul.bf16.gmra.mxu2 %v3841_v38 }
 0x498   : > { %4076 = vst [vmem:[%s6409_s9 + $0x68] sm:$0xff] %v4044_v16 }
 0x499   : > { %v3954_v15 = vpop.f32.mrf.mxu2 }
 0x49a   : > { %v3955_v51 = vadd.f32 %v6399_v43, %v3954_v15  ;;  %v4815_v15 = vld [vmem:[%s5185_s15 + $0xd0] sm:$0xff] }
 0x49c   : > { %v4013_v7 = vmax.f32 %v3955_v51, 0.0 }
 0x49e   : > { %v4045_v57 = vadd.f32 %v4803_v48, %v4013_v7 }
 0x4a0   : > { %4077 = vst [vmem:[%s6409_s9 + $0x70] sm:$0xff] %v4045_v57 }
 0x4a1   : > { %v3956_v47 = vpop.f32.mrf.mxu2 }
 0x4a2   : > { %v3957_v0 = vadd.f32 %v6399_v43, %v3956_v47  ;;  %v4816_v47 = vld [vmem:[%s5185_s15 + $0xd8] sm:$0xff] }
 0x4a4   : > { %v4014_v54 = vmax.f32 %v3957_v0, 0.0 }
 0x4a6   : > { %v4046_v9 = vadd.f32 %v4804_v37, %v4014_v54 }
 0x4a8   : > { %4078 = vst [vmem:[%s6409_s9 + $0x78] sm:$0xff] %v4046_v9 }
 0x4a9   : > { %v3959_v39 = vpop.f32.mrf.mxu2 }
 0x4aa   : > { %v3960_v46 = vadd.f32 %v6399_v43, %v3959_v39  ;;  %v4817_v39 = vld [vmem:[%s5185_s15 + $0xe0] sm:$0xff] }
 0x4ac   : > { %v4015_v44 = vmax.f32 %v3960_v46, 0.0 }
 0x4ae   : > { %v4047_v56 = vadd.f32 %v4805_v32, %v4015_v44 }
 0x4b0   : > { %4079 = vst [vmem:[%s6409_s9 + $0x80] sm:$0xff] %v4047_v56 }
 0x4b1   : > { %v3961_v6 = vpop.f32.mrf.mxu2 }
 0x4b2   : > { %v3962_v40 = vadd.f32 %v6399_v43, %v3961_v6  ;;  %v4818_v6 = vld [vmem:[%s5185_s15 + $0xe8] sm:$0xff] }
 0x4b4   : > { %v4016_v59 = vmax.f32 %v3962_v40, 0.0 }
 0x4b6   : > { %v4048_v3 = vadd.f32 %v4806_v21, %v4016_v59 }
 0x4b8   : > { %4080 = vst [vmem:[%s6409_s9 + $0x88] sm:$0xff] %v4048_v3 }
 0x4b9   : > { %v3964_v19 = vpop.f32.mrf.mxu2 }
 0x4ba   : > { %v3965_v53 = vadd.f32 %v6399_v43, %v3964_v19  ;;  %v4819_v19 = vld [vmem:[%s5185_s15 + $0xf0] sm:$0xff] }
 0x4bc   : > { %v4017_v18 = vmax.f32 %v3965_v53, 0.0 }
 0x4be   : > { %v4049_v61 = vadd.f32 %v4807_v60, %v4017_v18 }
 0x4c0   : > { %4081 = vst [vmem:[%s6409_s9 + $0x90] sm:$0xff] %v4049_v61 }
 0x4c1   : > { %v3966_v12 = vpop.f32.mrf.mxu2 }
 0x4c2   : > { %v3967_v13 = vadd.f32 %v6399_v43, %v3966_v12  ;;  %v4820_v12 = vld [vmem:[%s5185_s15 + $0xf8] sm:$0xff] }
 0x4c4   : > { %v4018_v1 = vmax.f32 %v3967_v13, 0.0 }
 0x4c6   : > { %v4050_v26 = vadd.f32 %v4808_v2, %v4018_v1 }
 0x4c8   : > { %4082 = vst [vmem:[%s6409_s9 + $0x98] sm:$0xff] %v4050_v26 }
 0x4c9   : > { %v3969_v49 = vpop.f32.mrf.mxu2 }
 0x4ca   : > { %v3970_v42 = vadd.f32 %v6399_v43, %v3969_v49 }
 0x4cc   : > { %v4019_v31 = vmax.f32 %v3970_v42, 0.0 }
 0x4ce   : > { %v4051_v10 = vadd.f32 %v4809_v62, %v4019_v31 }
 0x4d0   : > { %4083 = vst [vmem:[%s6409_s9 + $0xa0] sm:$0xff] %v4051_v10 }
 0x4d1   : > { %v3971_v41 = vpop.f32.mrf.mxu2 }
 0x4d2   : > { %v3972_v45 = vadd.f32 %v6399_v43, %v3971_v41 }
 0x4d4   : > { %v4020_v23 = vmax.f32 %v3972_v45, 0.0 }
 0x4d6   : > { %v4052_v50 = vadd.f32 %v4810_v14, %v4020_v23 }
 0x4d8   : > { %4084 = vst [vmem:[%s6409_s9 + $0xa8] sm:$0xff] %v4052_v50 }
 0x4d9   : > { %v3974_v36 = vpop.f32.mrf.mxu2 }
 0x4da   : > { %v3975_v11 = vadd.f32 %v6399_v43, %v3974_v36 }
 0x4dc   : > { %v4021_v35 = vmax.f32 %v3975_v11, 0.0 }
 0x4de   : > { %v4053_v25 = vadd.f32 %v4811_v24, %v4021_v35 }
 0x4e0   : > { %4085 = vst [vmem:[%s6409_s9 + $0xb0] sm:$0xff] %v4053_v25 }
 0x4e1   : > { %v3976_v20 = vpop.f32.mrf.mxu2 }
 0x4e2   : > { %v3977_v22 = vadd.f32 %v6399_v43, %v3976_v20 }
 0x4e4   : > { %v4022_v28 = vmax.f32 %v3977_v22, 0.0 }
 0x4e6   : > { %v4054_v34 = vadd.f32 %v4812_v8, %v4022_v28 }
 0x4e8   : > { %4086 = vst [vmem:[%s6409_s9 + $0xb8] sm:$0xff] %v4054_v34 }
 0x4e9   : > { %v3979_v30 = vpop.f32.mrf.mxu2 }
 0x4ea   : > { %v3980_v58 = vadd.f32 %v6399_v43, %v3979_v30 }
 0x4ec   : > { %v4023_v55 = vmax.f32 %v3980_v58, 0.0 }
 0x4ee   : > { %v4055_v63 = vadd.f32 %v4813_v52, %v4023_v55 }
 0x4f0   : > { %4087 = vst [vmem:[%s6409_s9 + $0xc0] sm:$0xff] %v4055_v63 }
 0x4f1   : > { %v3981_v5 = vpop.f32.mrf.mxu2 }
 0x4f2   : > { %v3982_v17 = vadd.f32 %v6399_v43, %v3981_v5 }
 0x4f4   : > { %v4024_v27 = vmax.f32 %v3982_v17, 0.0 }
 0x4f6   : > { %v4056_v33 = vadd.f32 %v4814_v4, %v4024_v27 }
 0x4f8   : > { %4088 = vst [vmem:[%s6409_s9 + $0xc8] sm:$0xff] %v4056_v33 }
 0x4f9   : > { %v3984_v38 = vpop.f32.mrf.mxu2 }
 0x4fa   : > { %v3985_v29 = vadd.f32 %v6399_v43, %v3984_v38 }
 0x4fc   : > { %v4025_v16 = vmax.f32 %v3985_v29, 0.0 }
 0x4fe   : > { %v4057_v51 = vadd.f32 %v4815_v15, %v4025_v16 }
 0x500   : > { %4089 = vst [vmem:[%s6409_s9 + $0xd0] sm:$0xff] %v4057_v51 }
 0x501   : > { %v3986_v7 = vpop.f32.mrf.mxu2 }
 0x502   : > { %v3987_v48 = vadd.f32 %v6399_v43, %v3986_v7 }
 0x504   : > { %v4026_v57 = vmax.f32 %v3987_v48, 0.0 }
 0x506   : > { %v4058_v0 = vadd.f32 %v4816_v47, %v4026_v57 }
 0x508   : > { %4090 = vst [vmem:[%s6409_s9 + $0xd8] sm:$0xff] %v4058_v0 }
 0x509   : > { %v3989_v54 = vpop.f32.mrf.mxu2 }
 0x50a   : > { %v3990_v37 = vadd.f32 %v6399_v43, %v3989_v54 }
 0x50c   : > { %v4027_v9 = vmax.f32 %v3990_v37, 0.0 }
 0x50e   : > { %v4059_v46 = vadd.f32 %v4817_v39, %v4027_v9 }
 0x510   : > { %4091 = vst [vmem:[%s6409_s9 + $0xe0] sm:$0xff] %v4059_v46 }
 0x511   : > { %v3991_v44 = vpop.f32.mrf.mxu2 }
 0x512   : > { %v3992_v32 = vadd.f32 %v6399_v43, %v3991_v44 }
 0x514   : > { %v4028_v56 = vmax.f32 %v3992_v32, 0.0 }
 0x516   : > { %v4060_v40 = vadd.f32 %v4818_v6, %v4028_v56 }
 0x518   : > { %4092 = vst [vmem:[%s6409_s9 + $0xe8] sm:$0xff] %v4060_v40 }
 0x519   : > { %v3994_v59 = vpop.f32.mrf.mxu2 }
 0x51a   : > { %v3995_v21 = vadd.f32 %v6399_v43, %v3994_v59 }
 0x51c   : > { %v4029_v3 = vmax.f32 %v3995_v21, 0.0 }
 0x51e   : > { %v4061_v53 = vadd.f32 %v4819_v19, %v4029_v3 }
 0x520   : > { %4093 = vst [vmem:[%s6409_s9 + $0xf0] sm:$0xff] %v4061_v53 }
 0x521   : > { %v3996_v18 = vpop.f32.mrf.mxu2 }
 0x522   : > { %v3997_v60 = vadd.f32 %v6399_v43, %v3996_v18 }
 0x524   : > { %v4030_v61 = vmax.f32 %v3997_v60, 0.0 }
 0x526   : > { %v4062_v13 = vadd.f32 %v4820_v12, %v4030_v61 }
 0x528   : > { %4094 = vst [vmem:[%s6409_s9 + $0xf8] sm:$0xff] %v4062_v13 }
 0x529   : > { %4968 = shalt.err (!%p4965_p10)
}
 0x52a   : > { %s5026_s22 = smov 128   ;;  %s5027_s15 = smov 8  }
 0x52b   : > { %4713 = dma.vmem_to_hbm [thread:$0]  (%p5151_p7), %s4109_s29, 4096, %s4111_s10, %s4096_s28, %s5026_s22, %s5026_s22, %s5027_s15  }
 0x52c PF: > { %s4125_s9 = sand.u32 1, %s5003_s24   ;;  %p6839_p12 = scmp.ge.s32.totalorder %s5015_s27, 2 }
 0x52d   : > { %s4126_s1 = scalar_lea.sflag [#allocation6], %s4125_s9 }
 0x52e   : > { %p4730_p13 = pnand %p6839_p12, %p5103_p6 }
 0x530   : > { %p4731_p0 = pneg %p4730_p13 }
 0x532   : > { %4998 = dma.done.wait (%p4731_p0), %s4126_s1, 4096  }
 0x533   : > { %5000 = vsyncadd (%p4731_p0), %s4126_s1, 4294963200  ;;  %p22_p3 = scmp.ge.s32.totalorder %s5135_s11, 4   ;;  %s6840_s24 = smov %s5007_s25 }
 0x534   : > { %s6841_s25 = smov %s5011_s26  ;;  %s6842_s26 = smov %s5147_s17 }
 0x535   : > { %s6843_s27 = smov %s5135_s11  ;;  %24 = sbr.rel (!%p22_p3) target bundleno = 9 (0x9), region = 115 }
 0x53a   :  { %4132 = vsyncpa [#allocation5], 1 }
 0x53b   :  { %4134 = vsyncpa [#allocation5 + $0x1], 1 }
 0x53c   :  { %4135 = vsyncpa [#allocation8], 1 }
 0x53d   :  { %4136 = vsyncpa [#allocation11], 1 }
 0x53e   :  { %4137 = vsyncpa [#allocation6], 1 }
 0x53f   :  { %4139 = vsyncpa [#allocation6 + $0x1], 1 }

</bundles_post_ra>
